<compile_context>
chip_gen: v7x
topology: tpu7x:2x2x1
jax: 0.10.0
libtpu: 0.0.40
codegen_flags: <defaults>
</compile_context>

<pallas_src>
import functools
import math

import jax
import jax.numpy as jnp
from jax import lax
from jax.experimental import pallas as pl

# ---- small synthetic BERT config ----
VOCAB = 100
HIDDEN = 32
N_LAYERS = 2
N_HEADS = 2
HEAD_DIM = HIDDEN // N_HEADS
INTER = 64
MAX_POS = 16
TYPE_VOCAB = 2
LN_EPS = 1e-12


# ---------------- in-kernel helpers ----------------
def _layer_norm(x, g, b):
    mu = jnp.mean(x, axis=-1, keepdims=True)
    xc = x - mu
    var = jnp.mean(xc * xc, axis=-1, keepdims=True)
    return xc * lax.rsqrt(var + LN_EPS) * g + b


def _gelu(y):
    # TODO(synk): HF BERT uses the exact erf-based GELU; tanh approximation used here.
    c = math.sqrt(2.0 / math.pi)
    return 0.5 * y * (1.0 + jnp.tanh(c * (y + 0.044715 * y * y * y)))


# ---------------- the single fused kernel ----------------
def _bert_mc_kernel(ids_ref, tt_ref, labels_ref,
                    wemb_ref, pemb_ref, temb_ref, embg_ref, embb_ref,
                    wq_ref, bq_ref, wk_ref, bk_ref, wv_ref, bv_ref,
                    wo_ref, bo_ref, ln1g_ref, ln1b_ref,
                    w1_ref, b1_ref, w2_ref, b2_ref, ln2g_ref, ln2b_ref,
                    poolw_ref, poolb_ref, clsw_ref, clsb_ref,
                    loss_ref, pred_ref, *, B, C, S):
    BC = B * C
    R = BC * S                      # all sequences flattened into one (R, HIDDEN) slab
    log2_s = S.bit_length() - 1     # S is a power of two (asserted in the wrapper)

    # ---- embeddings via one-hot MXU matmuls (gather-free, everything stays in VMEM) ----
    ids = ids_ref[...]                                               # (R, 1) int32
    tts = tt_ref[...]                                                # (R, 1) int32
    vcol = lax.broadcasted_iota(jnp.int32, (R, VOCAB), 1)
    x = jnp.dot((vcol == ids).astype(jnp.float32), wemb_ref[...],
                preferred_element_type=jnp.float32)
    row = lax.broadcasted_iota(jnp.int32, (R, MAX_POS), 0)
    pos = jnp.bitwise_and(row, S - 1)                                # position = row % S
    pcol = lax.broadcasted_iota(jnp.int32, (R, MAX_POS), 1)
    x = x + jnp.dot((pcol == pos).astype(jnp.float32), pemb_ref[...],
                    preferred_element_type=jnp.float32)
    tcol = lax.broadcasted_iota(jnp.int32, (R, TYPE_VOCAB), 1)
    x = x + jnp.dot((tcol == tts).astype(jnp.float32), temb_ref[...],
                    preferred_element_type=jnp.float32)
    h = _layer_norm(x, embg_ref[...], embb_ref[...])

    # ---- static block-diagonal mask: rows of different sequences never attend to each other ----
    rseq = lax.broadcasted_iota(jnp.int32, (R, R), 0) >> log2_s
    cseq = lax.broadcasted_iota(jnp.int32, (R, R), 1) >> log2_s
    neg_mask = jnp.where(rseq == cseq, 0.0, -1e30)
    # TODO(synk): no padding attention_mask applied (inputs here are fully valid sequences).
    scale = 1.0 / math.sqrt(HEAD_DIM)

    for l in range(N_LAYERS):
        attn = None
        for hd in range(N_HEADS):
            w = l * N_HEADS + hd
            q = jnp.dot(h, wq_ref[w], preferred_element_type=jnp.float32) + bq_ref[w]
            k = jnp.dot(h, wk_ref[w], preferred_element_type=jnp.float32) + bk_ref[w]
            v = jnp.dot(h, wv_ref[w], preferred_element_type=jnp.float32) + bv_ref[w]
            # q @ k^T over the whole slab, masked block-diagonally
            s = lax.dot_general(q, k, (((1,), (1,)), ((), ())),
                                preferred_element_type=jnp.float32) * scale + neg_mask
            m = jnp.max(s, axis=-1, keepdims=True)
            e = jnp.exp(s - m)
            p = e / jnp.sum(e, axis=-1, keepdims=True)               # exact softmax division
            ctx = jnp.dot(p, v, preferred_element_type=jnp.float32)  # (R, HEAD_DIM)
            o = jnp.dot(ctx, wo_ref[w], preferred_element_type=jnp.float32)
            attn = o if attn is None else attn + o                   # heads folded via their own Wo slice
        h = _layer_norm(attn + bo_ref[l] + h, ln1g_ref[l], ln1b_ref[l])

        ff = jnp.dot(h, w1_ref[l], preferred_element_type=jnp.float32) + b1_ref[l]
        ff = _gelu(ff)
        ff = jnp.dot(ff, w2_ref[l], preferred_element_type=jnp.float32) + b2_ref[l]
        h = _layer_norm(ff + h, ln2g_ref[l], ln2b_ref[l])

    # ---- pooler on [CLS] rows (row b*S of every sequence) via a small selection matmul ----
    srow = lax.broadcasted_iota(jnp.int32, (BC, R), 0)
    scol = lax.broadcasted_iota(jnp.int32, (BC, R), 1)
    sel = (scol == srow * S).astype(jnp.float32)                     # (BC, R)
    cls = jnp.dot(sel, h, preferred_element_type=jnp.float32)        # (BC, HIDDEN)
    pooled = jnp.tanh(jnp.dot(cls, poolw_ref[...],
                              preferred_element_type=jnp.float32) + poolb_ref[...])
    # TODO(synk): HF applies dropout before the classifier; omitted (deterministic eval).

    # ---- classifier + cross-entropy + argmax on a lane-dense (1, BC) logits row ----
    logits = lax.dot_general(clsw_ref[...], pooled, (((1,), (1,)), ((), ())),
                             preferred_element_type=jnp.float32) + clsb_ref[...]   # (1, BC)
    col = lax.broadcasted_iota(jnp.int32, (1, BC), 1)
    bcol = lax.broadcasted_iota(jnp.int32, (1, B), 1)
    labels = labels_ref[...]                                         # (B, 1) int32
    loss_acc = jnp.zeros((1, 1), jnp.float32)
    preds = jnp.zeros((1, B), jnp.int32)
    for b in range(B):
        in_b = (col >= b * C) & (col < (b + 1) * C)
        lg_b = jnp.where(in_b, logits, -1e30)
        m_b = jnp.max(lg_b, axis=-1, keepdims=True)
        e_b = jnp.exp(lg_b - m_b)
        lse_b = m_b + jnp.log(jnp.sum(e_b, axis=-1, keepdims=True))
        tgt_col = labels[b:b + 1, :] + b * C                         # (1, 1)
        correct = jnp.sum(jnp.where(col == tgt_col, logits, 0.0), axis=-1, keepdims=True)
        loss_acc = loss_acc + (lse_b - correct)
        is_max = jnp.logical_and(lg_b == m_b, in_b)
        idx_b = jnp.min(jnp.where(is_max, col - b * C, C), axis=-1, keepdims=True)
        preds = jnp.where(bcol == b, idx_b, preds)
    loss_ref[...] = loss_acc * (1.0 / B)
    pred_ref[...] = preds


# ---------------- wrapper: one pallas_call, plain-JAX glue only reshapes ids ----------------
def bert_choice_forward(params, input_ids, token_type_ids, labels):
    # Mirrors Bert_choice.forward: (loss.mean(), argmax over choices)
    B, C, S = input_ids.shape
    assert S & (S - 1) == 0 and S <= MAX_POS, "seq_len must be a power of two <= MAX_POS"
    BC = B * C
    R = BC * S
    flat_ids = input_ids.reshape(R, 1).astype(jnp.int32)
    flat_tt = token_type_ids.reshape(R, 1).astype(jnp.int32)
    labels2 = labels.reshape(B, 1).astype(jnp.int32)

    args = (flat_ids, flat_tt, labels2,
            params["word_emb"], params["pos_emb"], params["type_emb"],
            params["emb_ln_g"], params["emb_ln_b"],
            params["wq"], params["bq"], params["wk"], params["bk"],
            params["wv"], params["bv"], params["wo"], params["bo"],
            params["ln1_g"], params["ln1_b"],
            params["w1"], params["b1"], params["w2"], params["b2"],
            params["ln2_g"], params["ln2_b"],
            params["pool_w"], params["pool_b"],
            params["cls_w"], params["cls_b"])

    # advisory cost hint so XLA schedules the tiny custom call sensibly
    flops = (2 * R * (VOCAB + MAX_POS + TYPE_VOCAB) * HIDDEN
             + N_LAYERS * (N_HEADS * (6 * R * HIDDEN * HEAD_DIM
                                      + 4 * R * R * HEAD_DIM
                                      + 2 * R * HEAD_DIM * HIDDEN)
                           + 4 * R * HIDDEN * INTER)
             + 2 * BC * R * HIDDEN + 2 * BC * HIDDEN * HIDDEN + 2 * BC * HIDDEN)
    transc = N_LAYERS * (N_HEADS * R * R + R * INTER) + BC * HIDDEN + 4 * B
    bytes_accessed = sum(int(a.size) * a.dtype.itemsize for a in args) + 4 + 4 * B

    loss, preds = pl.pallas_call(
        functools.partial(_bert_mc_kernel, B=B, C=C, S=S),
        out_shape=(jax.ShapeDtypeStruct((1, 1), jnp.float32),
                   jax.ShapeDtypeStruct((1, B), jnp.int32)),
        cost_estimate=pl.CostEstimate(flops=flops, transcendentals=transc,
                                      bytes_accessed=bytes_accessed),
    )(*args)
    return loss[0, 0], preds[0]


def init_params(key):
    keys = jax.random.split(key, 12)
    it = iter(keys)

    def w(shape, scale=0.02):
        return jax.random.normal(next(it), shape, jnp.float32) * scale

    LH = N_LAYERS * N_HEADS
    return {
        "word_emb": w((VOCAB, HIDDEN)),
        "pos_emb": w((MAX_POS, HIDDEN)),
        "type_emb": w((TYPE_VOCAB, HIDDEN)),
        "emb_ln_g": jnp.ones((1, HIDDEN), jnp.float32),
        "emb_ln_b": jnp.zeros((1, HIDDEN), jnp.float32),
        # attention weights pre-split per (layer, head) so the kernel never lane-slices heads
        "wq": w((LH, HIDDEN, HEAD_DIM)),
        "bq": jnp.zeros((LH, 1, HEAD_DIM), jnp.float32),
        "wk": w((LH, HIDDEN, HEAD_DIM)),
        "bk": jnp.zeros((LH, 1, HEAD_DIM), jnp.float32),
        "wv": w((LH, HIDDEN, HEAD_DIM)),
        "bv": jnp.zeros((LH, 1, HEAD_DIM), jnp.float32),
        "wo": w((LH, HEAD_DIM, HIDDEN)),
        "bo": jnp.zeros((N_LAYERS, 1, HIDDEN), jnp.float32),
        "ln1_g": jnp.ones((N_LAYERS, 1, HIDDEN), jnp.float32),
        "ln1_b": jnp.zeros((N_LAYERS, 1, HIDDEN), jnp.float32),
        "w1": w((N_LAYERS, HIDDEN, INTER)),
        "b1": jnp.zeros((N_LAYERS, 1, INTER), jnp.float32),
        "w2": w((N_LAYERS, INTER, HIDDEN)),
        "b2": jnp.zeros((N_LAYERS, 1, HIDDEN), jnp.float32),
        "ln2_g": jnp.ones((N_LAYERS, 1, HIDDEN), jnp.float32),
        "ln2_b": jnp.zeros((N_LAYERS, 1, HIDDEN), jnp.float32),
        "pool_w": w((HIDDEN, HIDDEN)),
        "pool_b": jnp.zeros((1, HIDDEN), jnp.float32),
        "cls_w": w((1, HIDDEN)),          # stored (1, H) so logits come out as a lane-dense (1, BC) row
        "cls_b": jnp.zeros((1, 1), jnp.float32),
    }


if __name__ == "__main__":
    key = jax.random.PRNGKey(0)
    pkey, ikey, lkey = jax.random.split(key, 3)
    params = init_params(pkey)

    B, C, S = 2, 4, 8      # batch, num_choices, seq_len
    input_ids = jax.random.randint(ikey, (B, C, S), 0, VOCAB, dtype=jnp.int32)
    token_type_ids = jnp.zeros((B, C, S), jnp.int32)
    labels = jax.random.randint(lkey, (B,), 0, C, dtype=jnp.int32)

    loss, ids = jax.jit(bert_choice_forward)(params, input_ids, token_type_ids, labels)
    jax.block_until_ready((loss, ids))
    assert loss.shape == () and ids.shape == (B,)
    print("KERNEL_OK")
</pallas_src>

<mosaic_0001>
module attributes {stable_mosaic.version = 11 : i64} {
  func.func @_bert_mc_kernel(%arg0: memref<64x1xi32, #tpu.memory_space<vmem>>, %arg1: memref<64x1xi32, #tpu.memory_space<vmem>>, %arg2: memref<2x1xi32, #tpu.memory_space<vmem>>, %arg3: memref<100x32xf32, #tpu.memory_space<vmem>>, %arg4: memref<16x32xf32, #tpu.memory_space<vmem>>, %arg5: memref<2x32xf32, #tpu.memory_space<vmem>>, %arg6: memref<1x32xf32, #tpu.memory_space<vmem>>, %arg7: memref<1x32xf32, #tpu.memory_space<vmem>>, %arg8: memref<4x32x16xf32, #tpu.memory_space<vmem>>, %arg9: memref<4x1x16xf32, #tpu.memory_space<vmem>>, %arg10: memref<4x32x16xf32, #tpu.memory_space<vmem>>, %arg11: memref<4x1x16xf32, #tpu.memory_space<vmem>>, %arg12: memref<4x32x16xf32, #tpu.memory_space<vmem>>, %arg13: memref<4x1x16xf32, #tpu.memory_space<vmem>>, %arg14: memref<4x16x32xf32, #tpu.memory_space<vmem>>, %arg15: memref<2x1x32xf32, #tpu.memory_space<vmem>>, %arg16: memref<2x1x32xf32, #tpu.memory_space<vmem>>, %arg17: memref<2x1x32xf32, #tpu.memory_space<vmem>>, %arg18: memref<2x32x64xf32, #tpu.memory_space<vmem>>, %arg19: memref<2x1x64xf32, #tpu.memory_space<vmem>>, %arg20: memref<2x64x32xf32, #tpu.memory_space<vmem>>, %arg21: memref<2x1x32xf32, #tpu.memory_space<vmem>>, %arg22: memref<2x1x32xf32, #tpu.memory_space<vmem>>, %arg23: memref<2x1x32xf32, #tpu.memory_space<vmem>>, %arg24: memref<32x32xf32, #tpu.memory_space<vmem>>, %arg25: memref<1x32xf32, #tpu.memory_space<vmem>>, %arg26: memref<1x32xf32, #tpu.memory_space<vmem>>, %arg27: memref<1x1xf32, #tpu.memory_space<vmem>>, %arg28: memref<1x1xf32, #tpu.memory_space<vmem>>, %arg29: memref<1x2xi32, #tpu.memory_space<vmem>>) attributes {dimension_semantics = [], scalar_prefetch = 0 : i64, scratch_operands = 0 : i64, tpu.core_type = #tpu.core_type<tc>} {
    %c0 = arith.constant 0 : index
    %c0_0 = arith.constant 0 : index
    %0 = vector.load %arg0[%c0, %c0_0] : memref<64x1xi32, #tpu.memory_space<vmem>>, vector<64x1xi32>
    %c0_1 = arith.constant 0 : index
    %c0_2 = arith.constant 0 : index
    %1 = vector.load %arg1[%c0_1, %c0_2] : memref<64x1xi32, #tpu.memory_space<vmem>>, vector<64x1xi32>
    %2 = tpu.iota {dimensions = array<i32: 1>} : vector<64x100xi32>
    %3 = vector.broadcast %0 : vector<64x1xi32> to vector<64x100xi32>
    %4 = arith.cmpi eq, %2, %3 : vector<64x100xi32>
    %5 = arith.extui %4 : vector<64x100xi1> to vector<64x100xi32>
    %6 = arith.sitofp %5 : vector<64x100xi32> to vector<64x100xf32>
    %c0_3 = arith.constant 0 : index
    %c0_4 = arith.constant 0 : index
    %7 = vector.load %arg3[%c0_3, %c0_4] : memref<100x32xf32, #tpu.memory_space<vmem>>, vector<100x32xf32>
    %cst = arith.constant dense<0.000000e+00> : vector<64x32xf32>
    %8 = tpu.matmul %6, %7, %cst {dimension_numbers = #tpu.dot_dimension_numbers<[1], [0], [0], [1], [0, 0, 1, 1], [], []>} : vector<64x100xf32>, vector<100x32xf32>, vector<64x32xf32> -> vector<64x32xf32>
    %9 = tpu.iota {dimensions = array<i32: 0>} : vector<64x16xi32>
    %c7_i32 = arith.constant 7 : i32
    %10 = vector.broadcast %c7_i32 : i32 to vector<64x16xi32>
    %11 = arith.andi %9, %10 : vector<64x16xi32>
    %12 = tpu.iota {dimensions = array<i32: 1>} : vector<64x16xi32>
    %13 = arith.cmpi eq, %12, %11 : vector<64x16xi32>
    %14 = arith.extui %13 : vector<64x16xi1> to vector<64x16xi32>
    %15 = arith.sitofp %14 : vector<64x16xi32> to vector<64x16xf32>
    %c0_5 = arith.constant 0 : index
    %c0_6 = arith.constant 0 : index
    %16 = vector.load %arg4[%c0_5, %c0_6] : memref<16x32xf32, #tpu.memory_space<vmem>>, vector<16x32xf32>
    %cst_7 = arith.constant dense<0.000000e+00> : vector<64x32xf32>
    %17 = tpu.matmul %15, %16, %cst_7 {dimension_numbers = #tpu.dot_dimension_numbers<[1], [0], [0], [1], [0, 0, 1, 1], [], []>} : vector<64x16xf32>, vector<16x32xf32>, vector<64x32xf32> -> vector<64x32xf32>
    %18 = arith.addf %8, %17 : vector<64x32xf32>
    %19 = tpu.iota {dimensions = array<i32: 1>} : vector<64x2xi32>
    %20 = vector.broadcast %1 : vector<64x1xi32> to vector<64x2xi32>
    %21 = arith.cmpi eq, %19, %20 : vector<64x2xi32>
    %22 = arith.extui %21 : vector<64x2xi1> to vector<64x2xi32>
    %23 = arith.sitofp %22 : vector<64x2xi32> to vector<64x2xf32>
    %c0_8 = arith.constant 0 : index
    %c0_9 = arith.constant 0 : index
    %24 = vector.load %arg5[%c0_8, %c0_9] : memref<2x32xf32, #tpu.memory_space<vmem>>, vector<2x32xf32>
    %cst_10 = arith.constant dense<0.000000e+00> : vector<64x32xf32>
    %25 = tpu.matmul %23, %24, %cst_10 {dimension_numbers = #tpu.dot_dimension_numbers<[1], [0], [0], [1], [0, 0, 1, 1], [], []>} : vector<64x2xf32>, vector<2x32xf32>, vector<64x32xf32> -> vector<64x32xf32>
    %26 = arith.addf %18, %25 : vector<64x32xf32>
    %c0_11 = arith.constant 0 : index
    %c0_12 = arith.constant 0 : index
    %27 = vector.load %arg6[%c0_11, %c0_12] : memref<1x32xf32, #tpu.memory_space<vmem>>, vector<1x32xf32>
    %c0_13 = arith.constant 0 : index
    %c0_14 = arith.constant 0 : index
    %28 = vector.load %arg7[%c0_13, %c0_14] : memref<1x32xf32, #tpu.memory_space<vmem>>, vector<1x32xf32>
    %cst_15 = arith.constant dense<0.000000e+00> : vector<64xf32>
    %29 = vector.multi_reduction <add>, %26, %cst_15 [1] : vector<64x32xf32> to vector<64xf32>
    %30 = vector.shape_cast %29 : vector<64xf32> to vector<64x1xf32>
    %cst_16 = arith.constant 3.200000e+01 : f32
    %31 = vector.broadcast %cst_16 : f32 to vector<64x1xf32>
    %32 = arith.divf %30, %31 : vector<64x1xf32>
    %33 = vector.broadcast %32 : vector<64x1xf32> to vector<64x32xf32>
    %34 = arith.subf %26, %33 : vector<64x32xf32>
    %35 = arith.mulf %34, %34 : vector<64x32xf32>
    %cst_17 = arith.constant dense<0.000000e+00> : vector<64xf32>
    %36 = vector.multi_reduction <add>, %35, %cst_17 [1] : vector<64x32xf32> to vector<64xf32>
    %37 = vector.shape_cast %36 : vector<64xf32> to vector<64x1xf32>
    %cst_18 = arith.constant 3.200000e+01 : f32
    %38 = vector.broadcast %cst_18 : f32 to vector<64x1xf32>
    %39 = arith.divf %37, %38 : vector<64x1xf32>
    %cst_19 = arith.constant 9.99999996E-13 : f32
    %40 = vector.broadcast %cst_19 : f32 to vector<64x1xf32>
    %41 = arith.addf %39, %40 : vector<64x1xf32>
    %42 = math.rsqrt %41 : vector<64x1xf32>
    %43 = vector.broadcast %42 : vector<64x1xf32> to vector<64x32xf32>
    %44 = arith.mulf %34, %43 : vector<64x32xf32>
    %45 = vector.broadcast %27 : vector<1x32xf32> to vector<64x32xf32>
    %46 = arith.mulf %44, %45 : vector<64x32xf32>
    %47 = vector.broadcast %28 : vector<1x32xf32> to vector<64x32xf32>
    %48 = arith.addf %46, %47 : vector<64x32xf32>
    %49 = tpu.iota {dimensions = array<i32: 0>} : vector<64x64xi32>
    %c3_i32 = arith.constant 3 : i32
    %50 = vector.broadcast %c3_i32 : i32 to vector<64x64xi32>
    %51 = arith.shrsi %49, %50 : vector<64x64xi32>
    %52 = tpu.iota {dimensions = array<i32: 1>} : vector<64x64xi32>
    %c3_i32_20 = arith.constant 3 : i32
    %53 = vector.broadcast %c3_i32_20 : i32 to vector<64x64xi32>
    %54 = arith.shrsi %52, %53 : vector<64x64xi32>
    %55 = arith.cmpi eq, %51, %54 : vector<64x64xi32>
    %cst_21 = arith.constant 0.000000e+00 : f32
    %cst_22 = arith.constant -1.000000e+30 : f32
    %56 = vector.broadcast %cst_21 : f32 to vector<64x64xf32>
    %57 = vector.broadcast %cst_22 : f32 to vector<64x64xf32>
    %58 = arith.select %55, %56, %57 : vector<64x64xi1>, vector<64x64xf32>
    %c0_23 = arith.constant 0 : index
    %c0_24 = arith.constant 0 : index
    %c0_25 = arith.constant 0 : index
    %59 = vector.load %arg8[%c0_23, %c0_24, %c0_25] : memref<4x32x16xf32, #tpu.memory_space<vmem>>, vector<1x32x16xf32>
    %60 = vector.shape_cast %59 : vector<1x32x16xf32> to vector<32x16xf32>
    %cst_26 = arith.constant dense<0.000000e+00> : vector<64x16xf32>
    %61 = tpu.matmul %48, %60, %cst_26 {dimension_numbers = #tpu.dot_dimension_numbers<[1], [0], [0], [1], [0, 0, 1, 1], [], []>} : vector<64x32xf32>, vector<32x16xf32>, vector<64x16xf32> -> vector<64x16xf32>
    %c0_27 = arith.constant 0 : index
    %c0_28 = arith.constant 0 : index
    %c0_29 = arith.constant 0 : index
    %62 = vector.load %arg9[%c0_27, %c0_28, %c0_29] : memref<4x1x16xf32, #tpu.memory_space<vmem>>, vector<1x1x16xf32>
    %63 = vector.shape_cast %62 : vector<1x1x16xf32> to vector<1x16xf32>
    %64 = vector.broadcast %63 : vector<1x16xf32> to vector<64x16xf32>
    %65 = arith.addf %61, %64 : vector<64x16xf32>
    %c0_30 = arith.constant 0 : index
    %c0_31 = arith.constant 0 : index
    %c0_32 = arith.constant 0 : index
    %66 = vector.load %arg10[%c0_30, %c0_31, %c0_32] : memref<4x32x16xf32, #tpu.memory_space<vmem>>, vector<1x32x16xf32>
    %67 = vector.shape_cast %66 : vector<1x32x16xf32> to vector<32x16xf32>
    %cst_33 = arith.constant dense<0.000000e+00> : vector<64x16xf32>
    %68 = tpu.matmul %48, %67, %cst_33 {dimension_numbers = #tpu.dot_dimension_numbers<[1], [0], [0], [1], [0, 0, 1, 1], [], []>} : vector<64x32xf32>, vector<32x16xf32>, vector<64x16xf32> -> vector<64x16xf32>
    %c0_34 = arith.constant 0 : index
    %c0_35 = arith.constant 0 : index
    %c0_36 = arith.constant 0 : index
    %69 = vector.load %arg11[%c0_34, %c0_35, %c0_36] : memref<4x1x16xf32, #tpu.memory_space<vmem>>, vector<1x1x16xf32>
    %70 = vector.shape_cast %69 : vector<1x1x16xf32> to vector<1x16xf32>
    %71 = vector.broadcast %70 : vector<1x16xf32> to vector<64x16xf32>
    %72 = arith.addf %68, %71 : vector<64x16xf32>
    %c0_37 = arith.constant 0 : index
    %c0_38 = arith.constant 0 : index
    %c0_39 = arith.constant 0 : index
    %73 = vector.load %arg12[%c0_37, %c0_38, %c0_39] : memref<4x32x16xf32, #tpu.memory_space<vmem>>, vector<1x32x16xf32>
    %74 = vector.shape_cast %73 : vector<1x32x16xf32> to vector<32x16xf32>
    %cst_40 = arith.constant dense<0.000000e+00> : vector<64x16xf32>
    %75 = tpu.matmul %48, %74, %cst_40 {dimension_numbers = #tpu.dot_dimension_numbers<[1], [0], [0], [1], [0, 0, 1, 1], [], []>} : vector<64x32xf32>, vector<32x16xf32>, vector<64x16xf32> -> vector<64x16xf32>
    %c0_41 = arith.constant 0 : index
    %c0_42 = arith.constant 0 : index
    %c0_43 = arith.constant 0 : index
    %76 = vector.load %arg13[%c0_41, %c0_42, %c0_43] : memref<4x1x16xf32, #tpu.memory_space<vmem>>, vector<1x1x16xf32>
    %77 = vector.shape_cast %76 : vector<1x1x16xf32> to vector<1x16xf32>
    %78 = vector.broadcast %77 : vector<1x16xf32> to vector<64x16xf32>
    %79 = arith.addf %75, %78 : vector<64x16xf32>
    %cst_44 = arith.constant dense<0.000000e+00> : vector<64x64xf32>
    %80 = tpu.matmul %65, %72, %cst_44 {dimension_numbers = #tpu.dot_dimension_numbers<[1], [1], [0], [0], [0, 0, 1, 0], [], []>} : vector<64x16xf32>, vector<64x16xf32>, vector<64x64xf32> -> vector<64x64xf32>
    %cst_45 = arith.constant 2.500000e-01 : f32
    %81 = vector.broadcast %cst_45 : f32 to vector<64x64xf32>
    %82 = arith.mulf %80, %81 : vector<64x64xf32>
    %83 = arith.addf %82, %58 : vector<64x64xf32>
    %cst_46 = arith.constant dense<0xFF800000> : vector<64xf32>
    %84 = vector.multi_reduction <maximumf>, %83, %cst_46 [1] : vector<64x64xf32> to vector<64xf32>
    %85 = vector.shape_cast %84 : vector<64xf32> to vector<64x1xf32>
    %86 = vector.broadcast %85 : vector<64x1xf32> to vector<64x64xf32>
    %87 = arith.subf %83, %86 : vector<64x64xf32>
    %88 = math.exp %87 : vector<64x64xf32>
    %cst_47 = arith.constant dense<0.000000e+00> : vector<64xf32>
    %89 = vector.multi_reduction <add>, %88, %cst_47 [1] : vector<64x64xf32> to vector<64xf32>
    %90 = vector.shape_cast %89 : vector<64xf32> to vector<64x1xf32>
    %91 = vector.broadcast %90 : vector<64x1xf32> to vector<64x64xf32>
    %92 = arith.divf %88, %91 : vector<64x64xf32>
    %cst_48 = arith.constant dense<0.000000e+00> : vector<64x16xf32>
    %93 = tpu.matmul %92, %79, %cst_48 {dimension_numbers = #tpu.dot_dimension_numbers<[1], [0], [0], [1], [0, 0, 1, 1], [], []>} : vector<64x64xf32>, vector<64x16xf32>, vector<64x16xf32> -> vector<64x16xf32>
    %c0_49 = arith.constant 0 : index
    %c0_50 = arith.constant 0 : index
    %c0_51 = arith.constant 0 : index
    %94 = vector.load %arg14[%c0_49, %c0_50, %c0_51] : memref<4x16x32xf32, #tpu.memory_space<vmem>>, vector<1x16x32xf32>
    %95 = vector.shape_cast %94 : vector<1x16x32xf32> to vector<16x32xf32>
    %cst_52 = arith.constant dense<0.000000e+00> : vector<64x32xf32>
    %96 = tpu.matmul %93, %95, %cst_52 {dimension_numbers = #tpu.dot_dimension_numbers<[1], [0], [0], [1], [0, 0, 1, 1], [], []>} : vector<64x16xf32>, vector<16x32xf32>, vector<64x32xf32> -> vector<64x32xf32>
    %c1 = arith.constant 1 : index
    %c0_53 = arith.constant 0 : index
    %c0_54 = arith.constant 0 : index
    %97 = vector.load %arg8[%c1, %c0_53, %c0_54] : memref<4x32x16xf32, #tpu.memory_space<vmem>>, vector<1x32x16xf32>
    %98 = vector.shape_cast %97 : vector<1x32x16xf32> to vector<32x16xf32>
    %cst_55 = arith.constant dense<0.000000e+00> : vector<64x16xf32>
    %99 = tpu.matmul %48, %98, %cst_55 {dimension_numbers = #tpu.dot_dimension_numbers<[1], [0], [0], [1], [0, 0, 1, 1], [], []>} : vector<64x32xf32>, vector<32x16xf32>, vector<64x16xf32> -> vector<64x16xf32>
    %c1_56 = arith.constant 1 : index
    %c0_57 = arith.constant 0 : index
    %c0_58 = arith.constant 0 : index
    %100 = vector.load %arg9[%c1_56, %c0_57, %c0_58] : memref<4x1x16xf32, #tpu.memory_space<vmem>>, vector<1x1x16xf32>
    %101 = vector.shape_cast %100 : vector<1x1x16xf32> to vector<1x16xf32>
    %102 = vector.broadcast %101 : vector<1x16xf32> to vector<64x16xf32>
    %103 = arith.addf %99, %102 : vector<64x16xf32>
    %c1_59 = arith.constant 1 : index
    %c0_60 = arith.constant 0 : index
    %c0_61 = arith.constant 0 : index
    %104 = vector.load %arg10[%c1_59, %c0_60, %c0_61] : memref<4x32x16xf32, #tpu.memory_space<vmem>>, vector<1x32x16xf32>
    %105 = vector.shape_cast %104 : vector<1x32x16xf32> to vector<32x16xf32>
    %cst_62 = arith.constant dense<0.000000e+00> : vector<64x16xf32>
    %106 = tpu.matmul %48, %105, %cst_62 {dimension_numbers = #tpu.dot_dimension_numbers<[1], [0], [0], [1], [0, 0, 1, 1], [], []>} : vector<64x32xf32>, vector<32x16xf32>, vector<64x16xf32> -> vector<64x16xf32>
    %c1_63 = arith.constant 1 : index
    %c0_64 = arith.constant 0 : index
    %c0_65 = arith.constant 0 : index
    %107 = vector.load %arg11[%c1_63, %c0_64, %c0_65] : memref<4x1x16xf32, #tpu.memory_space<vmem>>, vector<1x1x16xf32>
    %108 = vector.shape_cast %107 : vector<1x1x16xf32> to vector<1x16xf32>
    %109 = vector.broadcast %108 : vector<1x16xf32> to vector<64x16xf32>
    %110 = arith.addf %106, %109 : vector<64x16xf32>
    %c1_66 = arith.constant 1 : index
    %c0_67 = arith.constant 0 : index
    %c0_68 = arith.constant 0 : index
    %111 = vector.load %arg12[%c1_66, %c0_67, %c0_68] : memref<4x32x16xf32, #tpu.memory_space<vmem>>, vector<1x32x16xf32>
    %112 = vector.shape_cast %111 : vector<1x32x16xf32> to vector<32x16xf32>
    %cst_69 = arith.constant dense<0.000000e+00> : vector<64x16xf32>
    %113 = tpu.matmul %48, %112, %cst_69 {dimension_numbers = #tpu.dot_dimension_numbers<[1], [0], [0], [1], [0, 0, 1, 1], [], []>} : vector<64x32xf32>, vector<32x16xf32>, vector<64x16xf32> -> vector<64x16xf32>
    %c1_70 = arith.constant 1 : index
    %c0_71 = arith.constant 0 : index
    %c0_72 = arith.constant 0 : index
    %114 = vector.load %arg13[%c1_70, %c0_71, %c0_72] : memref<4x1x16xf32, #tpu.memory_space<vmem>>, vector<1x1x16xf32>
    %115 = vector.shape_cast %114 : vector<1x1x16xf32> to vector<1x16xf32>
    %116 = vector.broadcast %115 : vector<1x16xf32> to vector<64x16xf32>
    %117 = arith.addf %113, %116 : vector<64x16xf32>
    %cst_73 = arith.constant dense<0.000000e+00> : vector<64x64xf32>
    %118 = tpu.matmul %103, %110, %cst_73 {dimension_numbers = #tpu.dot_dimension_numbers<[1], [1], [0], [0], [0, 0, 1, 0], [], []>} : vector<64x16xf32>, vector<64x16xf32>, vector<64x64xf32> -> vector<64x64xf32>
    %cst_74 = arith.constant 2.500000e-01 : f32
    %119 = vector.broadcast %cst_74 : f32 to vector<64x64xf32>
    %120 = arith.mulf %118, %119 : vector<64x64xf32>
    %121 = arith.addf %120, %58 : vector<64x64xf32>
    %cst_75 = arith.constant dense<0xFF800000> : vector<64xf32>
    %122 = vector.multi_reduction <maximumf>, %121, %cst_75 [1] : vector<64x64xf32> to vector<64xf32>
    %123 = vector.shape_cast %122 : vector<64xf32> to vector<64x1xf32>
    %124 = vector.broadcast %123 : vector<64x1xf32> to vector<64x64xf32>
    %125 = arith.subf %121, %124 : vector<64x64xf32>
    %126 = math.exp %125 : vector<64x64xf32>
    %cst_76 = arith.constant dense<0.000000e+00> : vector<64xf32>
    %127 = vector.multi_reduction <add>, %126, %cst_76 [1] : vector<64x64xf32> to vector<64xf32>
    %128 = vector.shape_cast %127 : vector<64xf32> to vector<64x1xf32>
    %129 = vector.broadcast %128 : vector<64x1xf32> to vector<64x64xf32>
    %130 = arith.divf %126, %129 : vector<64x64xf32>
    %cst_77 = arith.constant dense<0.000000e+00> : vector<64x16xf32>
    %131 = tpu.matmul %130, %117, %cst_77 {dimension_numbers = #tpu.dot_dimension_numbers<[1], [0], [0], [1], [0, 0, 1, 1], [], []>} : vector<64x64xf32>, vector<64x16xf32>, vector<64x16xf32> -> vector<64x16xf32>
    %c1_78 = arith.constant 1 : index
    %c0_79 = arith.constant 0 : index
    %c0_80 = arith.constant 0 : index
    %132 = vector.load %arg14[%c1_78, %c0_79, %c0_80] : memref<4x16x32xf32, #tpu.memory_space<vmem>>, vector<1x16x32xf32>
    %133 = vector.shape_cast %132 : vector<1x16x32xf32> to vector<16x32xf32>
    %cst_81 = arith.constant dense<0.000000e+00> : vector<64x32xf32>
    %134 = tpu.matmul %131, %133, %cst_81 {dimension_numbers = #tpu.dot_dimension_numbers<[1], [0], [0], [1], [0, 0, 1, 1], [], []>} : vector<64x16xf32>, vector<16x32xf32>, vector<64x32xf32> -> vector<64x32xf32>
    %135 = arith.addf %96, %134 : vector<64x32xf32>
    %c0_82 = arith.constant 0 : index
    %c0_83 = arith.constant 0 : index
    %c0_84 = arith.constant 0 : index
    %136 = vector.load %arg15[%c0_82, %c0_83, %c0_84] : memref<2x1x32xf32, #tpu.memory_space<vmem>>, vector<1x1x32xf32>
    %137 = vector.shape_cast %136 : vector<1x1x32xf32> to vector<1x32xf32>
    %138 = vector.broadcast %137 : vector<1x32xf32> to vector<64x32xf32>
    %139 = arith.addf %135, %138 : vector<64x32xf32>
    %140 = arith.addf %139, %48 : vector<64x32xf32>
    %c0_85 = arith.constant 0 : index
    %c0_86 = arith.constant 0 : index
    %c0_87 = arith.constant 0 : index
    %141 = vector.load %arg16[%c0_85, %c0_86, %c0_87] : memref<2x1x32xf32, #tpu.memory_space<vmem>>, vector<1x1x32xf32>
    %142 = vector.shape_cast %141 : vector<1x1x32xf32> to vector<1x32xf32>
    %c0_88 = arith.constant 0 : index
    %c0_89 = arith.constant 0 : index
    %c0_90 = arith.constant 0 : index
    %143 = vector.load %arg17[%c0_88, %c0_89, %c0_90] : memref<2x1x32xf32, #tpu.memory_space<vmem>>, vector<1x1x32xf32>
    %144 = vector.shape_cast %143 : vector<1x1x32xf32> to vector<1x32xf32>
    %cst_91 = arith.constant dense<0.000000e+00> : vector<64xf32>
    %145 = vector.multi_reduction <add>, %140, %cst_91 [1] : vector<64x32xf32> to vector<64xf32>
    %146 = vector.shape_cast %145 : vector<64xf32> to vector<64x1xf32>
    %cst_92 = arith.constant 3.200000e+01 : f32
    %147 = vector.broadcast %cst_92 : f32 to vector<64x1xf32>
    %148 = arith.divf %146, %147 : vector<64x1xf32>
    %149 = vector.broadcast %148 : vector<64x1xf32> to vector<64x32xf32>
    %150 = arith.subf %140, %149 : vector<64x32xf32>
    %151 = arith.mulf %150, %150 : vector<64x32xf32>
    %cst_93 = arith.constant dense<0.000000e+00> : vector<64xf32>
    %152 = vector.multi_reduction <add>, %151, %cst_93 [1] : vector<64x32xf32> to vector<64xf32>
    %153 = vector.shape_cast %152 : vector<64xf32> to vector<64x1xf32>
    %cst_94 = arith.constant 3.200000e+01 : f32
    %154 = vector.broadcast %cst_94 : f32 to vector<64x1xf32>
    %155 = arith.divf %153, %154 : vector<64x1xf32>
    %cst_95 = arith.constant 9.99999996E-13 : f32
    %156 = vector.broadcast %cst_95 : f32 to vector<64x1xf32>
    %157 = arith.addf %155, %156 : vector<64x1xf32>
    %158 = math.rsqrt %157 : vector<64x1xf32>
    %159 = vector.broadcast %158 : vector<64x1xf32> to vector<64x32xf32>
    %160 = arith.mulf %150, %159 : vector<64x32xf32>
    %161 = vector.broadcast %142 : vector<1x32xf32> to vector<64x32xf32>
    %162 = arith.mulf %160, %161 : vector<64x32xf32>
    %163 = vector.broadcast %144 : vector<1x32xf32> to vector<64x32xf32>
    %164 = arith.addf %162, %163 : vector<64x32xf32>
    %c0_96 = arith.constant 0 : index
    %c0_97 = arith.constant 0 : index
    %c0_98 = arith.constant 0 : index
    %165 = vector.load %arg18[%c0_96, %c0_97, %c0_98] : memref<2x32x64xf32, #tpu.memory_space<vmem>>, vector<1x32x64xf32>
    %166 = vector.shape_cast %165 : vector<1x32x64xf32> to vector<32x64xf32>
    %cst_99 = arith.constant dense<0.000000e+00> : vector<64x64xf32>
    %167 = tpu.matmul %164, %166, %cst_99 {dimension_numbers = #tpu.dot_dimension_numbers<[1], [0], [0], [1], [0, 0, 1, 1], [], []>} : vector<64x32xf32>, vector<32x64xf32>, vector<64x64xf32> -> vector<64x64xf32>
    %c0_100 = arith.constant 0 : index
    %c0_101 = arith.constant 0 : index
    %c0_102 = arith.constant 0 : index
    %168 = vector.load %arg19[%c0_100, %c0_101, %c0_102] : memref<2x1x64xf32, #tpu.memory_space<vmem>>, vector<1x1x64xf32>
    %169 = vector.shape_cast %168 : vector<1x1x64xf32> to vector<1x64xf32>
    %170 = vector.broadcast %169 : vector<1x64xf32> to vector<64x64xf32>
    %171 = arith.addf %167, %170 : vector<64x64xf32>
    %cst_103 = arith.constant 5.000000e-01 : f32
    %172 = vector.broadcast %cst_103 : f32 to vector<64x64xf32>
    %173 = arith.mulf %172, %171 : vector<64x64xf32>
    %cst_104 = arith.constant 4.471500e-02 : f32
    %174 = vector.broadcast %cst_104 : f32 to vector<64x64xf32>
    %175 = arith.mulf %174, %171 : vector<64x64xf32>
    %176 = arith.mulf %175, %171 : vector<64x64xf32>
    %177 = arith.mulf %176, %171 : vector<64x64xf32>
    %178 = arith.addf %171, %177 : vector<64x64xf32>
    %cst_105 = arith.constant 0.797884583 : f32
    %179 = vector.broadcast %cst_105 : f32 to vector<64x64xf32>
    %180 = arith.mulf %179, %178 : vector<64x64xf32>
    %181 = math.tanh %180 : vector<64x64xf32>
    %cst_106 = arith.constant 1.000000e+00 : f32
    %182 = vector.broadcast %cst_106 : f32 to vector<64x64xf32>
    %183 = arith.addf %182, %181 : vector<64x64xf32>
    %184 = arith.mulf %173, %183 : vector<64x64xf32>
    %c0_107 = arith.constant 0 : index
    %c0_108 = arith.constant 0 : index
    %c0_109 = arith.constant 0 : index
    %185 = vector.load %arg20[%c0_107, %c0_108, %c0_109] : memref<2x64x32xf32, #tpu.memory_space<vmem>>, vector<1x64x32xf32>
    %186 = vector.shape_cast %185 : vector<1x64x32xf32> to vector<64x32xf32>
    %cst_110 = arith.constant dense<0.000000e+00> : vector<64x32xf32>
    %187 = tpu.matmul %184, %186, %cst_110 {dimension_numbers = #tpu.dot_dimension_numbers<[1], [0], [0], [1], [0, 0, 1, 1], [], []>} : vector<64x64xf32>, vector<64x32xf32>, vector<64x32xf32> -> vector<64x32xf32>
    %c0_111 = arith.constant 0 : index
    %c0_112 = arith.constant 0 : index
    %c0_113 = arith.constant 0 : index
    %188 = vector.load %arg21[%c0_111, %c0_112, %c0_113] : memref<2x1x32xf32, #tpu.memory_space<vmem>>, vector<1x1x32xf32>
    %189 = vector.shape_cast %188 : vector<1x1x32xf32> to vector<1x32xf32>
    %190 = vector.broadcast %189 : vector<1x32xf32> to vector<64x32xf32>
    %191 = arith.addf %187, %190 : vector<64x32xf32>
    %192 = arith.addf %191, %164 : vector<64x32xf32>
    %c0_114 = arith.constant 0 : index
    %c0_115 = arith.constant 0 : index
    %c0_116 = arith.constant 0 : index
    %193 = vector.load %arg22[%c0_114, %c0_115, %c0_116] : memref<2x1x32xf32, #tpu.memory_space<vmem>>, vector<1x1x32xf32>
    %194 = vector.shape_cast %193 : vector<1x1x32xf32> to vector<1x32xf32>
    %c0_117 = arith.constant 0 : index
    %c0_118 = arith.constant 0 : index
    %c0_119 = arith.constant 0 : index
    %195 = vector.load %arg23[%c0_117, %c0_118, %c0_119] : memref<2x1x32xf32, #tpu.memory_space<vmem>>, vector<1x1x32xf32>
    %196 = vector.shape_cast %195 : vector<1x1x32xf32> to vector<1x32xf32>
    %cst_120 = arith.constant dense<0.000000e+00> : vector<64xf32>
    %197 = vector.multi_reduction <add>, %192, %cst_120 [1] : vector<64x32xf32> to vector<64xf32>
    %198 = vector.shape_cast %197 : vector<64xf32> to vector<64x1xf32>
    %cst_121 = arith.constant 3.200000e+01 : f32
    %199 = vector.broadcast %cst_121 : f32 to vector<64x1xf32>
    %200 = arith.divf %198, %199 : vector<64x1xf32>
    %201 = vector.broadcast %200 : vector<64x1xf32> to vector<64x32xf32>
    %202 = arith.subf %192, %201 : vector<64x32xf32>
    %203 = arith.mulf %202, %202 : vector<64x32xf32>
    %cst_122 = arith.constant dense<0.000000e+00> : vector<64xf32>
    %204 = vector.multi_reduction <add>, %203, %cst_122 [1] : vector<64x32xf32> to vector<64xf32>
    %205 = vector.shape_cast %204 : vector<64xf32> to vector<64x1xf32>
    %cst_123 = arith.constant 3.200000e+01 : f32
    %206 = vector.broadcast %cst_123 : f32 to vector<64x1xf32>
    %207 = arith.divf %205, %206 : vector<64x1xf32>
    %cst_124 = arith.constant 9.99999996E-13 : f32
    %208 = vector.broadcast %cst_124 : f32 to vector<64x1xf32>
    %209 = arith.addf %207, %208 : vector<64x1xf32>
    %210 = math.rsqrt %209 : vector<64x1xf32>
    %211 = vector.broadcast %210 : vector<64x1xf32> to vector<64x32xf32>
    %212 = arith.mulf %202, %211 : vector<64x32xf32>
    %213 = vector.broadcast %194 : vector<1x32xf32> to vector<64x32xf32>
    %214 = arith.mulf %212, %213 : vector<64x32xf32>
    %215 = vector.broadcast %196 : vector<1x32xf32> to vector<64x32xf32>
    %216 = arith.addf %214, %215 : vector<64x32xf32>
    %c2 = arith.constant 2 : index
    %c0_125 = arith.constant 0 : index
    %c0_126 = arith.constant 0 : index
    %217 = vector.load %arg8[%c2, %c0_125, %c0_126] : memref<4x32x16xf32, #tpu.memory_space<vmem>>, vector<1x32x16xf32>
    %218 = vector.shape_cast %217 : vector<1x32x16xf32> to vector<32x16xf32>
    %cst_127 = arith.constant dense<0.000000e+00> : vector<64x16xf32>
    %219 = tpu.matmul %216, %218, %cst_127 {dimension_numbers = #tpu.dot_dimension_numbers<[1], [0], [0], [1], [0, 0, 1, 1], [], []>} : vector<64x32xf32>, vector<32x16xf32>, vector<64x16xf32> -> vector<64x16xf32>
    %c2_128 = arith.constant 2 : index
    %c0_129 = arith.constant 0 : index
    %c0_130 = arith.constant 0 : index
    %220 = vector.load %arg9[%c2_128, %c0_129, %c0_130] : memref<4x1x16xf32, #tpu.memory_space<vmem>>, vector<1x1x16xf32>
    %221 = vector.shape_cast %220 : vector<1x1x16xf32> to vector<1x16xf32>
    %222 = vector.broadcast %221 : vector<1x16xf32> to vector<64x16xf32>
    %223 = arith.addf %219, %222 : vector<64x16xf32>
    %c2_131 = arith.constant 2 : index
    %c0_132 = arith.constant 0 : index
    %c0_133 = arith.constant 0 : index
    %224 = vector.load %arg10[%c2_131, %c0_132, %c0_133] : memref<4x32x16xf32, #tpu.memory_space<vmem>>, vector<1x32x16xf32>
    %225 = vector.shape_cast %224 : vector<1x32x16xf32> to vector<32x16xf32>
    %cst_134 = arith.constant dense<0.000000e+00> : vector<64x16xf32>
    %226 = tpu.matmul %216, %225, %cst_134 {dimension_numbers = #tpu.dot_dimension_numbers<[1], [0], [0], [1], [0, 0, 1, 1], [], []>} : vector<64x32xf32>, vector<32x16xf32>, vector<64x16xf32> -> vector<64x16xf32>
    %c2_135 = arith.constant 2 : index
    %c0_136 = arith.constant 0 : index
    %c0_137 = arith.constant 0 : index
    %227 = vector.load %arg11[%c2_135, %c0_136, %c0_137] : memref<4x1x16xf32, #tpu.memory_space<vmem>>, vector<1x1x16xf32>
    %228 = vector.shape_cast %227 : vector<1x1x16xf32> to vector<1x16xf32>
    %229 = vector.broadcast %228 : vector<1x16xf32> to vector<64x16xf32>
    %230 = arith.addf %226, %229 : vector<64x16xf32>
    %c2_138 = arith.constant 2 : index
    %c0_139 = arith.constant 0 : index
    %c0_140 = arith.constant 0 : index
    %231 = vector.load %arg12[%c2_138, %c0_139, %c0_140] : memref<4x32x16xf32, #tpu.memory_space<vmem>>, vector<1x32x16xf32>
    %232 = vector.shape_cast %231 : vector<1x32x16xf32> to vector<32x16xf32>
    %cst_141 = arith.constant dense<0.000000e+00> : vector<64x16xf32>
    %233 = tpu.matmul %216, %232, %cst_141 {dimension_numbers = #tpu.dot_dimension_numbers<[1], [0], [0], [1], [0, 0, 1, 1], [], []>} : vector<64x32xf32>, vector<32x16xf32>, vector<64x16xf32> -> vector<64x16xf32>
    %c2_142 = arith.constant 2 : index
    %c0_143 = arith.constant 0 : index
    %c0_144 = arith.constant 0 : index
    %234 = vector.load %arg13[%c2_142, %c0_143, %c0_144] : memref<4x1x16xf32, #tpu.memory_space<vmem>>, vector<1x1x16xf32>
    %235 = vector.shape_cast %234 : vector<1x1x16xf32> to vector<1x16xf32>
    %236 = vector.broadcast %235 : vector<1x16xf32> to vector<64x16xf32>
    %237 = arith.addf %233, %236 : vector<64x16xf32>
    %cst_145 = arith.constant dense<0.000000e+00> : vector<64x64xf32>
    %238 = tpu.matmul %223, %230, %cst_145 {dimension_numbers = #tpu.dot_dimension_numbers<[1], [1], [0], [0], [0, 0, 1, 0], [], []>} : vector<64x16xf32>, vector<64x16xf32>, vector<64x64xf32> -> vector<64x64xf32>
    %cst_146 = arith.constant 2.500000e-01 : f32
    %239 = vector.broadcast %cst_146 : f32 to vector<64x64xf32>
    %240 = arith.mulf %238, %239 : vector<64x64xf32>
    %241 = arith.addf %240, %58 : vector<64x64xf32>
    %cst_147 = arith.constant dense<0xFF800000> : vector<64xf32>
    %242 = vector.multi_reduction <maximumf>, %241, %cst_147 [1] : vector<64x64xf32> to vector<64xf32>
    %243 = vector.shape_cast %242 : vector<64xf32> to vector<64x1xf32>
    %244 = vector.broadcast %243 : vector<64x1xf32> to vector<64x64xf32>
    %245 = arith.subf %241, %244 : vector<64x64xf32>
    %246 = math.exp %245 : vector<64x64xf32>
    %cst_148 = arith.constant dense<0.000000e+00> : vector<64xf32>
    %247 = vector.multi_reduction <add>, %246, %cst_148 [1] : vector<64x64xf32> to vector<64xf32>
    %248 = vector.shape_cast %247 : vector<64xf32> to vector<64x1xf32>
    %249 = vector.broadcast %248 : vector<64x1xf32> to vector<64x64xf32>
    %250 = arith.divf %246, %249 : vector<64x64xf32>
    %cst_149 = arith.constant dense<0.000000e+00> : vector<64x16xf32>
    %251 = tpu.matmul %250, %237, %cst_149 {dimension_numbers = #tpu.dot_dimension_numbers<[1], [0], [0], [1], [0, 0, 1, 1], [], []>} : vector<64x64xf32>, vector<64x16xf32>, vector<64x16xf32> -> vector<64x16xf32>
    %c2_150 = arith.constant 2 : index
    %c0_151 = arith.constant 0 : index
    %c0_152 = arith.constant 0 : index
    %252 = vector.load %arg14[%c2_150, %c0_151, %c0_152] : memref<4x16x32xf32, #tpu.memory_space<vmem>>, vector<1x16x32xf32>
    %253 = vector.shape_cast %252 : vector<1x16x32xf32> to vector<16x32xf32>
    %cst_153 = arith.constant dense<0.000000e+00> : vector<64x32xf32>
    %254 = tpu.matmul %251, %253, %cst_153 {dimension_numbers = #tpu.dot_dimension_numbers<[1], [0], [0], [1], [0, 0, 1, 1], [], []>} : vector<64x16xf32>, vector<16x32xf32>, vector<64x32xf32> -> vector<64x32xf32>
    %c3 = arith.constant 3 : index
    %c0_154 = arith.constant 0 : index
    %c0_155 = arith.constant 0 : index
    %255 = vector.load %arg8[%c3, %c0_154, %c0_155] : memref<4x32x16xf32, #tpu.memory_space<vmem>>, vector<1x32x16xf32>
    %256 = vector.shape_cast %255 : vector<1x32x16xf32> to vector<32x16xf32>
    %cst_156 = arith.constant dense<0.000000e+00> : vector<64x16xf32>
    %257 = tpu.matmul %216, %256, %cst_156 {dimension_numbers = #tpu.dot_dimension_numbers<[1], [0], [0], [1], [0, 0, 1, 1], [], []>} : vector<64x32xf32>, vector<32x16xf32>, vector<64x16xf32> -> vector<64x16xf32>
    %c3_157 = arith.constant 3 : index
    %c0_158 = arith.constant 0 : index
    %c0_159 = arith.constant 0 : index
    %258 = vector.load %arg9[%c3_157, %c0_158, %c0_159] : memref<4x1x16xf32, #tpu.memory_space<vmem>>, vector<1x1x16xf32>
    %259 = vector.shape_cast %258 : vector<1x1x16xf32> to vector<1x16xf32>
    %260 = vector.broadcast %259 : vector<1x16xf32> to vector<64x16xf32>
    %261 = arith.addf %257, %260 : vector<64x16xf32>
    %c3_160 = arith.constant 3 : index
    %c0_161 = arith.constant 0 : index
    %c0_162 = arith.constant 0 : index
    %262 = vector.load %arg10[%c3_160, %c0_161, %c0_162] : memref<4x32x16xf32, #tpu.memory_space<vmem>>, vector<1x32x16xf32>
    %263 = vector.shape_cast %262 : vector<1x32x16xf32> to vector<32x16xf32>
    %cst_163 = arith.constant dense<0.000000e+00> : vector<64x16xf32>
    %264 = tpu.matmul %216, %263, %cst_163 {dimension_numbers = #tpu.dot_dimension_numbers<[1], [0], [0], [1], [0, 0, 1, 1], [], []>} : vector<64x32xf32>, vector<32x16xf32>, vector<64x16xf32> -> vector<64x16xf32>
    %c3_164 = arith.constant 3 : index
    %c0_165 = arith.constant 0 : index
    %c0_166 = arith.constant 0 : index
    %265 = vector.load %arg11[%c3_164, %c0_165, %c0_166] : memref<4x1x16xf32, #tpu.memory_space<vmem>>, vector<1x1x16xf32>
    %266 = vector.shape_cast %265 : vector<1x1x16xf32> to vector<1x16xf32>
    %267 = vector.broadcast %266 : vector<1x16xf32> to vector<64x16xf32>
    %268 = arith.addf %264, %267 : vector<64x16xf32>
    %c3_167 = arith.constant 3 : index
    %c0_168 = arith.constant 0 : index
    %c0_169 = arith.constant 0 : index
    %269 = vector.load %arg12[%c3_167, %c0_168, %c0_169] : memref<4x32x16xf32, #tpu.memory_space<vmem>>, vector<1x32x16xf32>
    %270 = vector.shape_cast %269 : vector<1x32x16xf32> to vector<32x16xf32>
    %cst_170 = arith.constant dense<0.000000e+00> : vector<64x16xf32>
    %271 = tpu.matmul %216, %270, %cst_170 {dimension_numbers = #tpu.dot_dimension_numbers<[1], [0], [0], [1], [0, 0, 1, 1], [], []>} : vector<64x32xf32>, vector<32x16xf32>, vector<64x16xf32> -> vector<64x16xf32>
    %c3_171 = arith.constant 3 : index
    %c0_172 = arith.constant 0 : index
    %c0_173 = arith.constant 0 : index
    %272 = vector.load %arg13[%c3_171, %c0_172, %c0_173] : memref<4x1x16xf32, #tpu.memory_space<vmem>>, vector<1x1x16xf32>
    %273 = vector.shape_cast %272 : vector<1x1x16xf32> to vector<1x16xf32>
    %274 = vector.broadcast %273 : vector<1x16xf32> to vector<64x16xf32>
    %275 = arith.addf %271, %274 : vector<64x16xf32>
    %cst_174 = arith.constant dense<0.000000e+00> : vector<64x64xf32>
    %276 = tpu.matmul %261, %268, %cst_174 {dimension_numbers = #tpu.dot_dimension_numbers<[1], [1], [0], [0], [0, 0, 1, 0], [], []>} : vector<64x16xf32>, vector<64x16xf32>, vector<64x64xf32> -> vector<64x64xf32>
    %cst_175 = arith.constant 2.500000e-01 : f32
    %277 = vector.broadcast %cst_175 : f32 to vector<64x64xf32>
    %278 = arith.mulf %276, %277 : vector<64x64xf32>
    %279 = arith.addf %278, %58 : vector<64x64xf32>
    %cst_176 = arith.constant dense<0xFF800000> : vector<64xf32>
    %280 = vector.multi_reduction <maximumf>, %279, %cst_176 [1] : vector<64x64xf32> to vector<64xf32>
    %281 = vector.shape_cast %280 : vector<64xf32> to vector<64x1xf32>
    %282 = vector.broadcast %281 : vector<64x1xf32> to vector<64x64xf32>
    %283 = arith.subf %279, %282 : vector<64x64xf32>
    %284 = math.exp %283 : vector<64x64xf32>
    %cst_177 = arith.constant dense<0.000000e+00> : vector<64xf32>
    %285 = vector.multi_reduction <add>, %284, %cst_177 [1] : vector<64x64xf32> to vector<64xf32>
    %286 = vector.shape_cast %285 : vector<64xf32> to vector<64x1xf32>
    %287 = vector.broadcast %286 : vector<64x1xf32> to vector<64x64xf32>
    %288 = arith.divf %284, %287 : vector<64x64xf32>
    %cst_178 = arith.constant dense<0.000000e+00> : vector<64x16xf32>
    %289 = tpu.matmul %288, %275, %cst_178 {dimension_numbers = #tpu.dot_dimension_numbers<[1], [0], [0], [1], [0, 0, 1, 1], [], []>} : vector<64x64xf32>, vector<64x16xf32>, vector<64x16xf32> -> vector<64x16xf32>
    %c3_179 = arith.constant 3 : index
    %c0_180 = arith.constant 0 : index
    %c0_181 = arith.constant 0 : index
    %290 = vector.load %arg14[%c3_179, %c0_180, %c0_181] : memref<4x16x32xf32, #tpu.memory_space<vmem>>, vector<1x16x32xf32>
    %291 = vector.shape_cast %290 : vector<1x16x32xf32> to vector<16x32xf32>
    %cst_182 = arith.constant dense<0.000000e+00> : vector<64x32xf32>
    %292 = tpu.matmul %289, %291, %cst_182 {dimension_numbers = #tpu.dot_dimension_numbers<[1], [0], [0], [1], [0, 0, 1, 1], [], []>} : vector<64x16xf32>, vector<16x32xf32>, vector<64x32xf32> -> vector<64x32xf32>
    %293 = arith.addf %254, %292 : vector<64x32xf32>
    %c1_183 = arith.constant 1 : index
    %c0_184 = arith.constant 0 : index
    %c0_185 = arith.constant 0 : index
    %294 = vector.load %arg15[%c1_183, %c0_184, %c0_185] : memref<2x1x32xf32, #tpu.memory_space<vmem>>, vector<1x1x32xf32>
    %295 = vector.shape_cast %294 : vector<1x1x32xf32> to vector<1x32xf32>
    %296 = vector.broadcast %295 : vector<1x32xf32> to vector<64x32xf32>
    %297 = arith.addf %293, %296 : vector<64x32xf32>
    %298 = arith.addf %297, %216 : vector<64x32xf32>
    %c1_186 = arith.constant 1 : index
    %c0_187 = arith.constant 0 : index
    %c0_188 = arith.constant 0 : index
    %299 = vector.load %arg16[%c1_186, %c0_187, %c0_188] : memref<2x1x32xf32, #tpu.memory_space<vmem>>, vector<1x1x32xf32>
    %300 = vector.shape_cast %299 : vector<1x1x32xf32> to vector<1x32xf32>
    %c1_189 = arith.constant 1 : index
    %c0_190 = arith.constant 0 : index
    %c0_191 = arith.constant 0 : index
    %301 = vector.load %arg17[%c1_189, %c0_190, %c0_191] : memref<2x1x32xf32, #tpu.memory_space<vmem>>, vector<1x1x32xf32>
    %302 = vector.shape_cast %301 : vector<1x1x32xf32> to vector<1x32xf32>
    %cst_192 = arith.constant dense<0.000000e+00> : vector<64xf32>
    %303 = vector.multi_reduction <add>, %298, %cst_192 [1] : vector<64x32xf32> to vector<64xf32>
    %304 = vector.shape_cast %303 : vector<64xf32> to vector<64x1xf32>
    %cst_193 = arith.constant 3.200000e+01 : f32
    %305 = vector.broadcast %cst_193 : f32 to vector<64x1xf32>
    %306 = arith.divf %304, %305 : vector<64x1xf32>
    %307 = vector.broadcast %306 : vector<64x1xf32> to vector<64x32xf32>
    %308 = arith.subf %298, %307 : vector<64x32xf32>
    %309 = arith.mulf %308, %308 : vector<64x32xf32>
    %cst_194 = arith.constant dense<0.000000e+00> : vector<64xf32>
    %310 = vector.multi_reduction <add>, %309, %cst_194 [1] : vector<64x32xf32> to vector<64xf32>
    %311 = vector.shape_cast %310 : vector<64xf32> to vector<64x1xf32>
    %cst_195 = arith.constant 3.200000e+01 : f32
    %312 = vector.broadcast %cst_195 : f32 to vector<64x1xf32>
    %313 = arith.divf %311, %312 : vector<64x1xf32>
    %cst_196 = arith.constant 9.99999996E-13 : f32
    %314 = vector.broadcast %cst_196 : f32 to vector<64x1xf32>
    %315 = arith.addf %313, %314 : vector<64x1xf32>
    %316 = math.rsqrt %315 : vector<64x1xf32>
    %317 = vector.broadcast %316 : vector<64x1xf32> to vector<64x32xf32>
    %318 = arith.mulf %308, %317 : vector<64x32xf32>
    %319 = vector.broadcast %300 : vector<1x32xf32> to vector<64x32xf32>
    %320 = arith.mulf %318, %319 : vector<64x32xf32>
    %321 = vector.broadcast %302 : vector<1x32xf32> to vector<64x32xf32>
    %322 = arith.addf %320, %321 : vector<64x32xf32>
    %c1_197 = arith.constant 1 : index
    %c0_198 = arith.constant 0 : index
    %c0_199 = arith.constant 0 : index
    %323 = vector.load %arg18[%c1_197, %c0_198, %c0_199] : memref<2x32x64xf32, #tpu.memory_space<vmem>>, vector<1x32x64xf32>
    %324 = vector.shape_cast %323 : vector<1x32x64xf32> to vector<32x64xf32>
    %cst_200 = arith.constant dense<0.000000e+00> : vector<64x64xf32>
    %325 = tpu.matmul %322, %324, %cst_200 {dimension_numbers = #tpu.dot_dimension_numbers<[1], [0], [0], [1], [0, 0, 1, 1], [], []>} : vector<64x32xf32>, vector<32x64xf32>, vector<64x64xf32> -> vector<64x64xf32>
    %c1_201 = arith.constant 1 : index
    %c0_202 = arith.constant 0 : index
    %c0_203 = arith.constant 0 : index
    %326 = vector.load %arg19[%c1_201, %c0_202, %c0_203] : memref<2x1x64xf32, #tpu.memory_space<vmem>>, vector<1x1x64xf32>
    %327 = vector.shape_cast %326 : vector<1x1x64xf32> to vector<1x64xf32>
    %328 = vector.broadcast %327 : vector<1x64xf32> to vector<64x64xf32>
    %329 = arith.addf %325, %328 : vector<64x64xf32>
    %cst_204 = arith.constant 5.000000e-01 : f32
    %330 = vector.broadcast %cst_204 : f32 to vector<64x64xf32>
    %331 = arith.mulf %330, %329 : vector<64x64xf32>
    %cst_205 = arith.constant 4.471500e-02 : f32
    %332 = vector.broadcast %cst_205 : f32 to vector<64x64xf32>
    %333 = arith.mulf %332, %329 : vector<64x64xf32>
    %334 = arith.mulf %333, %329 : vector<64x64xf32>
    %335 = arith.mulf %334, %329 : vector<64x64xf32>
    %336 = arith.addf %329, %335 : vector<64x64xf32>
    %cst_206 = arith.constant 0.797884583 : f32
    %337 = vector.broadcast %cst_206 : f32 to vector<64x64xf32>
    %338 = arith.mulf %337, %336 : vector<64x64xf32>
    %339 = math.tanh %338 : vector<64x64xf32>
    %cst_207 = arith.constant 1.000000e+00 : f32
    %340 = vector.broadcast %cst_207 : f32 to vector<64x64xf32>
    %341 = arith.addf %340, %339 : vector<64x64xf32>
    %342 = arith.mulf %331, %341 : vector<64x64xf32>
    %c1_208 = arith.constant 1 : index
    %c0_209 = arith.constant 0 : index
    %c0_210 = arith.constant 0 : index
    %343 = vector.load %arg20[%c1_208, %c0_209, %c0_210] : memref<2x64x32xf32, #tpu.memory_space<vmem>>, vector<1x64x32xf32>
    %344 = vector.shape_cast %343 : vector<1x64x32xf32> to vector<64x32xf32>
    %cst_211 = arith.constant dense<0.000000e+00> : vector<64x32xf32>
    %345 = tpu.matmul %342, %344, %cst_211 {dimension_numbers = #tpu.dot_dimension_numbers<[1], [0], [0], [1], [0, 0, 1, 1], [], []>} : vector<64x64xf32>, vector<64x32xf32>, vector<64x32xf32> -> vector<64x32xf32>
    %c1_212 = arith.constant 1 : index
    %c0_213 = arith.constant 0 : index
    %c0_214 = arith.constant 0 : index
    %346 = vector.load %arg21[%c1_212, %c0_213, %c0_214] : memref<2x1x32xf32, #tpu.memory_space<vmem>>, vector<1x1x32xf32>
    %347 = vector.shape_cast %346 : vector<1x1x32xf32> to vector<1x32xf32>
    %348 = vector.broadcast %347 : vector<1x32xf32> to vector<64x32xf32>
    %349 = arith.addf %345, %348 : vector<64x32xf32>
    %350 = arith.addf %349, %322 : vector<64x32xf32>
    %c1_215 = arith.constant 1 : index
    %c0_216 = arith.constant 0 : index
    %c0_217 = arith.constant 0 : index
    %351 = vector.load %arg22[%c1_215, %c0_216, %c0_217] : memref<2x1x32xf32, #tpu.memory_space<vmem>>, vector<1x1x32xf32>
    %352 = vector.shape_cast %351 : vector<1x1x32xf32> to vector<1x32xf32>
    %c1_218 = arith.constant 1 : index
    %c0_219 = arith.constant 0 : index
    %c0_220 = arith.constant 0 : index
    %353 = vector.load %arg23[%c1_218, %c0_219, %c0_220] : memref<2x1x32xf32, #tpu.memory_space<vmem>>, vector<1x1x32xf32>
    %354 = vector.shape_cast %353 : vector<1x1x32xf32> to vector<1x32xf32>
    %cst_221 = arith.constant dense<0.000000e+00> : vector<64xf32>
    %355 = vector.multi_reduction <add>, %350, %cst_221 [1] : vector<64x32xf32> to vector<64xf32>
    %356 = vector.shape_cast %355 : vector<64xf32> to vector<64x1xf32>
    %cst_222 = arith.constant 3.200000e+01 : f32
    %357 = vector.broadcast %cst_222 : f32 to vector<64x1xf32>
    %358 = arith.divf %356, %357 : vector<64x1xf32>
    %359 = vector.broadcast %358 : vector<64x1xf32> to vector<64x32xf32>
    %360 = arith.subf %350, %359 : vector<64x32xf32>
    %361 = arith.mulf %360, %360 : vector<64x32xf32>
    %cst_223 = arith.constant dense<0.000000e+00> : vector<64xf32>
    %362 = vector.multi_reduction <add>, %361, %cst_223 [1] : vector<64x32xf32> to vector<64xf32>
    %363 = vector.shape_cast %362 : vector<64xf32> to vector<64x1xf32>
    %cst_224 = arith.constant 3.200000e+01 : f32
    %364 = vector.broadcast %cst_224 : f32 to vector<64x1xf32>
    %365 = arith.divf %363, %364 : vector<64x1xf32>
    %cst_225 = arith.constant 9.99999996E-13 : f32
    %366 = vector.broadcast %cst_225 : f32 to vector<64x1xf32>
    %367 = arith.addf %365, %366 : vector<64x1xf32>
    %368 = math.rsqrt %367 : vector<64x1xf32>
    %369 = vector.broadcast %368 : vector<64x1xf32> to vector<64x32xf32>
    %370 = arith.mulf %360, %369 : vector<64x32xf32>
    %371 = vector.broadcast %352 : vector<1x32xf32> to vector<64x32xf32>
    %372 = arith.mulf %370, %371 : vector<64x32xf32>
    %373 = vector.broadcast %354 : vector<1x32xf32> to vector<64x32xf32>
    %374 = arith.addf %372, %373 : vector<64x32xf32>
    %375 = tpu.iota {dimensions = array<i32: 0>} : vector<8x64xi32>
    %376 = tpu.iota {dimensions = array<i32: 1>} : vector<8x64xi32>
    %c8_i32 = arith.constant 8 : i32
    %377 = vector.broadcast %c8_i32 : i32 to vector<8x64xi32>
    %378 = arith.muli %375, %377 : vector<8x64xi32>
    %379 = arith.cmpi eq, %376, %378 : vector<8x64xi32>
    %380 = arith.extui %379 : vector<8x64xi1> to vector<8x64xi32>
    %381 = arith.sitofp %380 : vector<8x64xi32> to vector<8x64xf32>
    %cst_226 = arith.constant dense<0.000000e+00> : vector<8x32xf32>
    %382 = tpu.matmul %381, %374, %cst_226 {dimension_numbers = #tpu.dot_dimension_numbers<[1], [0], [0], [1], [0, 0, 1, 1], [], []>} : vector<8x64xf32>, vector<64x32xf32>, vector<8x32xf32> -> vector<8x32xf32>
    %c0_227 = arith.constant 0 : index
    %c0_228 = arith.constant 0 : index
    %383 = vector.load %arg24[%c0_227, %c0_228] : memref<32x32xf32, #tpu.memory_space<vmem>>, vector<32x32xf32>
    %cst_229 = arith.constant dense<0.000000e+00> : vector<8x32xf32>
    %384 = tpu.matmul %382, %383, %cst_229 {dimension_numbers = #tpu.dot_dimension_numbers<[1], [0], [0], [1], [0, 0, 1, 1], [], []>} : vector<8x32xf32>, vector<32x32xf32>, vector<8x32xf32> -> vector<8x32xf32>
    %c0_230 = arith.constant 0 : index
    %c0_231 = arith.constant 0 : index
    %385 = vector.load %arg25[%c0_230, %c0_231] : memref<1x32xf32, #tpu.memory_space<vmem>>, vector<1x32xf32>
    %386 = vector.broadcast %385 : vector<1x32xf32> to vector<8x32xf32>
    %387 = arith.addf %384, %386 : vector<8x32xf32>
    %388 = math.tanh %387 : vector<8x32xf32>
    %c0_232 = arith.constant 0 : index
    %c0_233 = arith.constant 0 : index
    %389 = vector.load %arg26[%c0_232, %c0_233] : memref<1x32xf32, #tpu.memory_space<vmem>>, vector<1x32xf32>
    %cst_234 = arith.constant dense<0.000000e+00> : vector<1x8xf32>
    %390 = tpu.matmul %389, %388, %cst_234 {dimension_numbers = #tpu.dot_dimension_numbers<[1], [1], [0], [0], [0, 0, 1, 0], [], []>} : vector<1x32xf32>, vector<8x32xf32>, vector<1x8xf32> -> vector<1x8xf32>
    %c0_235 = arith.constant 0 : index
    %c0_236 = arith.constant 0 : index
    %391 = vector.load %arg27[%c0_235, %c0_236] : memref<1x1xf32, #tpu.memory_space<vmem>>, vector<1x1xf32>
    %392 = vector.broadcast %391 : vector<1x1xf32> to vector<1x8xf32>
    %393 = arith.addf %390, %392 : vector<1x8xf32>
    %394 = tpu.iota {dimensions = array<i32: 1>} : vector<1x8xi32>
    %395 = tpu.iota {dimensions = array<i32: 1>} : vector<1x2xi32>
    %c0_237 = arith.constant 0 : index
    %c0_238 = arith.constant 0 : index
    %396 = vector.load %arg2[%c0_237, %c0_238] : memref<2x1xi32, #tpu.memory_space<vmem>>, vector<2x1xi32>
    %cst_239 = arith.constant 0.000000e+00 : f32
    %397 = vector.broadcast %cst_239 : f32 to vector<1x1xf32>
    %c0_i32 = arith.constant 0 : i32
    %398 = vector.broadcast %c0_i32 : i32 to vector<1x2xi32>
    %c0_i32_240 = arith.constant 0 : i32
    %399 = vector.broadcast %c0_i32_240 : i32 to vector<1x8xi32>
    %400 = arith.cmpi sge, %394, %399 : vector<1x8xi32>
    %c4_i32 = arith.constant 4 : i32
    %401 = vector.broadcast %c4_i32 : i32 to vector<1x8xi32>
    %402 = arith.cmpi slt, %394, %401 : vector<1x8xi32>
    %403 = arith.andi %400, %402 : vector<1x8xi1>
    %cst_241 = arith.constant -1.000000e+30 : f32
    %404 = vector.broadcast %cst_241 : f32 to vector<1x8xf32>
    %405 = arith.select %403, %393, %404 : vector<1x8xi1>, vector<1x8xf32>
    %cst_242 = arith.constant dense<0xFF800000> : vector<1xf32>
    %406 = vector.multi_reduction <maximumf>, %405, %cst_242 [1] : vector<1x8xf32> to vector<1xf32>
    %407 = vector.shape_cast %406 : vector<1xf32> to vector<1x1xf32>
    %408 = vector.broadcast %407 : vector<1x1xf32> to vector<1x8xf32>
    %409 = arith.subf %405, %408 : vector<1x8xf32>
    %410 = math.exp %409 : vector<1x8xf32>
    %cst_243 = arith.constant dense<0.000000e+00> : vector<1xf32>
    %411 = vector.multi_reduction <add>, %410, %cst_243 [1] : vector<1x8xf32> to vector<1xf32>
    %412 = vector.shape_cast %411 : vector<1xf32> to vector<1x1xf32>
    %413 = math.log %412 : vector<1x1xf32>
    %414 = arith.addf %407, %413 : vector<1x1xf32>
    %415 = vector.extract_strided_slice %396 {offsets = [0, 0], sizes = [1, 1], strides = [1, 1]} : vector<2x1xi32> to vector<1x1xi32>
    %c0_i32_244 = arith.constant 0 : i32
    %416 = vector.broadcast %c0_i32_244 : i32 to vector<1x1xi32>
    %417 = arith.addi %415, %416 : vector<1x1xi32>
    %418 = vector.broadcast %417 : vector<1x1xi32> to vector<1x8xi32>
    %419 = arith.cmpi eq, %394, %418 : vector<1x8xi32>
    %cst_245 = arith.constant 0.000000e+00 : f32
    %420 = vector.broadcast %cst_245 : f32 to vector<1x8xf32>
    %421 = arith.select %419, %393, %420 : vector<1x8xi1>, vector<1x8xf32>
    %cst_246 = arith.constant dense<0.000000e+00> : vector<1xf32>
    %422 = vector.multi_reduction <add>, %421, %cst_246 [1] : vector<1x8xf32> to vector<1xf32>
    %423 = vector.shape_cast %422 : vector<1xf32> to vector<1x1xf32>
    %424 = arith.subf %414, %423 : vector<1x1xf32>
    %425 = arith.addf %397, %424 : vector<1x1xf32>
    %426 = vector.broadcast %407 : vector<1x1xf32> to vector<1x8xf32>
    %427 = arith.cmpf oeq, %405, %426 : vector<1x8xf32>
    %428 = arith.andi %427, %403 : vector<1x8xi1>
    %c0_i32_247 = arith.constant 0 : i32
    %429 = vector.broadcast %c0_i32_247 : i32 to vector<1x8xi32>
    %430 = arith.subi %394, %429 : vector<1x8xi32>
    %c4_i32_248 = arith.constant 4 : i32
    %431 = vector.broadcast %c4_i32_248 : i32 to vector<1x8xi32>
    %432 = arith.select %428, %430, %431 : vector<1x8xi1>, vector<1x8xi32>
    %cst_249 = arith.constant dense<2147483647> : vector<1xi32>
    %433 = vector.multi_reduction <minsi>, %432, %cst_249 [1] : vector<1x8xi32> to vector<1xi32>
    %434 = vector.shape_cast %433 : vector<1xi32> to vector<1x1xi32>
    %c0_i32_250 = arith.constant 0 : i32
    %435 = vector.broadcast %c0_i32_250 : i32 to vector<1x2xi32>
    %436 = arith.cmpi eq, %395, %435 : vector<1x2xi32>
    %437 = vector.shape_cast %434 : vector<1x1xi32> to vector<1x1xi32>
    %438 = vector.broadcast %437 : vector<1x1xi32> to vector<1x2xi32>
    %439 = arith.select %436, %438, %398 : vector<1x2xi1>, vector<1x2xi32>
    %c4_i32_251 = arith.constant 4 : i32
    %440 = vector.broadcast %c4_i32_251 : i32 to vector<1x8xi32>
    %441 = arith.cmpi sge, %394, %440 : vector<1x8xi32>
    %c8_i32_252 = arith.constant 8 : i32
    %442 = vector.broadcast %c8_i32_252 : i32 to vector<1x8xi32>
    %443 = arith.cmpi slt, %394, %442 : vector<1x8xi32>
    %444 = arith.andi %441, %443 : vector<1x8xi1>
    %cst_253 = arith.constant -1.000000e+30 : f32
    %445 = vector.broadcast %cst_253 : f32 to vector<1x8xf32>
    %446 = arith.select %444, %393, %445 : vector<1x8xi1>, vector<1x8xf32>
    %cst_254 = arith.constant dense<0xFF800000> : vector<1xf32>
    %447 = vector.multi_reduction <maximumf>, %446, %cst_254 [1] : vector<1x8xf32> to vector<1xf32>
    %448 = vector.shape_cast %447 : vector<1xf32> to vector<1x1xf32>
    %449 = vector.broadcast %448 : vector<1x1xf32> to vector<1x8xf32>
    %450 = arith.subf %446, %449 : vector<1x8xf32>
    %451 = math.exp %450 : vector<1x8xf32>
    %cst_255 = arith.constant dense<0.000000e+00> : vector<1xf32>
    %452 = vector.multi_reduction <add>, %451, %cst_255 [1] : vector<1x8xf32> to vector<1xf32>
    %453 = vector.shape_cast %452 : vector<1xf32> to vector<1x1xf32>
    %454 = math.log %453 : vector<1x1xf32>
    %455 = arith.addf %448, %454 : vector<1x1xf32>
    %456 = vector.extract_strided_slice %396 {offsets = [1, 0], sizes = [1, 1], strides = [1, 1]} : vector<2x1xi32> to vector<1x1xi32>
    %c4_i32_256 = arith.constant 4 : i32
    %457 = vector.broadcast %c4_i32_256 : i32 to vector<1x1xi32>
    %458 = arith.addi %456, %457 : vector<1x1xi32>
    %459 = vector.broadcast %458 : vector<1x1xi32> to vector<1x8xi32>
    %460 = arith.cmpi eq, %394, %459 : vector<1x8xi32>
    %cst_257 = arith.constant 0.000000e+00 : f32
    %461 = vector.broadcast %cst_257 : f32 to vector<1x8xf32>
    %462 = arith.select %460, %393, %461 : vector<1x8xi1>, vector<1x8xf32>
    %cst_258 = arith.constant dense<0.000000e+00> : vector<1xf32>
    %463 = vector.multi_reduction <add>, %462, %cst_258 [1] : vector<1x8xf32> to vector<1xf32>
    %464 = vector.shape_cast %463 : vector<1xf32> to vector<1x1xf32>
    %465 = arith.subf %455, %464 : vector<1x1xf32>
    %466 = arith.addf %425, %465 : vector<1x1xf32>
    %467 = vector.broadcast %448 : vector<1x1xf32> to vector<1x8xf32>
    %468 = arith.cmpf oeq, %446, %467 : vector<1x8xf32>
    %469 = arith.andi %468, %444 : vector<1x8xi1>
    %c4_i32_259 = arith.constant 4 : i32
    %470 = vector.broadcast %c4_i32_259 : i32 to vector<1x8xi32>
    %471 = arith.subi %394, %470 : vector<1x8xi32>
    %c4_i32_260 = arith.constant 4 : i32
    %472 = vector.broadcast %c4_i32_260 : i32 to vector<1x8xi32>
    %473 = arith.select %469, %471, %472 : vector<1x8xi1>, vector<1x8xi32>
    %cst_261 = arith.constant dense<2147483647> : vector<1xi32>
    %474 = vector.multi_reduction <minsi>, %473, %cst_261 [1] : vector<1x8xi32> to vector<1xi32>
    %475 = vector.shape_cast %474 : vector<1xi32> to vector<1x1xi32>
    %c1_i32 = arith.constant 1 : i32
    %476 = vector.broadcast %c1_i32 : i32 to vector<1x2xi32>
    %477 = arith.cmpi eq, %395, %476 : vector<1x2xi32>
    %478 = vector.shape_cast %475 : vector<1x1xi32> to vector<1x1xi32>
    %479 = vector.broadcast %478 : vector<1x1xi32> to vector<1x2xi32>
    %480 = arith.select %477, %479, %439 : vector<1x2xi1>, vector<1x2xi32>
    %cst_262 = arith.constant 5.000000e-01 : f32
    %481 = vector.broadcast %cst_262 : f32 to vector<1x1xf32>
    %482 = arith.mulf %466, %481 : vector<1x1xf32>
    %c0_263 = arith.constant 0 : index
    %c0_264 = arith.constant 0 : index
    %483 = vector.load %arg28[%c0_263, %c0_264] : memref<1x1xf32, #tpu.memory_space<vmem>>, vector<1x1xf32>
    tpu.vector_store %arg28[%c0_263, %c0_264], %482 {strides = array<i32>} : memref<1x1xf32, #tpu.memory_space<vmem>>, vector<1x1xf32>,
    %c0_265 = arith.constant 0 : index
    %c0_266 = arith.constant 0 : index
    %484 = vector.load %arg29[%c0_265, %c0_266] : memref<1x2xi32, #tpu.memory_space<vmem>>, vector<1x2xi32>
    tpu.vector_store %arg29[%c0_265, %c0_266], %480 {strides = array<i32>} : memref<1x2xi32, #tpu.memory_space<vmem>>, vector<1x2xi32>,
    return
  }
}

</mosaic_0001>

<bundles_post_ra>
// kernel: bert_choice_forward.1
= control target key start
LH: loop header
LB: loop body
LE: loop exit
PB: predicated region body
PF: predicated region fallthrough
CT: control target
= control target key end

     0   :  { %s8422_s6 = smov 1   ;;  %s8423_s10 = smov 2   ;;  %s10082_s0 = inlined_call_operand.smem [shape: u32[30], index: -1, kind: input, shape index: {}] }
   0x1   :  { %s8466_s5 = sld [smem:[%s10082_s0]]   ;;  %s8424_s14 = smov 3  }
   0x2   :  { %s8471_s9 = sld [smem:[%s10082_s0 + %s8422_s6]]   ;;  %s8425_s18 = smov 4  }
   0x3   :  { %s8476_s13 = sld [smem:[%s10082_s0 + %s8423_s10]]   ;;  %s8426_s22 = smov 5  }
   0x4   :  { %s8481_s17 = sld [smem:[%s10082_s0 + %s8424_s14]]   ;;  %s8427_s26 = smov 6  }
   0x5   :  { %s8486_s21 = sld [smem:[%s10082_s0 + %s8425_s18]]   ;;  %s8428_s30 = smov 7  }
   0x6   :  { %s8491_s25 = sld [smem:[%s10082_s0 + %s8426_s22]]   ;;  %s8429_s4 = smov 8  }
   0x7   :  { %s8496_s29 = sld [smem:[%s10082_s0 + %s8427_s26]]   ;;  %s8430_s10 = smov 9  }
   0x8   :  { %s8501_s3 = sld [smem:[%s10082_s0 + %s8428_s30]]   ;;  %s8431_s15 = smov 10  }
   0x9   :  { %10093 = sst [smem:[#allocation9_spill]] %s8476_s13  ;;  %s8432_s20 = smov 11  }
   0xa   :  { %s8506_s8 = sld [smem:[%s10082_s0 + %s8429_s4]]   ;;  %s8433_s26 = smov 12  }
   0xb   :  { %s8511_s14 = sld [smem:[%s10082_s0 + %s8430_s10]]   ;;  %s8434_s1 = smov 13  }
   0xc   :  { %s8516_s19 = sld [smem:[%s10082_s0 + %s8431_s15]]   ;;  %s8435_s7 = smov 14  }
   0xd   :  { %s8521_s24 = sld [smem:[%s10082_s0 + %s8432_s20]]   ;;  %s8436_s15 = smov 15  }
   0xe   :  { %s8526_s30 = sld [smem:[%s10082_s0 + %s8433_s26]]   ;;  %s8437_s22 = smov 16  }
   0xf   :  { %s8531_s6 = sld [smem:[%s10082_s0 + %s8434_s1]]   ;;  %s8438_s28 = smov 17  }
  0x10   :  { %s8536_s12 = sld [smem:[%s10082_s0 + %s8435_s7]]   ;;  %s8439_s7 = smov 18  }
  0x11   :  { %s8541_s20 = sld [smem:[%s10082_s0 + %s8436_s15]]   ;;  %s8440_s15 = smov 19  }
  0x12   :  { %s8546_s27 = sld [smem:[%s10082_s0 + %s8437_s22]]   ;;  %s8441_s22 = smov 20  }
  0x13   :  { %s8551_s4 = sld [smem:[%s10082_s0 + %s8438_s28]]   ;;  %s8442_s28 = smov 21  }
  0x14   :  { %s8556_s13 = sld [smem:[%s10082_s0 + %s8439_s7]]   ;;  %s8443_s7 = smov 22  }
  0x15   :  { %s8449_s23 = smov 28   ;;  %s8450_s1 = smov 29  }
  0x17   :  { %10094 = sst [smem:[#allocation10_spill]] %s8541_s20 }
  0x18   :  { %10095 = sst [smem:[#allocation11_spill]] %s8546_s27 }
  0x19   :  { %10096 = sst [smem:[#allocation12_spill]] %s8551_s4 }
  0x1a   :  { %10097 = sst [smem:[#allocation13_spill]] %s8556_s13 }
  0x1b   :  { %s8561_s20 = sld [smem:[%s10082_s0 + %s8440_s15]]   ;;  %s8444_s15 = smov 23  }
  0x1c   :  { %s8566_s27 = sld [smem:[%s10082_s0 + %s8441_s22]]   ;;  %s8445_s22 = smov 24  }
  0x1d   :  { %s8571_s4 = sld [smem:[%s10082_s0 + %s8442_s28]]   ;;  %s8446_s28 = smov 25  }
  0x1e   :  { %s8576_s13 = sld [smem:[%s10082_s0 + %s8443_s7]]   ;;  %s8447_s7 = smov 26  }
  0x21   :  { %10098 = sst [smem:[#allocation14_spill]] %s8561_s20 }
  0x22   :  { %10099 = sst [smem:[#allocation15_spill]] %s8566_s27 }
  0x23   :  { %10100 = sst [smem:[#allocation16_spill]] %s8571_s4 }
  0x24   :  { %10101 = sst [smem:[#allocation17_spill]] %s8576_s13 }
  0x25   :  { %s8581_s20 = sld [smem:[%s10082_s0 + %s8444_s15]]   ;;  %s8448_s15 = smov 27  }
  0x26   :  { %s8586_s27 = sld [smem:[%s10082_s0 + %s8445_s22]]  }
  0x27   :  { %s8591_s4 = sld [smem:[%s10082_s0 + %s8446_s28]]  }
  0x28   :  { %s8596_s13 = sld [smem:[%s10082_s0 + %s8447_s7]]  }
  0x2b   :  { %10102 = sst [smem:[#allocation18_spill]] %s8581_s20 }
  0x2c   :  { %10103 = sst [smem:[#allocation19_spill]] %s8586_s27 }
  0x2d   :  { %10104 = sst [smem:[#allocation20_spill]] %s8591_s4 }
  0x2e   :  { %s6123_s20 = sld [smem:[%s10082_s0 + %s8448_s15]]  }
  0x2f   :  { %s8604_s27 = sld [smem:[%s10082_s0 + %s8449_s23]]  }
  0x30   :  { %s8609_s4 = sld [smem:[%s10082_s0 + %s8450_s1]]  }
  0x34   :  { %v65_v0 = vstv %s6123_s20 }
  0x35   :  { %66 = vst [vmem:[#allocation2] sm:$0x1] %v65_v0 }
  0x36   :  { %67 = vsyncpa [#allocation4], 0  ;;  %v127_v1 = vld [vmem:[%s8466_s5 + $0x10] sm:$0xff]  ;;  %v125_v2 = vld [vmem:[%s8466_s5] sm:$0xff]  ;;  %v141_v3 = vlaneseq  ;;  %v8451_v4 = vmov 0   ;;  %vm247_vm0 = vcmask 130048  }
  0x37   :  { %8123 = vset.pattern.permute.xlu1 %v8451_v4  ;;  %8122 = vset.pattern.permute.xlu0 %v8451_v4  ;;  %v128_v7 = vld [vmem:[%s8466_s5 + $0x18] sm:$0xff]  ;;  %v126_v8 = vld [vmem:[%s8466_s5 + $0x8] sm:$0xff]  ;;  %v245_v12 = vld [vmem:[%s8486_s21] sm:$0xff]  ;;  %v8452_v24 = vmov 0.0  }
  0x38   :  { %150 = vperm.xlu1 %8123, %v127_v1   ;;  %144 = vperm.xlu0 %8122, %v125_v2   ;;  %v8613_v5 = vand.u32 127, %v141_v3  ;;  %v8615_v6 = vshrl.u32 %v141_v3, 7  ;;  %v246_v13 = vld [vmem:[%s8486_s21 + $0x8] sm:$0xff]  ;;  %v191_v18 = vld [vmem:[%s8481_s17] sm:$0xff]  ;;  %v193_v29 = vld [vmem:[%s8481_s17 + $0x10] sm:$0xff] }
  0x39   :  { %v7688_v17 = vpack.c.bf16 %v246_v13, %v245_v12  ;;  %v192_v19 = vld [vmem:[%s8481_s17 + $0x8] sm:$0xff]  ;;  %v129_v23 = vld [vmem:[%s8466_s5 + $0x20] sm:$0xff]  ;;  %v194_v30 = vld [vmem:[%s8481_s17 + $0x18] sm:$0xff] }
  0x3a   :  { %v213_v9 = vand.u32 7, %v8615_v6  ;;  %v8621_v10 = vadd.s32 8, %v8615_v6  ;;  %v8624_v11 = vadd.s32 16, %v8615_v6  ;;  %v8629_v14 = vadd.s32 24, %v8615_v6  ;;  %v130_v22 = vld [vmem:[%s8466_s5 + $0x28] sm:$0xff] }
  0x3b   :  { %v8632_v15 = vadd.s32 32, %v8615_v6  ;;  %v8635_v16 = vadd.s32 40, %v8615_v6  ;;  %v7692_v26 = vpack.c.bf16 %v192_v19, %v191_v18  ;;  %7689 = vmatprep.subr.bf16.mxu0 %v7688_v17 }
  0x3c   :  { %153 = vperm.xlu1 %8123, %v128_v7   ;;  %147 = vperm.xlu0 %8122, %v126_v8   ;;  %vm221_vm1 = vcmp.eq.s32.totalorder %v8613_v5, %v213_v9  ;;  %v214_v20 = vand.u32 7, %v8621_v10  ;;  %v215_v21 = vand.u32 7, %v8624_v11  ;;  %v216_v27 = vand.u32 7, %v8629_v14 }
  0x3d   :  { %v6134_v25 = vsel %vm221_vm1, 1.0, %v8452_v24  ;;  %v217_v28 = vand.u32 7, %v8632_v15  ;;  %7691 = vmatpush3.bf16.msra.mxu0 %v7688_v17  ;;  %v218_v33 = vand.u32 7, %v8635_v16 }
  0x3e   :  { %6965 = vmatprep.mubr.msk.f32.mxu0 %vm247_vm0, %v6134_v25  ;;  %vm222_vm2 = vcmp.eq.s32.totalorder %v8613_v5, %v214_v20  ;;  %vm223_vm3 = vcmp.eq.s32.totalorder %v8613_v5, %v215_v21  ;;  %vm224_vm4 = vcmp.eq.s32.totalorder %v8613_v5, %v216_v27 }
  0x3f   :  { %v6135_v31 = vsel %vm222_vm2, 1.0, %v8452_v24  ;;  %v6136_v32 = vsel %vm223_vm3, 1.0, %v8452_v24 }
  0x40   :  { %159 = vperm.xlu1 %8123, %v130_v22   ;;  %156 = vperm.xlu0 %8122, %v129_v23  }
  0x41   :  { %68 = vsyncpa [#allocation6], 0  ;;  %v132_v34 = vld [vmem:[%s8466_s5 + $0x38] sm:$0xff]  ;;  %v131_v35 = vld [vmem:[%s8466_s5 + $0x30] sm:$0xff]  ;;  %7693 = vmatprep.subr.bf16.mxu0 %v7692_v26  ;;  %v7696_v36 = vpack.c.bf16 %v194_v30, %v193_v29  ;;  %vm225_vm5 = vcmp.eq.s32.totalorder %v8613_v5, %v217_v28  ;;  %v8660_v37 = vadd.s32 48, %v8615_v6  ;;  %6966 = vmatmul.mubr.msk.f32.vlgmr.msra.gmra.mrb[0].mxu0 %vm247_vm0, %v6135_v31  ;;  %v8666_v40 = vadd.s32 56, %v8615_v6 }
  0x42   :  { %v195_v38 = vld [vmem:[%s8481_s17 + $0x20] sm:$0xff]  ;;  %v196_v39 = vld [vmem:[%s8481_s17 + $0x28] sm:$0xff]  ;;  %7695 = vmatpush3.bf16.msra.mxu0 %v7692_v26  ;;  %6968 = vmatprep.mubr.msk.f32.mxu0 %vm247_vm0, %v6136_v32  ;;  %v6137_v41 = vsel %vm224_vm4, 1.0, %v8452_v24  ;;  %v6138_v43 = vsel %vm225_vm5, 1.0, %v8452_v24  ;;  %vm226_vm6 = vcmp.eq.s32.totalorder %v8613_v5, %v218_v33  ;;  %v197_v48 = vld [vmem:[%s8481_s17 + $0x30] sm:$0xff]  ;;  %vm402_vm9 = vcmask 1043456  }
  0x43   :  { %v219_v42 = vand.u32 7, %v8660_v37  ;;  %v220_v44 = vand.u32 7, %v8666_v40  ;;  %v134_v45 = vld [vmem:[%s8471_s9 + $0x8] sm:$0xff]  ;;  %v133_v46 = vld [vmem:[%s8471_s9] sm:$0xff]  ;;  %7697 = vmatprep.subr.bf16.mxu0 %v7696_v36  ;;  %v7700_v47 = vpack.c.bf16 %v196_v39, %v195_v38  ;;  %v198_v49 = vld [vmem:[%s8481_s17 + $0x38] sm:$0xff]  ;;  %v6139_v50 = vsel %vm226_vm6, 1.0, %v8452_v24 }
  0x44   :  { %165 = vperm.xlu1 %8123, %v132_v34   ;;  %162 = vperm.xlu0 %8122, %v131_v35   ;;  %v136_v52 = vld [vmem:[%s8471_s9 + $0x18] sm:$0xff]  ;;  %v135_v53 = vld [vmem:[%s8471_s9 + $0x10] sm:$0xff]  ;;  %v7704_v54 = vpack.c.bf16 %v198_v49, %v197_v48  ;;  %v199_v55 = vld [vmem:[%s8481_s17 + $0x40] sm:$0xff]  ;;  %vm585_vm10 = vcmask 1041408   ;;  %vm377_vm11 = vcmask 818176   ;;  %vm560_vm6 = vcmask 15360  }
  0x45   :  { %vm227_vm7 = vcmp.eq.s32.totalorder %v8613_v5, %v219_v42  ;;  %6969 = vmatmul.mubr.msk.f32.gmra.mrb[2].mxu0 %vm247_vm0, %v6137_v41  ;;  %vm228_vm8 = vcmp.eq.s32.totalorder %v8613_v5, %v220_v44  ;;  %v200_v56 = vld [vmem:[%s8481_s17 + $0x48] sm:$0xff]  ;;  %v137_v59 = vld [vmem:[%s8471_s9 + $0x20] sm:$0xff]  ;;  %v201_v61 = vld [vmem:[%s8481_s17 + $0x50] sm:$0xff]  ;;  %s10107_s0 = sld [smem:[#allocation10_spill]]  ;;  %s10108_s5 = sld [smem:[#allocation13_spill]] }
  0x46   :  { %7699 = vmatpush3.bf16.msra.mxu0 %v7696_v36  ;;  %6971 = vmatprep.mubr.msk.f32.mxu0 %vm247_vm0, %v6138_v43  ;;  %v6140_v51 = vsel %vm227_vm7, 1.0, %v8452_v24  ;;  %v6141_v57 = vsel %vm228_vm8, 1.0, %v8452_v24  ;;  %v138_v58 = vld [vmem:[%s8471_s9 + $0x28] sm:$0xff]  ;;  %v7708_v60 = vpack.c.bf16 %v200_v56, %v199_v55  ;;  %v202_v62 = vld [vmem:[%s8481_s17 + $0x58] sm:$0xff]  ;;  %v139_v0 = vld [vmem:[%s8471_s9 + $0x30] sm:$0xff]  ;;  %s10111_s21 = sld [smem:[#allocation15_spill]] }
  0x47   :  { %7701 = vmatprep.subr.bf16.mxu0 %v7700_v47  ;;  %v140_v63 = vld [vmem:[%s8471_s9 + $0x38] sm:$0xff]  ;;  %v7712_v1 = vpack.c.bf16 %v202_v62, %v201_v61  ;;  %v203_v2 = vld [vmem:[%s8481_s17 + $0x60] sm:$0xf]  ;;  %s10109_s9 = sld [smem:[#allocation11_spill]]  ;;  %s10110_s17 = sld [smem:[#allocation12_spill]] }
  0x48   :  { %515 = vperm.xlu1 %8123, %v134_v45   ;;  %512 = vperm.xlu0 %8122, %v133_v46   ;;  %v559_v3 = vld [vmem:[%s8491_s25] sm:$0x3]  ;;  %s10112_s25 = sld [smem:[#allocation14_spill]]  ;;  %s10115_s20 = sld [smem:[#allocation18_spill]] }
  0x49   :  { %6972 = vmatmul.mubr.msk.f32.gmra.mrb[4].mxu0 %vm247_vm0, %v6139_v50 }
  0x4a   :  { %7703 = vmatpush3.bf16.msra.mxu0 %v7700_v47  ;;  %6974 = vmatprep.mubr.msk.f32.mxu0 %vm247_vm0, %v6140_v51 }
  0x4b   :  { %7705 = vmatprep.subr.bf16.mxu0 %v7704_v54 }
  0x4c   :  { %521 = vperm.xlu1 %8123, %v136_v52   ;;  %518 = vperm.xlu0 %8122, %v135_v53  }
  0x4d   :  { %6975 = vmatmul.mubr.msk.f32.gmra.mrb[6].mxu0 %vm247_vm0, %v6141_v57 }
  0x4e   :  { %7707 = vmatpush3.bf16.msra.mxu0 %v7704_v54 }
  0x4f   :  { %7709 = vmatprep.subr.bf16.mxu0 %v7708_v60 }
  0x50   :  { %527 = vperm.xlu1 %8123, %v138_v58   ;;  %524 = vperm.xlu0 %8122, %v137_v59  }
  0x52   :  { %7711 = vmatpush3.bf16.msra.mxu0 %v7708_v60 }
  0x53   :  { %7713 = vmatprep.subr.bf16.mxu0 %v7712_v1 }
  0x54   :  { %533 = vperm.xlu1 %8123, %v140_v63   ;;  %530 = vperm.xlu0 %8122, %v139_v0  }
  0x56   :  { %7715 = vmatpush3.bf16.msra.mxu0 %v7712_v1 }
  0x57   :  { %7001 = vmatprep.subr.msk.mxu0 %vm402_vm9, %v203_v2 }
  0x5a   :  { %7002 = vmatpush3.msk.msra.mxu0 %vm402_vm9, %v203_v2 }
  0x5b   :  { %7015 = vmatprep.subr.msk.mxu0 %vm585_vm10, %v559_v3 }
  0xb7   :  { %v151_v4 = vpop.permute.xlu1 %150  ;;  %v145_v7 = vpop.permute.xlu0 %144 }
  0xb8   :  { %vm167_vm12 = vcmp.eq.s32.totalorder %v8613_v5, %v145_v7  ;;  %vm169_vm13 = vcmp.eq.s32.totalorder %v8613_v5, %v151_v4 }
  0xb9   :  { %v6126_v8 = vsel %vm167_vm12, 1.0, %v8452_v24  ;;  %v6128_v13 = vsel %vm169_vm13, 1.0, %v8452_v24 }
  0xba   :  { %7003 = vmatprep.mubr.msk.f32.mxu0 %vm377_vm11, %v6126_v8 }
  0xbb   :  { %v154_v9 = vpop.permute.xlu1 %153  ;;  %v148_v12 = vpop.permute.xlu0 %147 }
  0xbc   :  { %vm168_vm14 = vcmp.eq.s32.totalorder %v8613_v5, %v148_v12  ;;  %vm170_vm15 = vcmp.eq.s32.totalorder %v8613_v5, %v154_v9 }
  0xbd   :  { %v6127_v17 = vsel %vm168_vm14, 1.0, %v8452_v24  ;;  %v6129_v20 = vsel %vm170_vm15, 1.0, %v8452_v24  ;;  %vm704_vm14 = vcmask 261120   ;;  %vm8907_vm15 = vmpackc.low %vm247_vm0, %vm247_vm0 }
  0xbe   :  { %7004 = vmatmul.mubr.msk.f32.vlgmr.msra.gmra.mrb[0].mxu0 %vm377_vm11, %v6127_v17 }
  0xbf   :  { %v160_v18 = vpop.permute.xlu1 %159  ;;  %7006 = vmatprep.mubr.msk.f32.mxu0 %vm377_vm11, %v6128_v13  ;;  %v157_v19 = vpop.permute.xlu0 %156  ;;  %7016 = vmatpush3.msk.msra.mxu0 %vm585_vm10, %v559_v3 }
  0xc0   :  { %vm171_vm1 = vcmp.eq.s32.totalorder %v8613_v5, %v157_v19  ;;  %vm172_vm2 = vcmp.eq.s32.totalorder %v8613_v5, %v160_v18 }
  0xc1   :  { %v6130_v21 = vsel %vm171_vm1, 1.0, %v8452_v24  ;;  %v6131_v25 = vsel %vm172_vm2, 1.0, %v8452_v24 }
  0xc2   :  { %7007 = vmatmul.mubr.msk.f32.gmra.mrb[2].mxu0 %vm377_vm11, %v6129_v20 }
  0xc3   :  { %v166_v22 = vpop.permute.xlu1 %165  ;;  %7009 = vmatprep.mubr.msk.f32.mxu0 %vm377_vm11, %v6130_v21  ;;  %v163_v23 = vpop.permute.xlu0 %162 }
  0xc4   :  { %vm173_vm3 = vcmp.eq.s32.totalorder %v8613_v5, %v163_v23  ;;  %vm174_vm4 = vcmp.eq.s32.totalorder %v8613_v5, %v166_v22 }
  0xc5   :  { %v6132_v26 = vsel %vm173_vm3, 1.0, %v8452_v24  ;;  %v6133_v29 = vsel %vm174_vm4, 1.0, %v8452_v24 }
  0xc6   :  { %7010 = vmatmul.mubr.msk.f32.gmra.mrb[4].mxu0 %vm377_vm11, %v6131_v25 }
  0xc7   :  { %v516_v27 = vpop.permute.xlu1 %515  ;;  %7012 = vmatprep.mubr.msk.f32.mxu0 %vm377_vm11, %v6132_v26  ;;  %v513_v28 = vpop.permute.xlu0 %512 }
  0xc8   :  { %vm535_vm5 = vcmp.eq.s32.totalorder %v8613_v5, %v513_v28  ;;  %vm536_vm7 = vcmp.eq.s32.totalorder %v8613_v5, %v516_v27 }
  0xc9   :  { %v6159_v30 = vsel %vm535_vm5, 1.0, %v8452_v24  ;;  %v6160_v33 = vsel %vm536_vm7, 1.0, %v8452_v24  ;;  %vm1404_vm5 = vcmask 523264  }
  0xca   :  { %7013 = vmatmul.mubr.msk.f32.gmra.mrb[6].mxu0 %vm377_vm11, %v6133_v29 }
  0xcb   :  { %v522_v31 = vpop.permute.xlu1 %521  ;;  %7017 = vmatprep.mubr.msk.f32.mxu0 %vm560_vm6, %v6159_v30  ;;  %v519_v32 = vpop.permute.xlu0 %518 }
  0xcc   :  { %vm537_vm8 = vcmp.eq.s32.totalorder %v8613_v5, %v519_v32  ;;  %vm538_vm9 = vcmp.eq.s32.totalorder %v8613_v5, %v522_v31 }
  0xcd   :  { %v6161_v34 = vsel %vm537_vm8, 1.0, %v8452_v24  ;;  %v6162_v38 = vsel %vm538_vm9, 1.0, %v8452_v24 }
  0xce   :  { %7018 = vmatmul.mubr.msk.f32.vlgmr.msra.gmra.mrb[0].mxu0 %vm560_vm6, %v6160_v33 }
  0xcf   :  { %v528_v35 = vpop.permute.xlu1 %527  ;;  %7020 = vmatprep.mubr.msk.f32.mxu0 %vm560_vm6, %v6161_v34  ;;  %v525_v36 = vpop.permute.xlu0 %524 }
  0xd0   :  { %vm539_vm10 = vcmp.eq.s32.totalorder %v8613_v5, %v525_v36  ;;  %vm540_vm11 = vcmp.eq.s32.totalorder %v8613_v5, %v528_v35 }
  0xd1   :  { %v6163_v39 = vsel %vm539_vm10, 1.0, %v8452_v24  ;;  %v6164_v43 = vsel %vm540_vm11, 1.0, %v8452_v24  ;;  %vm6009_vm11 = vcmp.ge.s32.totalorder %v8613_v5, 4 }
  0xd2   :  { %7021 = vmatmul.mubr.msk.f32.gmra.mrb[2].mxu0 %vm560_vm6, %v6162_v38 }
  0xd3   :  { %v534_v41 = vpop.permute.xlu1 %533  ;;  %7023 = vmatprep.mubr.msk.f32.mxu0 %vm560_vm6, %v6163_v39  ;;  %v531_v42 = vpop.permute.xlu0 %530 }
  0xd4   :  { %vm541_vm12 = vcmp.eq.s32.totalorder %v8613_v5, %v531_v42  ;;  %vm542_vm13 = vcmp.eq.s32.totalorder %v8613_v5, %v534_v41 }
  0xd5   :  { %v6165_v44 = vsel %vm541_vm12, 1.0, %v8452_v24  ;;  %v6166_v45 = vsel %vm542_vm13, 1.0, %v8452_v24  ;;  %vm6010_vm12 = vcmp.lt.s32.totalorder %v8613_v5, 8  ;;  %vm5963_vm13 = vcmp.lt.s32.totalorder %v8613_v5, 4 }
  0xd6   :  { %7024 = vmatmul.mubr.msk.f32.gmra.mrb[4].mxu0 %vm560_vm6, %v6164_v43 }
  0xd7   :  { %7026 = vmatprep.mubr.msk.f32.mxu0 %vm560_vm6, %v6165_v44 }
  0xda   :  { %7027 = vmatmul.mubr.msk.f32.gmra.mrb[6].mxu0 %vm560_vm6, %v6166_v45 }
 0x1a1   :  { %v7019_v46 = vpop.f32.mrb[0].mxu0 }
 0x1a2   :  { %v655_v47 = vpop.f32.mrb[1].mxu0  ;;  %v708_v48 = vsel %vm704_vm14, %v7019_v46, 0.0 }
 0x1a3   :  { %709 = vadd.xlane.f32.xlu1 %v708_v48  ;;  %v705_v49 = vsel %vm704_vm14, %v655_v47, 0.0  ;;  %v863_v48 = vld [vmem:[%s8506_s8] sm:$0xff] }
 0x1a4   :  { %706 = vadd.xlane.f32.xlu0 %v705_v49  ;;  %v864_v49 = vld [vmem:[%s8506_s8 + $0x8] sm:$0xff] }
 0x1a5   :  { %v7022_v50 = vpop.f32.mrb[2].mxu0 }
 0x1a6   :  { %v665_v51 = vpop.f32.mrb[3].mxu0  ;;  %v714_v55 = vsel %vm704_vm14, %v7022_v50, 0.0 }
 0x1a7   :  { %v711_v52 = vsel %vm704_vm14, %v665_v51, 0.0 }
 0x1a8   :  { %712 = vadd.xlane.f32.xlu0 %v711_v52  ;;  %v866_v52 = vld [vmem:[%s8506_s8 + $0x18] sm:$0xff] }
 0x1a9   :  { %v7025_v53 = vpop.f32.mrb[4].mxu0 }
 0x1aa   :  { %v675_v54 = vpop.f32.mrb[5].mxu0  ;;  %v720_v59 = vsel %vm704_vm14, %v7025_v53, 0.0 }
 0x1ab   :  { %v717_v56 = vsel %vm704_vm14, %v675_v54, 0.0 }
 0x1ac   :  { %715 = vadd.xlane.f32.xlu0 %v714_v55  ;;  %718 = vadd.xlane.f32.xlu1 %v717_v56  ;;  %v1004_v55 = vld [vmem:[%s8516_s19 + $0x8] sm:$0xff] }
 0x1ad   :  { %v7028_v57 = vpop.f32.mrb[6].mxu0 }
 0x1ae   :  { %v685_v58 = vpop.f32.mrb[7].mxu0  ;;  %v726_v61 = vsel %vm704_vm14, %v7028_v57, 0.0 }
 0x1af   :  { %v723_v60 = vsel %vm704_vm14, %v685_v58, 0.0 }
 0x1b0   :  { %721 = vadd.xlane.f32.xlu0 %v720_v59  ;;  %724 = vadd.xlane.f32.xlu1 %v723_v60 }
 0x1b4   :  { %727 = vadd.xlane.f32.xlu0 %v726_v61 }
 0x230   :  { %v710_v62 = vpop.xlane.xlu1 %709 }
 0x231   :  { %v731_v63 = vmul.f32 0.03125, %v710_v62  ;;  %v707_v0 = vpop.xlane.xlu0 %706 }
 0x232   :  { %v730_v1 = vmul.f32 0.03125, %v707_v0 }
 0x233   :  { %v8758_v2 = vsub.f32 %v7019_v46, %v731_v63 }
 0x234   :  { %v8760_v3 = vsub.f32 %v655_v47, %v730_v1 }
 0x235   :  { %v713_v4 = vpop.xlane.xlu0 %712  ;;  %v747_v7 = vmul.f32 %v8758_v2, %v8758_v2 }
 0x236   :  { %v732_v8 = vmul.f32 0.03125, %v713_v4  ;;  %v746_v9 = vmul.f32 %v8760_v3, %v8760_v3 }
 0x237   :  { %v757_v12 = vsel %vm704_vm14, %v747_v7, 0.0 }
 0x238   :  { %v8767_v13 = vsub.f32 %v665_v51, %v732_v8  ;;  %758 = vadd.xlane.f32.xlu0 %v757_v12  ;;  %v754_v17 = vsel %vm704_vm14, %v746_v9, 0.0  ;;  %v865_v51 = vld [vmem:[%s8506_s8 + $0x10] sm:$0xff] }
 0x239   :  { %v719_v18 = vpop.xlane.xlu1 %718  ;;  %755 = vadd.xlane.f32.xlu1 %v754_v17  ;;  %v716_v19 = vpop.xlane.xlu0 %715 }
 0x23a   :  { %v734_v20 = vmul.f32 0.03125, %v719_v18  ;;  %v733_v21 = vmul.f32 0.03125, %v716_v19  ;;  %v748_v22 = vmul.f32 %v8767_v13, %v8767_v13 }
 0x23c   :  { %v8772_v23 = vsub.f32 %v675_v54, %v734_v20  ;;  %v8774_v25 = vsub.f32 %v7022_v50, %v733_v21  ;;  %v760_v26 = vsel %vm704_vm14, %v748_v22, 0.0  ;;  %v7716_v50 = vpack.c.bf16 %v864_v49, %v863_v48  ;;  %v1003_v54 = vld [vmem:[%s8516_s19] sm:$0xff] }
 0x23d   :  { %v725_v27 = vpop.xlane.xlu1 %724  ;;  %761 = vadd.xlane.f32.xlu1 %v760_v26  ;;  %v722_v28 = vpop.xlane.xlu0 %721  ;;  %v7724_v56 = vpack.c.bf16 %v1004_v55, %v1003_v54  ;;  %v6176_v26 = vld [vmem:[%s8496_s29] ss:$0 sm:$0xff]  ;;  %s10113_s29 = sld [smem:[#allocation16_spill]] }
 0x23e   :  { %v736_v29 = vmul.f32 0.03125, %v725_v27  ;;  %v735_v30 = vmul.f32 0.03125, %v722_v28  ;;  %v750_v31 = vmul.f32 %v8772_v23, %v8772_v23  ;;  %v749_v32 = vmul.f32 %v8774_v25, %v8774_v25  ;;  %7717 = vmatprep.subr.bf16.mxu1 %v7716_v50  ;;  %v1119_v49 = vld [vmem:[%s8526_s30] sm:$0xff] }
 0x23f   :  { %7719 = vmatpush3.bf16.msra.mxu1 %v7716_v50  ;;  %v1120_v50 = vld [vmem:[%s8526_s30 + $0x8] sm:$0xff] }
 0x240   :  { %v8781_v33 = vsub.f32 %v685_v58, %v736_v29  ;;  %v8783_v34 = vsub.f32 %v7025_v53, %v735_v30  ;;  %v766_v35 = vsel %vm704_vm14, %v750_v31, 0.0  ;;  %v763_v36 = vsel %vm704_vm14, %v749_v32, 0.0 }
 0x241   :  { %767 = vadd.xlane.f32.xlu1 %v766_v35  ;;  %764 = vadd.xlane.f32.xlu0 %v763_v36  ;;  %v728_v38 = vpop.xlane.xlu0 %727  ;;  %v7720_v53 = vpack.c.bf16 %v866_v52, %v865_v51  ;;  %v6177_v35 = vld [vmem:[%s8501_s3] ss:$0 sm:$0xff]  ;;  %v7732_v55 = vpack.c.bf16 %v1120_v50, %v1119_v49  ;;  %s10114_s3 = sld [smem:[#allocation17_spill]] }
 0x242   :  { %v737_v39 = vmul.f32 0.03125, %v728_v38  ;;  %v752_v41 = vmul.f32 %v8781_v33, %v8781_v33  ;;  %v751_v42 = vmul.f32 %v8783_v34, %v8783_v34 }
 0x243   :  { %7721 = vmatprep.subr.bf16.mxu1 %v7720_v53 }
 0x244   :  { %v8791_v43 = vsub.f32 %v7028_v57, %v737_v39  ;;  %v772_v44 = vsel %vm704_vm14, %v752_v41, 0.0  ;;  %v769_v45 = vsel %vm704_vm14, %v751_v42, 0.0  ;;  %7723 = vmatpush3.bf16.msra.mxu1 %v7720_v53  ;;  %v1005_v41 = vld [vmem:[%s8516_s19 + $0x10] sm:$0xff]  ;;  %v1006_v42 = vld [vmem:[%s8516_s19 + $0x18] sm:$0xff] }
 0x245   :  { %773 = vadd.xlane.f32.xlu1 %v772_v44  ;;  %770 = vadd.xlane.f32.xlu0 %v769_v45 }
 0x246   :  { %v753_v46 = vmul.f32 %v8791_v43, %v8791_v43  ;;  %7725 = vmatprep.subr.bf16.mxu1 %v7724_v56 }
 0x248   :  { %v775_v47 = vsel %vm704_vm14, %v753_v46, 0.0 }
 0x249   :  { %776 = vadd.xlane.f32.xlu0 %v775_v47 }
 0x2c5   :  { %v759_v57 = vpop.xlane.xlu0 %758 }
 0x2c6   :  { %v779_v58 = vmul.f32 0.03125, %v759_v57  ;;  %v756_v59 = vpop.xlane.xlu1 %755 }
 0x2c7   :  { %v778_v60 = vmul.f32 0.03125, %v756_v59 }
 0x2c8   :  { %v787_v61 = vadd.f32 1e-12, %v779_v58 }
 0x2c9   :  { %v786_v62 = vadd.f32 1e-12, %v778_v60 }
 0x2ca   :  { %8124 = vrsqrt.f32 %v787_v61  ;;  %v762_v63 = vpop.xlane.xlu1 %761 }
 0x2cb   :  { %8126 = vrsqrt.f32 %v786_v62  ;;  %v780_v0 = vmul.f32 0.03125, %v762_v63 }
 0x2cd   :  { %v788_v1 = vadd.f32 1e-12, %v780_v0 }
 0x2ce   :  { %v768_v4 = vpop.xlane.xlu1 %767  ;;  %v765_v7 = vpop.xlane.xlu0 %764 }
 0x2cf   :  { %8128 = vrsqrt.f32 %v788_v1  ;;  %v782_v8 = vmul.f32 0.03125, %v768_v4  ;;  %v781_v9 = vmul.f32 0.03125, %v765_v7 }
 0x2d1   :  { %v790_v12 = vadd.f32 1e-12, %v782_v8  ;;  %v789_v17 = vadd.f32 1e-12, %v781_v9  ;;  %v1121_v8 = vld [vmem:[%s8526_s30 + $0x10] sm:$0xff]  ;;  %v1122_v9 = vld [vmem:[%s8526_s30 + $0x18] sm:$0xff] }
 0x2d2   :  { %v774_v18 = vpop.xlane.xlu1 %773  ;;  %v771_v19 = vpop.xlane.xlu0 %770 }
 0x2d3   :  { %8130 = vrsqrt.f32 %v790_v12  ;;  %v784_v20 = vmul.f32 0.03125, %v774_v18  ;;  %v783_v21 = vmul.f32 0.03125, %v771_v19  ;;  %v8885_v12 = vld [vmem:[%s8511_s14] ss:$0 sm:$0xff] }
 0x2d4   :  { %v8125_v22 = vpop.eup %8124  ;;  %8132 = vrsqrt.f32 %v789_v17 }
 0x2d5   :  { %v8127_v27 = vpop.eup %8126  ;;  %v803_v28 = vmul.f32 %v8125_v22, %v8758_v2  ;;  %v792_v29 = vadd.f32 1e-12, %v784_v20  ;;  %v791_v30 = vadd.f32 1e-12, %v783_v21 }
 0x2d6   :  { %v802_v31 = vmul.f32 %v8127_v27, %v8760_v3  ;;  %v777_v32 = vpop.xlane.xlu0 %776  ;;  %v7728_v3 = vpack.c.bf16 %v1006_v42, %v1005_v41 }
 0x2d7   :  { %v817_v36 = vmul.f32 %v6176_v26, %v803_v28  ;;  %8134 = vrsqrt.f32 %v792_v29  ;;  %v785_v38 = vmul.f32 0.03125, %v777_v32 }
 0x2d8   :  { %v816_v39 = vmul.f32 %v6176_v26, %v802_v31  ;;  %8136 = vrsqrt.f32 %v791_v30  ;;  %v6187_v30 = vld [vmem:[%s8521_s24] ss:$0 sm:$0xff] }
 0x2d9   :  { %v8129_v44 = vpop.eup %8128  ;;  %v793_v45 = vadd.f32 1e-12, %v785_v38  ;;  %v8813_v47 = vadd.f32 %v6177_v35, %v817_v36 }
 0x2da   :  { %v8810_v46 = vadd.f32 %v6177_v35, %v816_v39  ;;  %v804_v2 = vmul.f32 %v8129_v44, %v8767_v13 }
 0x2db   :  { %8138 = vrsqrt.f32 %v793_v45 }
 0x2dc   :  { %v818_v48 = vmul.f32 %v6176_v26, %v804_v2  ;;  %7037 = vmatprep.mubr.msk.f32.mxu1 %vm704_vm14, %v8810_v46 }
 0x2dd   :  { %v8131_v51 = vpop.eup %8130  ;;  %7038 = vmatmul.mubr.msk.f32.vlgmr.msra.gmra.mrb[0].mxu1 %vm704_vm14, %v8813_v47 }
 0x2de   :  { %v8133_v52 = vpop.eup %8132  ;;  %v8821_v53 = vadd.f32 %v6177_v35, %v818_v48  ;;  %v806_v54 = vmul.f32 %v8131_v51, %v8772_v23  ;;  %7727 = vmatpush3.bf16.msra.mxu1 %v7724_v56 }
 0x2df   :  { %v805_v13 = vmul.f32 %v8133_v52, %v8774_v25  ;;  %7729 = vmatprep.subr.bf16.mxu1 %v7728_v3 }
 0x2e0   :  { %v820_v57 = vmul.f32 %v6176_v26, %v806_v54  ;;  %7040 = vmatprep.mubr.msk.f32.mxu1 %vm704_vm14, %v8821_v53 }
 0x2e1   :  { %v8135_v58 = vpop.eup %8134  ;;  %v819_v59 = vmul.f32 %v6176_v26, %v805_v13 }
 0x2e2   :  { %v8137_v60 = vpop.eup %8136  ;;  %v8827_v61 = vadd.f32 %v6177_v35, %v820_v57  ;;  %v808_v62 = vmul.f32 %v8135_v58, %v8781_v33  ;;  %7731 = vmatpush3.bf16.msra.mxu1 %v7728_v3  ;;  %v6196_v57 = vld [vmem:[%s8531_s6] ss:$0 sm:$0xff] }
 0x2e3   :  { %v8830_v63 = vadd.f32 %v6177_v35, %v819_v59  ;;  %v807_v23 = vmul.f32 %v8137_v60, %v8783_v34  ;;  %7733 = vmatprep.subr.bf16.mxu1 %v7732_v55 }
 0x2e4   :  { %v822_v25 = vmul.f32 %v6176_v26, %v808_v62 }
 0x2e5   :  { %v8139_v56 = vpop.eup %8138  ;;  %v821_v0 = vmul.f32 %v6176_v26, %v807_v23  ;;  %7041 = vmatmul.mubr.msk.f32.gmra.mrb[2].mxu1 %vm704_vm14, %v8830_v63 }
 0x2e6   :  { %v8835_v1 = vadd.f32 %v6177_v35, %v822_v25  ;;  %v809_v4 = vmul.f32 %v8139_v56, %v8791_v43  ;;  %7043 = vmatprep.mubr.msk.f32.mxu1 %vm704_vm14, %v8827_v61  ;;  %v7736_v43 = vpack.c.bf16 %v1122_v9, %v1121_v8 }
 0x2e7   :  { %v8840_v33 = vadd.f32 %v6177_v35, %v821_v0 }
 0x2e8   :  { %v823_v7 = vmul.f32 %v6176_v26, %v809_v4 }
 0x2e9   :  { %7044 = vmatmul.mubr.msk.f32.gmra.mrb[4].mxu1 %vm704_vm14, %v8840_v33 }
 0x2ea   :  { %v8844_v34 = vadd.f32 %v6177_v35, %v823_v7  ;;  %7046 = vmatprep.mubr.msk.f32.mxu1 %vm704_vm14, %v8835_v1 }
 0x2ed   :  { %7047 = vmatmul.mubr.msk.f32.gmra.mrb[6].mxu1 %vm704_vm14, %v8844_v34 }
 0x2ee   :  { %7057 = vmatprep.mubr.msk.f32.mxu1 %vm704_vm14, %v8810_v46 }
 0x2f1   :  { %7058 = vmatmul.mubr.msk.f32.vlgmr.msra.gmra.mrb[8].mxu1 %vm704_vm14, %v8813_v47 }
 0x2f2   :  { %7060 = vmatprep.mubr.msk.f32.mxu1 %vm704_vm14, %v8821_v53  ;;  %7735 = vmatpush3.bf16.msra.mxu1 %v7732_v55 }
 0x2f3   :  { %7737 = vmatprep.subr.bf16.mxu1 %v7736_v43 }
 0x2f5   :  { %7061 = vmatmul.mubr.msk.f32.gmra.mrb[10].mxu1 %vm704_vm14, %v8830_v63 }
 0x2f6   :  { %7063 = vmatprep.mubr.msk.f32.mxu1 %vm704_vm14, %v8827_v61  ;;  %7739 = vmatpush3.bf16.msra.mxu1 %v7736_v43 }
 0x2f9   :  { %7064 = vmatmul.mubr.msk.f32.gmra.mrb[12].mxu1 %vm704_vm14, %v8840_v33 }
 0x2fa   :  { %7066 = vmatprep.mubr.msk.f32.mxu1 %vm704_vm14, %v8835_v1 }
 0x2fd   :  { %7067 = vmatmul.mubr.msk.f32.gmra.mrb[14].mxu1 %vm704_vm14, %v8844_v34 }
 0x2fe   :  { %7077 = vmatprep.mubr.msk.f32.mxu1 %vm704_vm14, %v8810_v46 }
 0x301   :  { %7078 = vmatmul.mubr.msk.f32.vlgmr.msra.gmra.mrb[16].mxu1 %vm704_vm14, %v8813_v47 }
 0x302   :  { %7080 = vmatprep.mubr.msk.f32.mxu1 %vm704_vm14, %v8821_v53 }
 0x305   :  { %7081 = vmatmul.mubr.msk.f32.gmra.mrb[18].mxu1 %vm704_vm14, %v8830_v63 }
 0x306   :  { %7083 = vmatprep.mubr.msk.f32.mxu1 %vm704_vm14, %v8827_v61 }
 0x309   :  { %7084 = vmatmul.mubr.msk.f32.gmra.mrb[20].mxu1 %vm704_vm14, %v8840_v33 }
 0x30a   :  { %7086 = vmatprep.mubr.msk.f32.mxu1 %vm704_vm14, %v8835_v1 }
 0x30d   :  { %7087 = vmatmul.mubr.msk.f32.gmra.mrb[22].mxu1 %vm704_vm14, %v8844_v34 }
 0x3b0   :  { %v8887_v17 = vpop.f32.mrb[0].mxu1 }
 0x3b1   :  { %v964_v18 = vpop.f32.mrb[1].mxu1 }
 0x3b2   :  { %v965_v19 = vadd.f32 %v8885_v12, %v964_v18 }
 0x3b4   :  { %7105 = vmatprep.mubr.msk.f32.mxu1 %vm247_vm0, %v965_v19  ;;  %v6243_v19 = vld [vmem:[%s8516_s19 + $0x20] sm:$0xff] }
 0x3b8   :  { %v8891_v20 = vpop.f32.mrb[2].mxu1 }
 0x3b9   :  { %v8893_v21 = vpop.f32.mrb[3].mxu1 }
 0x3bc   :  { %v8895_v22 = vpop.f32.mrb[4].mxu1 }
 0x3bd   :  { %v8897_v26 = vpop.f32.mrb[5].mxu1 }
 0x3c0   :  { %v7048_v27 = vpop.f32.mrb[6].mxu1 }
 0x3c1   :  { %v8900_v28 = vadd.f32 %v7048_v27, %v8885_v12  ;;  %v8902_v29 = vpop.f32.mrb[7].mxu1  ;;  %v6244_v27 = vld [vmem:[%s8516_s19 + $0x28] sm:$0xff] }
 0x3c4   :  { %v7059_v31 = vpop.f32.mrb[8].mxu1 }
 0x3c5   :  { %v1086_v32 = vadd.f32 %v7059_v31, %v6187_v30  ;;  %v1080_v35 = vpop.f32.mrb[9].mxu1 }
 0x3c6   :  { %v1081_v36 = vadd.f32 %v6187_v30, %v1080_v35  ;;  %v7788_v35 = vpack.c.bf16 %v6244_v27, %v6243_v19 }
 0x3c8   :  { %v7740_v39 = vpack.c.bf16 %v1086_v32, %v1081_v36  ;;  %v7062_v41 = vpop.f32.mrb[10].mxu1 }
 0x3c9   :  { %v1096_v42 = vadd.f32 %v7062_v41, %v6187_v30  ;;  %v1090_v44 = vpop.f32.mrb[11].mxu1 }
 0x3ca   :  { %v1091_v45 = vadd.f32 %v6187_v30, %v1090_v44  ;;  %7742 = vmatprep.subr.msk.bf16.mxu1 %vm8907_vm15, %v7740_v39  ;;  %v6245_v44 = vld [vmem:[%s8516_s19 + $0x30] sm:$0xff] }
 0x3cb   :  { %7745 = vmatpush3.bf16.xpose.msk.msra.mxu1 %vm8907_vm15, %v7740_v39 }
 0x3cc   :  { %v7746_v2 = vpack.c.bf16 %v1096_v42, %v1091_v45  ;;  %v7065_v3 = vpop.f32.mrb[12].mxu1  ;;  %v6246_v45 = vld [vmem:[%s8516_s19 + $0x38] sm:$0xff] }
 0x3cd   :  { %v1106_v48 = vadd.f32 %v7065_v3, %v6187_v30  ;;  %v1100_v49 = vpop.f32.mrb[13].mxu1  ;;  %v7792_v3 = vpack.c.bf16 %v6246_v45, %v6245_v44 }
 0x3ce   :  { %v1101_v50 = vadd.f32 %v6187_v30, %v1100_v49  ;;  %7748 = vmatprep.subr.msk.bf16.mxu1 %vm8907_vm15, %v7746_v2  ;;  %v980_v49 = vadd.f32 %v8891_v20, %v8885_v12  ;;  %v846_v20 = vshra.s32 %v8613_v5, 3 }
 0x3d0   :  { %v7752_v51 = vpack.c.bf16 %v1106_v48, %v1101_v50  ;;  %v7068_v52 = vpop.f32.mrb[14].mxu1  ;;  %v975_v48 = vadd.f32 %v8885_v12, %v8893_v21  ;;  %v985_v50 = vadd.f32 %v8885_v12, %v8897_v26  ;;  %v995_v21 = vadd.f32 %v8885_v12, %v8902_v29 }
 0x3d1   :  { %v1116_v54 = vadd.f32 %v7068_v52, %v6187_v30  ;;  %v1110_v13 = vpop.f32.mrb[15].mxu1  ;;  %v841_v26 = vshra.s32 %v8629_v14, 3 }
 0x3d2   :  { %v1111_v55 = vadd.f32 %v6187_v30, %v1110_v13 }
 0x3d3   :  { %7751 = vmatpush3.bf16.xpose.msk.msra.mxu1 %vm8907_vm15, %v7746_v2  ;;  %v970_v2 = vadd.f32 %v8887_v17, %v8885_v12  ;;  %v990_v17 = vadd.f32 %v8895_v22, %v8885_v12  ;;  %v839_v12 = vshra.s32 %v8621_v10, 3  ;;  %v838_v22 = vshra.s32 %v8615_v6, 3 }
 0x3d4   :  { %v7758_v58 = vpack.c.bf16 %v1116_v54, %v1111_v55  ;;  %v7079_v59 = vpop.f32.mrb[16].mxu1  ;;  %7754 = vmatprep.subr.msk.bf16.mxu1 %vm8907_vm15, %v7752_v51  ;;  %vm850_vm3 = vcmp.eq.s32.totalorder %v841_v26, %v846_v20  ;;  %v843_v10 = vshra.s32 %v8635_v16, 3 }
 0x3d5   :  { %v1202_v60 = vadd.f32 %v7079_v59, %v6196_v57  ;;  %v1196_v62 = vpop.f32.mrb[17].mxu1  ;;  %vm848_vm1 = vcmp.eq.s32.totalorder %v839_v12, %v846_v20  ;;  %vm847_vm2 = vcmp.eq.s32.totalorder %v838_v22, %v846_v20 }
 0x3d6   :  { %v1197_v23 = vadd.f32 %v6196_v57, %v1196_v62  ;;  %vm852_vm6 = vcmp.eq.s32.totalorder %v843_v10, %v846_v20 }
 0x3d8   :  { %v7764_v25 = vpack.c.bf16 %v1202_v60, %v1197_v23  ;;  %v7082_v56 = vpop.f32.mrb[18].mxu1 }
 0x3d9   :  { %v1212_v0 = vadd.f32 %v7082_v56, %v6196_v57  ;;  %v1206_v4 = vpop.f32.mrb[19].mxu1  ;;  %v845_v56 = vshra.s32 %v8666_v40, 3 }
 0x3da   :  { %v1207_v7 = vadd.f32 %v6196_v57, %v1206_v4  ;;  %7765 = vmatprep.subr.bf16.mxu0 %v7764_v25  ;;  %v844_v4 = vshra.s32 %v8660_v37, 3 }
 0x3db   :  { %7757 = vmatpush3.bf16.xpose.msk.msra.mxu1 %vm8907_vm15, %v7752_v51  ;;  %7767 = vmatpush3.bf16.msra.mxu0 %v7764_v25  ;;  %v8453_v51 = vmov -1e+30   ;;  %vm854_vm8 = vcmp.eq.s32.totalorder %v845_v56, %v846_v20 }
 0x3dc   :  { %v7768_v8 = vpack.c.bf16 %v1212_v0, %v1207_v7  ;;  %v7085_v9 = vpop.f32.mrb[20].mxu1  ;;  %7760 = vmatprep.subr.msk.bf16.mxu1 %vm8907_vm15, %v7758_v58  ;;  %v8973_v52 = vsel %vm848_vm1, 0.0, %v8453_v51  ;;  %v8975_v54 = vsel %vm847_vm2, 0.0, %v8453_v51  ;;  %v8985_v60 = vsel %vm850_vm3, 0.0, %v8453_v51  ;;  %vm10047_vm1 = vmand %vm6009_vm11, %vm6010_vm12 }
 0x3dd   :  { %v1222_v43 = vadd.f32 %v7085_v9, %v6196_v57  ;;  %v1216_v18 = vpop.f32.mrb[21].mxu1  ;;  %vm853_vm9 = vcmp.eq.s32.totalorder %v844_v4, %v846_v20 }
 0x3de   :  { %v1217_v30 = vadd.f32 %v6196_v57, %v1216_v18  ;;  %7769 = vmatprep.subr.bf16.mxu0 %v7768_v8  ;;  %v9019_v44 = vsel %vm853_vm9, 0.0, %v8453_v51 }
 0x3df   :  { %7771 = vmatpush3.bf16.msra.mxu0 %v7768_v8 }
 0x3e0   :  { %v7772_v31 = vpack.c.bf16 %v1222_v43, %v1217_v30  ;;  %v7088_v32 = vpop.f32.mrb[22].mxu1  ;;  %v9001_v43 = vsel %vm852_vm6, 0.0, %v8453_v51  ;;  %vm6034_vm6 = vcmask 58369  }
 0x3e1   :  { %v1232_v36 = vadd.f32 %v7088_v32, %v6196_v57  ;;  %v1226_v39 = vpop.f32.mrb[23].mxu1 }
 0x3e2   :  { %v1227_v41 = vadd.f32 %v6196_v57, %v1226_v39  ;;  %7773 = vmatprep.subr.bf16.mxu0 %v7772_v31 }
 0x3e3   :  { %7763 = vmatpush3.bf16.xpose.msk.msra.mxu1 %vm8907_vm15, %v7758_v58  ;;  %7775 = vmatpush3.bf16.msra.mxu0 %v7772_v31  ;;  %v842_v58 = vshra.s32 %v8632_v15, 3 }
 0x3e4   :  { %v7776_v42 = vpack.c.bf16 %v1232_v36, %v1227_v41  ;;  %7789 = vmatprep.subr.bf16.mxu1 %v7788_v35  ;;  %v9015_v36 = vsel %vm854_vm8, 0.0, %v8453_v51 }
 0x3e5   :  { %vm851_vm7 = vcmp.eq.s32.totalorder %v842_v58, %v846_v20 }
 0x3e6   :  { %7777 = vmatprep.subr.bf16.mxu0 %v7776_v42  ;;  %v9005_v27 = vsel %vm851_vm7, 0.0, %v8453_v51 }
 0x3e7   :  { %7779 = vmatpush3.bf16.msra.mxu0 %v7776_v42 }
 0x3ea   :  { %7106 = vmatmul.mubr.msk.f32.vlgmr.msra.gmra.mrb[24].mxu1 %vm247_vm0, %v970_v2 }
 0x3eb   :  { %7108 = vmatprep.mubr.msk.f32.mxu1 %vm247_vm0, %v975_v48  ;;  %7791 = vmatpush3.bf16.msra.mxu1 %v7788_v35 }
 0x3ec   :  { %7793 = vmatprep.subr.bf16.mxu1 %v7792_v3 }
 0x3ee   :  { %7109 = vmatmul.mubr.msk.f32.gmra.mrb[26].mxu1 %vm247_vm0, %v980_v49 }
 0x3ef   :  { %7111 = vmatprep.mubr.msk.f32.mxu1 %vm247_vm0, %v985_v50  ;;  %7795 = vmatpush3.bf16.msra.mxu1 %v7792_v3  ;;  %v6248_v3 = vld [vmem:[%s8521_s24 + $0x1] ss:$0 sm:$0xff] }
 0x3f2   :  { %7112 = vmatmul.mubr.msk.f32.gmra.mrb[28].mxu1 %vm247_vm0, %v990_v17 }
 0x3f3   :  { %7114 = vmatprep.mubr.msk.f32.mxu1 %vm247_vm0, %v995_v21 }
 0x3f6   :  { %7115 = vmatmul.mubr.msk.f32.gmra.mrb[30].mxu1 %vm247_vm0, %v8900_v28  ;;  %v840_v28 = vshra.s32 %v8624_v11, 3 }
 0x3f7   :  { %7173 = vmatprep.mubr.msk.f32.mxu1 %vm704_vm14, %v8810_v46 }
 0x3f8   :  { %vm849_vm4 = vcmp.eq.s32.totalorder %v840_v28, %v846_v20 }
 0x3f9   :  { %v8987_v62 = vsel %vm849_vm4, 0.0, %v8453_v51 }
 0x3fa   :  { %7174 = vmatmul.mubr.msk.f32.vlgmr.msra.gmra.mrb[32].mxu1 %vm704_vm14, %v8813_v47 }
 0x3fb   :  { %7176 = vmatprep.mubr.msk.f32.mxu1 %vm704_vm14, %v8821_v53 }
 0x3fe   :  { %7177 = vmatmul.mubr.msk.f32.gmra.mrb[34].mxu1 %vm704_vm14, %v8830_v63 }
 0x3ff   :  { %7179 = vmatprep.mubr.msk.f32.mxu1 %vm704_vm14, %v8827_v61 }
 0x402   :  { %7180 = vmatmul.mubr.msk.f32.gmra.mrb[36].mxu1 %vm704_vm14, %v8840_v33 }
 0x403   :  { %7182 = vmatprep.mubr.msk.f32.mxu1 %vm704_vm14, %v8835_v1 }
 0x406   :  { %7183 = vmatmul.mubr.msk.f32.gmra.mrb[38].mxu1 %vm704_vm14, %v8844_v34 }
 0x4bd   :  { %v7107_v29 = vpop.f32.mrb[24].mxu1 }
 0x4be   :  { %v1389_v13 = vmul.f32 0.25, %v7107_v29  ;;  %v1349_v55 = vpop.f32.mrb[25].mxu1 }
 0x4bf   :  { %v1388_v57 = vmul.f32 0.25, %v1349_v55 }
 0x4c0   :  { %v8980_v14 = vadd.f32 %v1389_v13, %v8973_v52 }
 0x4c1   :  { %v7110_v11 = vpop.f32.mrb[26].mxu1  ;;  %v8983_v59 = vadd.f32 %v1388_v57, %v8975_v54 }
 0x4c2   :  { %v1391_v23 = vmul.f32 0.25, %v7110_v11  ;;  %v1359_v25 = vpop.f32.mrb[27].mxu1  ;;  %v1408_v16 = vsel %vm1404_vm5, %v8980_v14, -inf }
 0x4c3   :  { %v1390_v15 = vmul.f32 0.25, %v1359_v25  ;;  %1409 = vmax.xlane.f32.xlu0 %v1408_v16  ;;  %v1405_v0 = vsel %vm1404_vm5, %v8983_v59, -inf }
 0x4c4   :  { %1406 = vmax.xlane.f32.xlu1 %v1405_v0  ;;  %v8996_v7 = vadd.f32 %v1391_v23, %v8985_v60 }
 0x4c5   :  { %v7113_v8 = vpop.f32.mrb[28].mxu1  ;;  %v8999_v9 = vadd.f32 %v1390_v15, %v8987_v62 }
 0x4c6   :  { %v1393_v18 = vmul.f32 0.25, %v7113_v8  ;;  %v1369_v40 = vpop.f32.mrb[29].mxu1  ;;  %v1414_v19 = vsel %vm1404_vm5, %v8996_v7, -inf }
 0x4c7   :  { %v1392_v30 = vmul.f32 0.25, %v1369_v40  ;;  %1415 = vmax.xlane.f32.xlu0 %v1414_v19  ;;  %v1411_v37 = vsel %vm1404_vm5, %v8999_v9, -inf }
 0x4c8   :  { %1412 = vmax.xlane.f32.xlu1 %v1411_v37  ;;  %v9010_v31 = vadd.f32 %v1393_v18, %v9001_v43 }
 0x4c9   :  { %v7116_v32 = vpop.f32.mrb[30].mxu1  ;;  %v9013_v35 = vadd.f32 %v1392_v30, %v9005_v27 }
 0x4ca   :  { %v1395_v39 = vmul.f32 0.25, %v7116_v32  ;;  %v1379_v41 = vpop.f32.mrb[31].mxu1  ;;  %v1420_v42 = vsel %vm1404_vm5, %v9010_v31, -inf }
 0x4cb   :  { %v1394_v45 = vmul.f32 0.25, %v1379_v41  ;;  %1421 = vmax.xlane.f32.xlu0 %v1420_v42  ;;  %v1417_v2 = vsel %vm1404_vm5, %v9013_v35, -inf }
 0x4cc   :  { %1418 = vmax.xlane.f32.xlu1 %v1417_v2  ;;  %v9025_v48 = vadd.f32 %v1395_v39, %v9015_v36 }
 0x4cd   :  { %v7175_v49 = vpop.f32.mrb[32].mxu1  ;;  %v9028_v50 = vadd.f32 %v1394_v45, %v9019_v44 }
 0x4ce   :  { %v1827_v17 = vadd.f32 %v7175_v49, %v6248_v3  ;;  %v1821_v21 = vpop.f32.mrb[33].mxu1  ;;  %v1426_v12 = vsel %vm1404_vm5, %v9025_v48, -inf }
 0x4cf   :  { %v1822_v20 = vadd.f32 %v6248_v3, %v1821_v21  ;;  %1427 = vmax.xlane.f32.xlu0 %v1426_v12  ;;  %v1423_v22 = vsel %vm1404_vm5, %v9028_v50, -inf }
 0x4d0   :  { %1424 = vmax.xlane.f32.xlu1 %v1423_v22 }
 0x4d1   :  { %v7804_v26 = vpack.c.bf16 %v1827_v17, %v1822_v20  ;;  %v7178_v28 = vpop.f32.mrb[34].mxu1 }
 0x4d2   :  { %v1837_v29 = vadd.f32 %v7178_v28, %v6248_v3  ;;  %v1831_v51 = vpop.f32.mrb[35].mxu1 }
 0x4d3   :  { %v1832_v13 = vadd.f32 %v6248_v3, %v1831_v51  ;;  %7806 = vmatprep.subr.msk.bf16.mxu1 %vm8907_vm15, %v7804_v26 }
 0x4d4   :  { %7809 = vmatpush3.bf16.xpose.msk.msra.mxu1 %vm8907_vm15, %v7804_v26 }
 0x4d5   :  { %v7810_v55 = vpack.c.bf16 %v1837_v29, %v1832_v13  ;;  %v7181_v10 = vpop.f32.mrb[36].mxu1 }
 0x4d6   :  { %v1847_v57 = vadd.f32 %v7181_v10, %v6248_v3  ;;  %v1841_v58 = vpop.f32.mrb[37].mxu1 }
 0x4d7   :  { %v1842_v11 = vadd.f32 %v6248_v3, %v1841_v58  ;;  %7812 = vmatprep.subr.msk.bf16.mxu1 %vm8907_vm15, %v7810_v55 }
 0x4d9   :  { %v7816_v23 = vpack.c.bf16 %v1847_v57, %v1842_v11  ;;  %v7184_v25 = vpop.f32.mrb[38].mxu1 }
 0x4da   :  { %v1857_v16 = vadd.f32 %v7184_v25, %v6248_v3  ;;  %v1851_v56 = vpop.f32.mrb[39].mxu1 }
 0x4db   :  { %v1852_v15 = vadd.f32 %v6248_v3, %v1851_v56  ;;  %v6230_v56 = vld [vmem:[%s8506_s8 + $0x28] sm:$0xff] }
 0x4dc   :  { %7815 = vmatpush3.bf16.xpose.msk.msra.mxu1 %vm8907_vm15, %v7810_v55 }
 0x4dd   :  { %v7822_v0 = vpack.c.bf16 %v1857_v16, %v1852_v15  ;;  %7818 = vmatprep.subr.msk.bf16.mxu1 %vm8907_vm15, %v7816_v23  ;;  %v6229_v16 = vld [vmem:[%s8506_s8 + $0x20] sm:$0xff] }
 0x4de   :  { %v7780_v15 = vpack.c.bf16 %v6230_v56, %v6229_v16  ;;  %v6234_v16 = vld [vmem:[%s8511_s14 + $0x1] ss:$0 sm:$0xff] }
 0x4e0   :  { %7781 = vmatprep.subr.bf16.mxu0 %v7780_v15 }
 0x4e4   :  { %7821 = vmatpush3.bf16.xpose.msk.msra.mxu1 %vm8907_vm15, %v7816_v23 }
 0x4e5   :  { %7824 = vmatprep.subr.msk.bf16.mxu1 %vm8907_vm15, %v7822_v0 }
 0x4ec   :  { %7827 = vmatpush3.bf16.xpose.msk.msra.mxu1 %vm8907_vm15, %v7822_v0 }
 0x550   :  { %v1410_v4 = vpop.xlane.xlu0 %1409 }
 0x551   :  { %v1430_v8 = vsub.f32 %v8980_v14, %v1410_v4  ;;  %v1407_v18 = vpop.xlane.xlu1 %1406 }
 0x552   :  { %v1429_v40 = vsub.f32 %v8983_v59, %v1407_v18 }
 0x553   :  { %v1439_v19 = vmul.f32 1.442695, %v1430_v8 }
 0x554   :  { %v1437_v30 = vmul.f32 1.442695, %v1429_v40  ;;  %v1416_v37 = vpop.xlane.xlu0 %1415 }
 0x555   :  { %8140 = vpow2.f32 %v1439_v19  ;;  %v1432_v32 = vsub.f32 %v8996_v7, %v1416_v37  ;;  %v1413_v39 = vpop.xlane.xlu1 %1412  ;;  %v6231_v37 = vld [vmem:[%s8506_s8 + $0x30] sm:$0xff] }
 0x556   :  { %8142 = vpow2.f32 %v1437_v30  ;;  %v1431_v41 = vsub.f32 %v8999_v9, %v1413_v39 }
 0x557   :  { %v1443_v42 = vmul.f32 1.442695, %v1432_v32  ;;  %v6232_v32 = vld [vmem:[%s8506_s8 + $0x38] sm:$0xff] }
 0x558   :  { %v1441_v45 = vmul.f32 1.442695, %v1431_v41  ;;  %v1422_v2 = vpop.xlane.xlu0 %1421 }
 0x559   :  { %8144 = vpow2.f32 %v1443_v42  ;;  %v1434_v3 = vsub.f32 %v9010_v31, %v1422_v2  ;;  %v1419_v14 = vpop.xlane.xlu1 %1418 }
 0x55a   :  { %8146 = vpow2.f32 %v1441_v45  ;;  %v1433_v59 = vsub.f32 %v9013_v35, %v1419_v14 }
 0x55b   :  { %v1447_v49 = vmul.f32 1.442695, %v1434_v3  ;;  %v7784_v3 = vpack.c.bf16 %v6232_v32, %v6231_v37 }
 0x55c   :  { %v1445_v17 = vmul.f32 1.442695, %v1433_v59  ;;  %v1428_v21 = vpop.xlane.xlu0 %1427  ;;  %v6257_v59 = vld [vmem:[%s8526_s30 + $0x20] sm:$0xff] }
 0x55d   :  { %8148 = vpow2.f32 %v1447_v49  ;;  %v1436_v7 = vsub.f32 %v9025_v48, %v1428_v21  ;;  %v1425_v12 = vpop.xlane.xlu1 %1424  ;;  %v6258_v49 = vld [vmem:[%s8526_s30 + $0x28] sm:$0xff] }
 0x55e   :  { %8150 = vpow2.f32 %v1445_v17  ;;  %v1435_v9 = vsub.f32 %v9028_v50, %v1425_v12  ;;  %v7796_v12 = vpack.c.bf16 %v6258_v49, %v6257_v59 }
 0x55f   :  { %v8141_v20 = vpop.eup %8140  ;;  %v1451_v22 = vmul.f32 1.442695, %v1436_v7 }
 0x560   :  { %v8143_v26 = vpop.eup %8142  ;;  %v1449_v28 = vmul.f32 1.442695, %v1435_v9  ;;  %v1456_v31 = vsel %vm1404_vm5, %v8141_v20, 0.0 }
 0x561   :  { %8152 = vpow2.f32 %v1451_v22  ;;  %1457 = vadd.xlane.f32.xlu0 %v1456_v31  ;;  %v1453_v35 = vsel %vm1404_vm5, %v8143_v26, 0.0 }
 0x562   :  { %8154 = vpow2.f32 %v1449_v28  ;;  %1454 = vadd.xlane.f32.xlu1 %v1453_v35 }
 0x563   :  { %v8145_v29 = vpop.eup %8144 }
 0x564   :  { %v8147_v51 = vpop.eup %8146  ;;  %v1462_v48 = vsel %vm1404_vm5, %v8145_v29, 0.0 }
 0x565   :  { %1463 = vadd.xlane.f32.xlu0 %v1462_v48  ;;  %v1459_v50 = vsel %vm1404_vm5, %v8147_v51, 0.0  ;;  %v6260_v48 = vld [vmem:[%s8526_s30 + $0x38] sm:$0xff] }
 0x566   :  { %1460 = vadd.xlane.f32.xlu1 %v1459_v50 }
 0x567   :  { %v8149_v13 = vpop.eup %8148 }
 0x568   :  { %v8151_v55 = vpop.eup %8150  ;;  %v1468_v10 = vsel %vm1404_vm5, %v8149_v13, 0.0 }
 0x569   :  { %1469 = vadd.xlane.f32.xlu0 %v1468_v10  ;;  %v1465_v57 = vsel %vm1404_vm5, %v8151_v55, 0.0 }
 0x56a   :  { %1466 = vadd.xlane.f32.xlu1 %v1465_v57 }
 0x56b   :  { %v8153_v58 = vpop.eup %8152 }
 0x56c   :  { %v8155_v11 = vpop.eup %8154  ;;  %v1474_v23 = vsel %vm1404_vm5, %v8153_v58, 0.0 }
 0x56d   :  { %1475 = vadd.xlane.f32.xlu0 %v1474_v23  ;;  %v1471_v25 = vsel %vm1404_vm5, %v8155_v11, 0.0 }
 0x56e   :  { %1472 = vadd.xlane.f32.xlu1 %v1471_v25 }
 0x5ee   :  { %v1458_v0 = vpop.xlane.xlu0 %1457 }
 0x5ef   :  { %8156 = vrcp.f32 %v1458_v0  ;;  %v1455_v4 = vpop.xlane.xlu1 %1454 }
 0x5f0   :  { %8158 = vrcp.f32 %v1455_v4 }
 0x5f2   :  { %v1464_v8 = vpop.xlane.xlu0 %1463 }
 0x5f3   :  { %8160 = vrcp.f32 %v1464_v8  ;;  %v1461_v18 = vpop.xlane.xlu1 %1460 }
 0x5f4   :  { %8162 = vrcp.f32 %v1461_v18 }
 0x5f6   :  { %v1470_v40 = vpop.xlane.xlu0 %1469 }
 0x5f7   :  { %8164 = vrcp.f32 %v1470_v40  ;;  %v1467_v19 = vpop.xlane.xlu1 %1466 }
 0x5f8   :  { %8166 = vrcp.f32 %v1467_v19 }
 0x5f9   :  { %v8157_v30 = vpop.eup %8156 }
 0x5fa   :  { %v8159_v39 = vpop.eup %8158  ;;  %v1476_v41 = vpop.xlane.xlu0 %1475  ;;  %v1480_v2 = vmul.f32 %v8157_v30, %v8141_v20 }
 0x5fb   :  { %8168 = vrcp.f32 %v1476_v41  ;;  %v1473_v42 = vpop.xlane.xlu1 %1472  ;;  %v1478_v45 = vmul.f32 %v8159_v39, %v8143_v26 }
 0x5fc   :  { %8170 = vrcp.f32 %v1473_v42 }
 0x5fd   :  { %v8161_v14 = vpop.eup %8160  ;;  %7133 = vmatprep.mubr.msk.f32.mxu0 %vm1404_vm5, %v1478_v45 }
 0x5fe   :  { %v8163_v17 = vpop.eup %8162  ;;  %7134 = vmatmul.mubr.msk.f32.vlgmr.msra.gmra.mrb[8].mxu0 %vm1404_vm5, %v1480_v2  ;;  %v1484_v7 = vmul.f32 %v8161_v14, %v8145_v29  ;;  %v6262_v2 = vld [vmem:[%s8531_s6 + $0x1] ss:$0 sm:$0xff] }
 0x5ff   :  { %v1482_v21 = vmul.f32 %v8163_v17, %v8147_v51  ;;  %7783 = vmatpush3.bf16.msra.mxu0 %v7780_v15  ;;  %v6259_v51 = vld [vmem:[%s8526_s30 + $0x30] sm:$0xff] }
 0x600   :  { %7785 = vmatprep.subr.bf16.mxu0 %v7784_v3  ;;  %v7800_v50 = vpack.c.bf16 %v6260_v48, %v6259_v51 }
 0x601   :  { %v8165_v9 = vpop.eup %8164  ;;  %7136 = vmatprep.mubr.msk.f32.mxu0 %vm1404_vm5, %v1482_v21 }
 0x602   :  { %v8167_v20 = vpop.eup %8166  ;;  %7137 = vmatmul.mubr.msk.f32.gmra.mrb[10].mxu0 %vm1404_vm5, %v1484_v7  ;;  %v1488_v26 = vmul.f32 %v8165_v9, %v8149_v13 }
 0x603   :  { %v1486_v22 = vmul.f32 %v8167_v20, %v8151_v55  ;;  %7787 = vmatpush3.bf16.msra.mxu0 %v7784_v3 }
 0x604   :  { %7797 = vmatprep.subr.bf16.mxu0 %v7796_v12 }
 0x605   :  { %v8169_v28 = vpop.eup %8168  ;;  %7139 = vmatprep.mubr.msk.f32.mxu0 %vm1404_vm5, %v1486_v22 }
 0x606   :  { %v8171_v31 = vpop.eup %8170  ;;  %7140 = vmatmul.mubr.msk.f32.gmra.mrb[12].mxu0 %vm1404_vm5, %v1488_v26  ;;  %v1492_v29 = vmul.f32 %v8169_v28, %v8153_v58 }
 0x607   :  { %v1490_v35 = vmul.f32 %v8171_v31, %v8155_v11 }
 0x609   :  { %7142 = vmatprep.mubr.msk.f32.mxu0 %vm1404_vm5, %v1490_v35 }
 0x60a   :  { %7143 = vmatmul.mubr.msk.f32.gmra.mrb[14].mxu0 %vm1404_vm5, %v1492_v29 }
 0x60b   :  { %7153 = vmatprep.mubr.msk.f32.mxu0 %vm704_vm14, %v8810_v46 }
 0x60e   :  { %7154 = vmatmul.mubr.msk.f32.vlgmr.msra.gmra.mrb[16].mxu0 %vm704_vm14, %v8813_v47 }
 0x60f   :  { %7156 = vmatprep.mubr.msk.f32.mxu0 %vm704_vm14, %v8821_v53  ;;  %7799 = vmatpush3.bf16.msra.mxu0 %v7796_v12 }
 0x610   :  { %7801 = vmatprep.subr.bf16.mxu0 %v7800_v50 }
 0x612   :  { %7157 = vmatmul.mubr.msk.f32.gmra.mrb[18].mxu0 %vm704_vm14, %v8830_v63 }
 0x613   :  { %7159 = vmatprep.mubr.msk.f32.mxu0 %vm704_vm14, %v8827_v61  ;;  %7803 = vmatpush3.bf16.msra.mxu0 %v7800_v50 }
 0x616   :  { %7160 = vmatmul.mubr.msk.f32.gmra.mrb[20].mxu0 %vm704_vm14, %v8840_v33 }
 0x617   :  { %7162 = vmatprep.mubr.msk.f32.mxu0 %vm704_vm14, %v8835_v1 }
 0x61a   :  { %7163 = vmatmul.mubr.msk.f32.gmra.mrb[22].mxu0 %vm704_vm14, %v8844_v34 }
 0x61b   :  { %7193 = vmatprep.mubr.msk.f32.mxu0 %vm704_vm14, %v8810_v46 }
 0x61e   :  { %7194 = vmatmul.mubr.msk.f32.vlgmr.msra.gmra.mrb[24].mxu0 %vm704_vm14, %v8813_v47 }
 0x61f   :  { %7196 = vmatprep.mubr.msk.f32.mxu0 %vm704_vm14, %v8821_v53 }
 0x622   :  { %7197 = vmatmul.mubr.msk.f32.gmra.mrb[26].mxu0 %vm704_vm14, %v8830_v63 }
 0x623   :  { %7199 = vmatprep.mubr.msk.f32.mxu0 %vm704_vm14, %v8827_v61 }
 0x626   :  { %7200 = vmatmul.mubr.msk.f32.gmra.mrb[28].mxu0 %vm704_vm14, %v8840_v33 }
 0x627   :  { %7202 = vmatprep.mubr.msk.f32.mxu0 %vm704_vm14, %v8835_v1 }
 0x62a   :  { %7203 = vmatmul.mubr.msk.f32.gmra.mrb[30].mxu0 %vm704_vm14, %v8844_v34 }
 0x6d1   :  { %v9114_v13 = vpop.f32.mrb[8].mxu0 }
 0x6d2   :  { %v9116_v55 = vpop.f32.mrb[9].mxu0 }
 0x6d5   :  { %v9118_v10 = vpop.f32.mrb[10].mxu0 }
 0x6d6   :  { %v9120_v57 = vpop.f32.mrb[11].mxu0 }
 0x6d9   :  { %v9122_v58 = vpop.f32.mrb[12].mxu0 }
 0x6da   :  { %v9124_v11 = vpop.f32.mrb[13].mxu0 }
 0x6dd   :  { %v9126_v23 = vpop.f32.mrb[14].mxu0 }
 0x6de   :  { %v9128_v25 = vpop.f32.mrb[15].mxu0 }
 0x6e1   :  { %v7155_v56 = vpop.f32.mrb[16].mxu0 }
 0x6e2   :  { %v1703_v15 = vpop.f32.mrb[17].mxu0  ;;  %v1709_v4 = vadd.f32 %v7155_v56, %v6234_v16 }
 0x6e3   :  { %v1704_v0 = vadd.f32 %v6234_v16, %v1703_v15 }
 0x6e5   :  { %v7158_v8 = vpop.f32.mrb[18].mxu0  ;;  %7221 = vmatprep.mubr.msk.f32.mxu1 %vm247_vm0, %v1704_v0 }
 0x6e6   :  { %v1713_v18 = vpop.f32.mrb[19].mxu0  ;;  %7222 = vmatmul.mubr.msk.f32.vlgmr.msra.gmra.mrb[40].mxu1 %vm247_vm0, %v1709_v4  ;;  %v1719_v19 = vadd.f32 %v7158_v8, %v6234_v16 }
 0x6e7   :  { %v1714_v40 = vadd.f32 %v6234_v16, %v1713_v18 }
 0x6e9   :  { %v7161_v30 = vpop.f32.mrb[20].mxu0  ;;  %7224 = vmatprep.mubr.msk.f32.mxu1 %vm247_vm0, %v1714_v40 }
 0x6ea   :  { %v1723_v37 = vpop.f32.mrb[21].mxu0  ;;  %7225 = vmatmul.mubr.msk.f32.gmra.mrb[42].mxu1 %vm247_vm0, %v1719_v19  ;;  %v1729_v39 = vadd.f32 %v7161_v30, %v6234_v16 }
 0x6eb   :  { %v1724_v32 = vadd.f32 %v6234_v16, %v1723_v37 }
 0x6ed   :  { %v7164_v41 = vpop.f32.mrb[22].mxu0  ;;  %7227 = vmatprep.mubr.msk.f32.mxu1 %vm247_vm0, %v1724_v32 }
 0x6ee   :  { %v1733_v42 = vpop.f32.mrb[23].mxu0  ;;  %7228 = vmatmul.mubr.msk.f32.gmra.mrb[44].mxu1 %vm247_vm0, %v1729_v39  ;;  %v1739_v3 = vadd.f32 %v7164_v41, %v6234_v16 }
 0x6ef   :  { %v1734_v45 = vadd.f32 %v6234_v16, %v1733_v42 }
 0x6f1   :  { %v7195_v14 = vpop.f32.mrb[24].mxu0  ;;  %7230 = vmatprep.mubr.msk.f32.mxu1 %vm247_vm0, %v1734_v45 }
 0x6f2   :  { %v1945_v59 = vadd.f32 %v7195_v14, %v6262_v2  ;;  %v1939_v49 = vpop.f32.mrb[25].mxu0  ;;  %7231 = vmatmul.mubr.msk.f32.gmra.mrb[46].mxu1 %vm247_vm0, %v1739_v3 }
 0x6f3   :  { %v1940_v17 = vadd.f32 %v6262_v2, %v1939_v49 }
 0x6f5   :  { %v7828_v21 = vpack.c.bf16 %v1945_v59, %v1940_v17  ;;  %v7198_v7 = vpop.f32.mrb[26].mxu0 }
 0x6f6   :  { %v1955_v12 = vadd.f32 %v7198_v7, %v6262_v2  ;;  %v1949_v9 = vpop.f32.mrb[27].mxu0 }
 0x6f7   :  { %v1950_v20 = vadd.f32 %v6262_v2, %v1949_v9  ;;  %7829 = vmatprep.subr.bf16.mxu0 %v7828_v21 }
 0x6f8   :  { %7831 = vmatpush3.bf16.msra.mxu0 %v7828_v21 }
 0x6f9   :  { %v7832_v22 = vpack.c.bf16 %v1955_v12, %v1950_v20  ;;  %v7201_v26 = vpop.f32.mrb[28].mxu0 }
 0x6fa   :  { %v1965_v28 = vadd.f32 %v7201_v26, %v6262_v2  ;;  %v1959_v31 = vpop.f32.mrb[29].mxu0 }
 0x6fb   :  { %v1960_v35 = vadd.f32 %v6262_v2, %v1959_v31  ;;  %7833 = vmatprep.subr.bf16.mxu0 %v7832_v22 }
 0x6fc   :  { %7835 = vmatpush3.bf16.msra.mxu0 %v7832_v22 }
 0x6fd   :  { %v7836_v29 = vpack.c.bf16 %v1965_v28, %v1960_v35  ;;  %v7204_v51 = vpop.f32.mrb[30].mxu0 }
 0x6fe   :  { %v1975_v48 = vadd.f32 %v7204_v51, %v6262_v2  ;;  %v1969_v50 = vpop.f32.mrb[31].mxu0 }
 0x6ff   :  { %v1970_v16 = vadd.f32 %v6262_v2, %v1969_v50  ;;  %7837 = vmatprep.subr.bf16.mxu0 %v7836_v29 }
 0x700   :  { %7839 = vmatpush3.bf16.msra.mxu0 %v7836_v29 }
 0x701   :  { %v7840_v56 = vpack.c.bf16 %v1975_v48, %v1970_v16 }
 0x703   :  { %7841 = vmatprep.subr.bf16.mxu0 %v7840_v56 }
 0x704   :  { %7843 = vmatpush3.bf16.msra.mxu0 %v7840_v56 }
 0x7b9   :  { %v7223_v15 = vpop.f32.mrb[40].mxu1 }
 0x7ba   :  { %v2132_v0 = vmul.f32 0.25, %v7223_v15  ;;  %v2092_v4 = vpop.f32.mrb[41].mxu1 }
 0x7bb   :  { %v2131_v8 = vmul.f32 0.25, %v2092_v4 }
 0x7bc   :  { %v2140_v18 = vadd.f32 %v2132_v0, %v8973_v52 }
 0x7bd   :  { %v7226_v40 = vpop.f32.mrb[42].mxu1  ;;  %v2139_v19 = vadd.f32 %v2131_v8, %v8975_v54 }
 0x7be   :  { %v2134_v30 = vmul.f32 0.25, %v7226_v40  ;;  %v2102_v37 = vpop.f32.mrb[43].mxu1  ;;  %v2150_v32 = vsel %vm1404_vm5, %v2140_v18, -inf }
 0x7bf   :  { %v2133_v39 = vmul.f32 0.25, %v2102_v37  ;;  %2151 = vmax.xlane.f32.xlu0 %v2150_v32  ;;  %v2147_v41 = vsel %vm1404_vm5, %v2139_v19, -inf }
 0x7c0   :  { %2148 = vmax.xlane.f32.xlu1 %v2147_v41  ;;  %v2142_v42 = vadd.f32 %v2134_v30, %v8985_v60 }
 0x7c1   :  { %v7229_v45 = vpop.f32.mrb[44].mxu1  ;;  %v2141_v2 = vadd.f32 %v2133_v39, %v8987_v62 }
 0x7c2   :  { %v2136_v3 = vmul.f32 0.25, %v7229_v45  ;;  %v2112_v14 = vpop.f32.mrb[45].mxu1  ;;  %v2156_v59 = vsel %vm1404_vm5, %v2142_v42, -inf }
 0x7c3   :  { %v2135_v49 = vmul.f32 0.25, %v2112_v14  ;;  %2157 = vmax.xlane.f32.xlu0 %v2156_v59  ;;  %v2153_v17 = vsel %vm1404_vm5, %v2141_v2, -inf }
 0x7c4   :  { %2154 = vmax.xlane.f32.xlu1 %v2153_v17  ;;  %v2144_v21 = vadd.f32 %v2136_v3, %v9001_v43 }
 0x7c5   :  { %v7232_v7 = vpop.f32.mrb[46].mxu1  ;;  %v2143_v12 = vadd.f32 %v2135_v49, %v9005_v27 }
 0x7c6   :  { %v2138_v9 = vmul.f32 0.25, %v7232_v7  ;;  %v2122_v20 = vpop.f32.mrb[47].mxu1  ;;  %v2162_v22 = vsel %vm1404_vm5, %v2144_v21, -inf }
 0x7c7   :  { %v2137_v26 = vmul.f32 0.25, %v2122_v20  ;;  %2163 = vmax.xlane.f32.xlu0 %v2162_v22  ;;  %v2159_v28 = vsel %vm1404_vm5, %v2143_v12, -inf }
 0x7c8   :  { %2160 = vmax.xlane.f32.xlu1 %v2159_v28  ;;  %v2146_v31 = vadd.f32 %v2138_v9, %v9015_v36 }
 0x7c9   :  { %v2145_v35 = vadd.f32 %v2137_v26, %v9019_v44 }
 0x7ca   :  { %v2168_v29 = vsel %vm1404_vm5, %v2146_v31, -inf }
 0x7cb   :  { %2169 = vmax.xlane.f32.xlu0 %v2168_v29  ;;  %v2165_v51 = vsel %vm1404_vm5, %v2145_v35, -inf }
 0x7cc   :  { %2166 = vmax.xlane.f32.xlu1 %v2165_v51 }
 0x84c   :  { %v2152_v48 = vpop.xlane.xlu0 %2151 }
 0x84d   :  { %v2172_v50 = vsub.f32 %v2140_v18, %v2152_v48  ;;  %v2149_v16 = vpop.xlane.xlu1 %2148 }
 0x84e   :  { %v2171_v56 = vsub.f32 %v2139_v19, %v2149_v16 }
 0x84f   :  { %v2181_v15 = vmul.f32 1.442695, %v2172_v50 }
 0x850   :  { %v2179_v0 = vmul.f32 1.442695, %v2171_v56  ;;  %v2158_v4 = vpop.xlane.xlu0 %2157 }
 0x851   :  { %8172 = vpow2.f32 %v2181_v15  ;;  %v2174_v8 = vsub.f32 %v2142_v42, %v2158_v4  ;;  %v2155_v40 = vpop.xlane.xlu1 %2154  ;;  %v6295_v15 = vld [vmem:[%s8536_s12 + $0x10] sm:$0xff] }
 0x852   :  { %8174 = vpow2.f32 %v2179_v0  ;;  %v2173_v30 = vsub.f32 %v2141_v2, %v2155_v40  ;;  %v6296_v0 = vld [vmem:[%s8536_s12 + $0x18] sm:$0xff] }
 0x853   :  { %v2185_v37 = vmul.f32 1.442695, %v2174_v8  ;;  %v7844_v4 = vpack.c.bf16 %v6296_v0, %v6295_v15 }
 0x854   :  { %v2183_v32 = vmul.f32 1.442695, %v2173_v30  ;;  %v2164_v39 = vpop.xlane.xlu0 %2163 }
 0x855   :  { %8176 = vpow2.f32 %v2185_v37  ;;  %v2176_v41 = vsub.f32 %v2144_v21, %v2164_v39  ;;  %v2161_v45 = vpop.xlane.xlu1 %2160  ;;  %7845 = vmatprep.subr.bf16.mxu0 %v7844_v4 }
 0x856   :  { %8178 = vpow2.f32 %v2183_v32  ;;  %v2175_v3 = vsub.f32 %v2143_v12, %v2161_v45 }
 0x857   :  { %v2189_v14 = vmul.f32 1.442695, %v2176_v41 }
 0x858   :  { %v2187_v18 = vmul.f32 1.442695, %v2175_v3  ;;  %v2170_v59 = vpop.xlane.xlu0 %2169 }
 0x859   :  { %8180 = vpow2.f32 %v2189_v14  ;;  %v2178_v19 = vsub.f32 %v2146_v31, %v2170_v59  ;;  %v2167_v49 = vpop.xlane.xlu1 %2166 }
 0x85a   :  { %8182 = vpow2.f32 %v2187_v18  ;;  %v2177_v17 = vsub.f32 %v2145_v35, %v2167_v49 }
 0x85b   :  { %v8173_v42 = vpop.eup %8172  ;;  %v2193_v7 = vmul.f32 1.442695, %v2178_v19 }
 0x85c   :  { %v8175_v9 = vpop.eup %8174  ;;  %v2191_v2 = vmul.f32 1.442695, %v2177_v17  ;;  %v2198_v20 = vsel %vm1404_vm5, %v8173_v42, 0.0 }
 0x85d   :  { %8184 = vpow2.f32 %v2193_v7  ;;  %2199 = vadd.xlane.f32.xlu0 %v2198_v20  ;;  %v2195_v21 = vsel %vm1404_vm5, %v8175_v9, 0.0 }
 0x85e   :  { %8186 = vpow2.f32 %v2191_v2  ;;  %2196 = vadd.xlane.f32.xlu1 %v2195_v21 }
 0x85f   :  { %v8177_v12 = vpop.eup %8176 }
 0x860   :  { %v8179_v22 = vpop.eup %8178  ;;  %v2204_v26 = vsel %vm1404_vm5, %v8177_v12, 0.0 }
 0x861   :  { %2205 = vadd.xlane.f32.xlu0 %v2204_v26  ;;  %v2201_v28 = vsel %vm1404_vm5, %v8179_v22, 0.0 }
 0x862   :  { %2202 = vadd.xlane.f32.xlu1 %v2201_v28 }
 0x863   :  { %v8181_v31 = vpop.eup %8180 }
 0x864   :  { %v8183_v35 = vpop.eup %8182  ;;  %v2210_v29 = vsel %vm1404_vm5, %v8181_v31, 0.0 }
 0x865   :  { %2211 = vadd.xlane.f32.xlu0 %v2210_v29  ;;  %v2207_v51 = vsel %vm1404_vm5, %v8183_v35, 0.0  ;;  %v1623_v29 = vld [vmem:[%s8536_s12 + $0x8] sm:$0xff] }
 0x866   :  { %2208 = vadd.xlane.f32.xlu1 %v2207_v51 }
 0x867   :  { %v8185_v48 = vpop.eup %8184 }
 0x868   :  { %v8187_v50 = vpop.eup %8186  ;;  %v2216_v16 = vsel %vm1404_vm5, %v8185_v48, 0.0 }
 0x869   :  { %2217 = vadd.xlane.f32.xlu0 %v2216_v16  ;;  %v2213_v56 = vsel %vm1404_vm5, %v8187_v50, 0.0 }
 0x86a   :  { %2214 = vadd.xlane.f32.xlu1 %v2213_v56 }
 0x8ea   :  { %v2200_v8 = vpop.xlane.xlu0 %2199 }
 0x8eb   :  { %8188 = vrcp.f32 %v2200_v8  ;;  %v2197_v40 = vpop.xlane.xlu1 %2196 }
 0x8ec   :  { %8190 = vrcp.f32 %v2197_v40 }
 0x8ee   :  { %v2206_v30 = vpop.xlane.xlu0 %2205 }
 0x8ef   :  { %8192 = vrcp.f32 %v2206_v30  ;;  %v2203_v37 = vpop.xlane.xlu1 %2202 }
 0x8f0   :  { %8194 = vrcp.f32 %v2203_v37 }
 0x8f2   :  { %v2212_v32 = vpop.xlane.xlu0 %2211 }
 0x8f3   :  { %8196 = vrcp.f32 %v2212_v32  ;;  %v2209_v39 = vpop.xlane.xlu1 %2208 }
 0x8f4   :  { %8198 = vrcp.f32 %v2209_v39 }
 0x8f5   :  { %v8189_v41 = vpop.eup %8188 }
 0x8f6   :  { %v8191_v45 = vpop.eup %8190  ;;  %v2218_v3 = vpop.xlane.xlu0 %2217  ;;  %v2222_v59 = vmul.f32 %v8189_v41, %v8173_v42 }
 0x8f7   :  { %8200 = vrcp.f32 %v2218_v3  ;;  %v2215_v14 = vpop.xlane.xlu1 %2214  ;;  %v2220_v18 = vmul.f32 %v8191_v45, %v8175_v9 }
 0x8f8   :  { %8202 = vrcp.f32 %v2215_v14 }
 0x8f9   :  { %v8193_v19 = vpop.eup %8192  ;;  %7249 = vmatprep.mubr.msk.f32.mxu0 %vm1404_vm5, %v2220_v18 }
 0x8fa   :  { %v8195_v49 = vpop.eup %8194  ;;  %7250 = vmatmul.mubr.msk.f32.vlgmr.msra.gmra.mrb[32].mxu0 %vm1404_vm5, %v2222_v59  ;;  %v2226_v7 = vmul.f32 %v8193_v19, %v8177_v12  ;;  %v1622_v12 = vld [vmem:[%s8536_s12] sm:$0xff] }
 0x8fb   :  { %v2224_v17 = vmul.f32 %v8195_v49, %v8179_v22  ;;  %7847 = vmatpush3.bf16.msra.mxu0 %v7844_v4  ;;  %v7848_v51 = vpack.c.bf16 %v1623_v29, %v1622_v12 }
 0x8fd   :  { %v8197_v2 = vpop.eup %8196  ;;  %7252 = vmatprep.mubr.msk.f32.mxu0 %vm1404_vm5, %v2224_v17  ;;  %7849 = vmatprep.subr.bf16.mxu0 %v7848_v51 }
 0x8fe   :  { %v8199_v20 = vpop.eup %8198  ;;  %7253 = vmatmul.mubr.msk.f32.gmra.mrb[34].mxu0 %vm1404_vm5, %v2226_v7  ;;  %v2230_v42 = vmul.f32 %v8197_v2, %v8181_v31 }
 0x8ff   :  { %v2228_v9 = vmul.f32 %v8199_v20, %v8183_v35 }
 0x901   :  { %v8201_v21 = vpop.eup %8200  ;;  %7255 = vmatprep.mubr.msk.f32.mxu0 %vm1404_vm5, %v2228_v9 }
 0x902   :  { %v8203_v26 = vpop.eup %8202  ;;  %7256 = vmatmul.mubr.msk.f32.gmra.mrb[36].mxu0 %vm1404_vm5, %v2230_v42  ;;  %v2234_v22 = vmul.f32 %v8201_v21, %v8185_v48 }
 0x903   :  { %v2232_v28 = vmul.f32 %v8203_v26, %v8187_v50 }
 0x905   :  { %7258 = vmatprep.mubr.msk.f32.mxu0 %vm1404_vm5, %v2232_v28 }
 0x906   :  { %7259 = vmatmul.mubr.msk.f32.gmra.mrb[38].mxu0 %vm1404_vm5, %v2234_v22 }
 0x9cd   :  { %v7251_v16 = vpop.f32.mrb[32].mxu0 }
 0x9ce   :  { %v2325_v56 = vpop.f32.mrb[33].mxu0 }
 0x9cf   :  { %7265 = vmatprep.mubr.msk.f32.mxu0 %vm247_vm0, %v2325_v56 }
 0x9d0   :  { %7266 = vmatmul.mubr.msk.f32.vlgmr.msra.gmra.mrb[40].mxu0 %vm247_vm0, %v7251_v16 }
 0x9d1   :  { %v7254_v31 = vpop.f32.mrb[34].mxu0  ;;  %7851 = vmatpush3.bf16.msra.mxu0 %v7848_v51 }
 0x9d2   :  { %v2335_v35 = vpop.f32.mrb[35].mxu0 }
 0x9d3   :  { %7268 = vmatprep.mubr.msk.f32.mxu0 %vm247_vm0, %v2335_v35 }
 0x9d4   :  { %7269 = vmatmul.mubr.msk.f32.gmra.mrb[42].mxu0 %vm247_vm0, %v7254_v31 }
 0x9d5   :  { %v7257_v48 = vpop.f32.mrb[36].mxu0 }
 0x9d6   :  { %v2345_v50 = vpop.f32.mrb[37].mxu0 }
 0x9d7   :  { %7271 = vmatprep.mubr.msk.f32.mxu0 %vm247_vm0, %v2345_v50 }
 0x9d8   :  { %7272 = vmatmul.mubr.msk.f32.gmra.mrb[44].mxu0 %vm247_vm0, %v7257_v48 }
 0x9d9   :  { %v7260_v15 = vpop.f32.mrb[38].mxu0 }
 0x9da   :  { %v2355_v0 = vpop.f32.mrb[39].mxu0 }
 0x9db   :  { %7274 = vmatprep.mubr.msk.f32.mxu0 %vm247_vm0, %v2355_v0 }
 0x9dc   :  { %7275 = vmatmul.mubr.msk.f32.gmra.mrb[46].mxu0 %vm247_vm0, %v7260_v15 }
 0x9dd   :  { %7281 = vmatprep.mubr.msk.f32.mxu0 %vm247_vm0, %v9116_v55  ;;  %v6313_v55 = vld [vmem:[%s10107_s0] ss:$0 sm:$0xff] }
 0x9e0   :  { %7282 = vmatmul.mubr.msk.f32.vlgmr.msra.gmra.mrb[40].mxu0 %vm247_vm0, %v9114_v13 }
 0x9e1   :  { %7284 = vmatprep.mubr.msk.f32.mxu0 %vm247_vm0, %v9120_v57 }
 0x9e4   :  { %7285 = vmatmul.mubr.msk.f32.gmra.mrb[42].mxu0 %vm247_vm0, %v9118_v10 }
 0x9e5   :  { %7287 = vmatprep.mubr.msk.f32.mxu0 %vm247_vm0, %v9124_v11 }
 0x9e8   :  { %7288 = vmatmul.mubr.msk.f32.gmra.mrb[44].mxu0 %vm247_vm0, %v9122_v58 }
 0x9e9   :  { %7290 = vmatprep.mubr.msk.f32.mxu0 %vm247_vm0, %v9128_v25 }
 0x9ec   :  { %7291 = vmatmul.mubr.msk.f32.gmra.mrb[46].mxu0 %vm247_vm0, %v9126_v23 }
 0xab3   :  { %v7283_v13 = vpop.f32.mrb[40].mxu0 }
 0xab4   :  { %v2633_v4 = vadd.f32 %v7283_v13, %v6313_v55  ;;  %v2586_v8 = vpop.f32.mrb[41].mxu0 }
 0xab5   :  { %v2632_v57 = vadd.f32 %v6313_v55, %v2586_v8 }
 0xab6   :  { %v2641_v40 = vadd.f32 %v2633_v4, %v8813_v47 }
 0xab7   :  { %v7286_v10 = vpop.f32.mrb[42].mxu0  ;;  %v2640_v30 = vadd.f32 %v2632_v57, %v8810_v46 }
 0xab8   :  { %v2635_v11 = vadd.f32 %v7286_v10, %v6313_v55  ;;  %v2596_v37 = vpop.f32.mrb[43].mxu0  ;;  %v2653_v58 = vsel %vm704_vm14, %v2641_v40, 0.0 }
 0xab9   :  { %v2634_v32 = vadd.f32 %v6313_v55, %v2596_v37  ;;  %2654 = vadd.xlane.f32.xlu0 %v2653_v58  ;;  %v2650_v25 = vsel %vm704_vm14, %v2640_v30, 0.0 }
 0xaba   :  { %2651 = vadd.xlane.f32.xlu1 %v2650_v25  ;;  %v2643_v23 = vadd.f32 %v2635_v11, %v8830_v63 }
 0xabb   :  { %v7289_v39 = vpop.f32.mrb[44].mxu0  ;;  %v2642_v41 = vadd.f32 %v2634_v32, %v8821_v53 }
 0xabc   :  { %v2637_v45 = vadd.f32 %v7289_v39, %v6313_v55  ;;  %v2606_v3 = vpop.f32.mrb[45].mxu0  ;;  %v2659_v47 = vsel %vm704_vm14, %v2643_v23, 0.0 }
 0xabd   :  { %v2636_v14 = vadd.f32 %v6313_v55, %v2606_v3  ;;  %2660 = vadd.xlane.f32.xlu0 %v2659_v47  ;;  %v2656_v46 = vsel %vm704_vm14, %v2642_v41, 0.0 }
 0xabe   :  { %2657 = vadd.xlane.f32.xlu1 %v2656_v46  ;;  %v2645_v18 = vadd.f32 %v2637_v45, %v8840_v33 }
 0xabf   :  { %v7292_v59 = vpop.f32.mrb[46].mxu0  ;;  %v2644_v19 = vadd.f32 %v2636_v14, %v8827_v61 }
 0xac0   :  { %v2639_v49 = vadd.f32 %v7292_v59, %v6313_v55  ;;  %v2616_v17 = vpop.f32.mrb[47].mxu0  ;;  %v2665_v63 = vsel %vm704_vm14, %v2645_v18, 0.0  ;;  %v2783_v59 = vld [vmem:[%s10108_s5 + $0x8] sm:$0xff] }
 0xac1   :  { %v2638_v7 = vadd.f32 %v6313_v55, %v2616_v17  ;;  %2666 = vadd.xlane.f32.xlu0 %v2665_v63  ;;  %v2662_v53 = vsel %vm704_vm14, %v2644_v19, 0.0  ;;  %v2785_v17 = vld [vmem:[%s10108_s5 + $0x18] sm:$0xff] }
 0xac2   :  { %2663 = vadd.xlane.f32.xlu1 %v2662_v53  ;;  %v2647_v2 = vadd.f32 %v2639_v49, %v8844_v34  ;;  %v2784_v49 = vld [vmem:[%s10108_s5 + $0x10] sm:$0xff] }
 0xac3   :  { %v2646_v20 = vadd.f32 %v2638_v7, %v8835_v1  ;;  %v7856_v63 = vpack.c.bf16 %v2785_v17, %v2784_v49 }
 0xac4   :  { %v2671_v9 = vsel %vm704_vm14, %v2647_v2, 0.0 }
 0xac5   :  { %2672 = vadd.xlane.f32.xlu0 %v2671_v9  ;;  %v2668_v33 = vsel %vm704_vm14, %v2646_v20, 0.0 }
 0xac6   :  { %2669 = vadd.xlane.f32.xlu1 %v2668_v33 }
 0xb46   :  { %v2655_v61 = vpop.xlane.xlu0 %2654 }
 0xb47   :  { %v2675_v42 = vmul.f32 0.03125, %v2655_v61  ;;  %v2652_v21 = vpop.xlane.xlu1 %2651 }
 0xb48   :  { %v2674_v26 = vmul.f32 0.03125, %v2652_v21 }
 0xb49   :  { %v9217_v28 = vsub.f32 %v2641_v40, %v2675_v42 }
 0xb4a   :  { %v9219_v22 = vsub.f32 %v2640_v30, %v2674_v26  ;;  %v2661_v12 = vpop.xlane.xlu0 %2660 }
 0xb4b   :  { %v2677_v29 = vmul.f32 0.03125, %v2661_v12  ;;  %v2658_v51 = vpop.xlane.xlu1 %2657  ;;  %v2691_v1 = vmul.f32 %v9217_v28, %v9217_v28 }
 0xb4c   :  { %v2676_v34 = vmul.f32 0.03125, %v2658_v51  ;;  %v2690_v16 = vmul.f32 %v9219_v22, %v9219_v22 }
 0xb4d   :  { %v9225_v56 = vsub.f32 %v2643_v23, %v2677_v29  ;;  %v2701_v31 = vsel %vm704_vm14, %v2691_v1, 0.0 }
 0xb4e   :  { %v9228_v35 = vsub.f32 %v2642_v41, %v2676_v34  ;;  %v2667_v48 = vpop.xlane.xlu0 %2666  ;;  %2702 = vadd.xlane.f32.xlu0 %v2701_v31  ;;  %v2698_v50 = vsel %vm704_vm14, %v2690_v16, 0.0 }
 0xb4f   :  { %v2679_v15 = vmul.f32 0.03125, %v2667_v48  ;;  %v2664_v0 = vpop.xlane.xlu1 %2663  ;;  %2699 = vadd.xlane.f32.xlu1 %v2698_v50  ;;  %v2693_v55 = vmul.f32 %v9225_v56, %v9225_v56 }
 0xb50   :  { %v2678_v13 = vmul.f32 0.03125, %v2664_v0  ;;  %v2692_v4 = vmul.f32 %v9228_v35, %v9228_v35 }
 0xb51   :  { %v9235_v8 = vsub.f32 %v2645_v18, %v2679_v15  ;;  %v2707_v57 = vsel %vm704_vm14, %v2693_v55, 0.0  ;;  %v2782_v18 = vld [vmem:[%s10108_s5] sm:$0xff] }
 0xb52   :  { %v9238_v40 = vsub.f32 %v2644_v19, %v2678_v13  ;;  %2708 = vadd.xlane.f32.xlu0 %v2707_v57  ;;  %v2673_v10 = vpop.xlane.xlu0 %2672  ;;  %v2704_v30 = vsel %vm704_vm14, %v2692_v4, 0.0  ;;  %v7852_v19 = vpack.c.bf16 %v2783_v59, %v2782_v18  ;;  %v6314_v4 = vld [vmem:[%s10109_s9] ss:$0 sm:$0xff] }
 0xb53   :  { %v2681_v11 = vmul.f32 0.03125, %v2673_v10  ;;  %2705 = vadd.xlane.f32.xlu1 %v2704_v30  ;;  %v2670_v37 = vpop.xlane.xlu1 %2669  ;;  %v2695_v58 = vmul.f32 %v9235_v8, %v9235_v8 }
 0xb54   :  { %v2680_v32 = vmul.f32 0.03125, %v2670_v37  ;;  %v2694_v25 = vmul.f32 %v9238_v40, %v9238_v40  ;;  %7853 = vmatprep.subr.bf16.mxu1 %v7852_v19 }
 0xb55   :  { %v9245_v23 = vsub.f32 %v2647_v2, %v2681_v11  ;;  %v2713_v39 = vsel %vm704_vm14, %v2695_v58, 0.0  ;;  %7855 = vmatpush3.bf16.msra.mxu1 %v7852_v19 }
 0xb56   :  { %v9248_v41 = vsub.f32 %v2646_v20, %v2680_v32  ;;  %2714 = vadd.xlane.f32.xlu0 %v2713_v39  ;;  %v2710_v45 = vsel %vm704_vm14, %v2694_v25, 0.0  ;;  %7857 = vmatprep.subr.bf16.mxu1 %v7856_v63  ;;  %v6315_v32 = vld [vmem:[%s10110_s17] ss:$0 sm:$0xff] }
 0xb57   :  { %2711 = vadd.xlane.f32.xlu1 %v2710_v45  ;;  %v2697_v3 = vmul.f32 %v9245_v23, %v9245_v23 }
 0xb58   :  { %v2696_v47 = vmul.f32 %v9248_v41, %v9248_v41 }
 0xb59   :  { %v2719_v14 = vsel %vm704_vm14, %v2697_v3, 0.0  ;;  %7859 = vmatpush3.bf16.msra.mxu1 %v7856_v63 }
 0xb5a   :  { %2720 = vadd.xlane.f32.xlu0 %v2719_v14  ;;  %v2716_v46 = vsel %vm704_vm14, %v2696_v47, 0.0 }
 0xb5b   :  { %2717 = vadd.xlane.f32.xlu1 %v2716_v46 }
 0xbdb   :  { %v2703_v7 = vpop.xlane.xlu0 %2702 }
 0xbdc   :  { %v2723_v53 = vmul.f32 0.03125, %v2703_v7  ;;  %v2700_v2 = vpop.xlane.xlu1 %2699 }
 0xbdd   :  { %v2722_v20 = vmul.f32 0.03125, %v2700_v2 }
 0xbde   :  { %v2731_v9 = vadd.f32 1e-12, %v2723_v53 }
 0xbdf   :  { %v2730_v33 = vadd.f32 1e-12, %v2722_v20  ;;  %v2709_v61 = vpop.xlane.xlu0 %2708 }
 0xbe0   :  { %8204 = vrsqrt.f32 %v2731_v9  ;;  %v2725_v42 = vmul.f32 0.03125, %v2709_v61  ;;  %v2706_v21 = vpop.xlane.xlu1 %2705 }
 0xbe1   :  { %8206 = vrsqrt.f32 %v2730_v33  ;;  %v2724_v26 = vmul.f32 0.03125, %v2706_v21 }
 0xbe2   :  { %v2733_v12 = vadd.f32 1e-12, %v2725_v42  ;;  %v2995_v42 = vld [vmem:[%s10111_s21 + $0x8] sm:$0xff] }
 0xbe3   :  { %v2732_v29 = vadd.f32 1e-12, %v2724_v26  ;;  %v2715_v51 = vpop.xlane.xlu0 %2714  ;;  %v2996_v26 = vld [vmem:[%s10111_s21 + $0x10] sm:$0xff] }
 0xbe4   :  { %8208 = vrsqrt.f32 %v2733_v12  ;;  %v2727_v1 = vmul.f32 0.03125, %v2715_v51  ;;  %v2712_v34 = vpop.xlane.xlu1 %2711  ;;  %v2997_v12 = vld [vmem:[%s10111_s21 + $0x18] sm:$0xff]  ;;  %v2998_v51 = vld [vmem:[%s10111_s21 + $0x20] sm:$0xff] }
 0xbe5   :  { %8210 = vrsqrt.f32 %v2732_v29  ;;  %v2726_v16 = vmul.f32 0.03125, %v2712_v34  ;;  %v7864_v29 = vpack.c.bf16 %v2997_v12, %v2996_v26 }
 0xbe6   :  { %v2735_v31 = vadd.f32 1e-12, %v2727_v1  ;;  %v2999_v1 = vld [vmem:[%s10111_s21 + $0x28] sm:$0xff] }
 0xbe7   :  { %v2734_v48 = vadd.f32 1e-12, %v2726_v16  ;;  %v2721_v50 = vpop.xlane.xlu0 %2720  ;;  %v7868_v34 = vpack.c.bf16 %v2999_v1, %v2998_v51  ;;  %v3000_v16 = vld [vmem:[%s10111_s21 + $0x30] sm:$0xff] }
 0xbe8   :  { %8212 = vrsqrt.f32 %v2735_v31  ;;  %v2729_v15 = vmul.f32 0.03125, %v2721_v50  ;;  %v2718_v0 = vpop.xlane.xlu1 %2717  ;;  %v3001_v31 = vld [vmem:[%s10111_s21 + $0x38] sm:$0xff]  ;;  %v6316_v50 = vld [vmem:[%s10112_s25] ss:$0 sm:$0xff] }
 0xbe9   :  { %8214 = vrsqrt.f32 %v2734_v48  ;;  %v2728_v55 = vmul.f32 0.03125, %v2718_v0  ;;  %v7872_v48 = vpack.c.bf16 %v3001_v31, %v3000_v16 }
 0xbea   :  { %v8205_v13 = vpop.eup %8204  ;;  %v2737_v57 = vadd.f32 1e-12, %v2729_v15 }
 0xbeb   :  { %v8207_v10 = vpop.eup %8206  ;;  %v2747_v30 = vmul.f32 %v8205_v13, %v9217_v28  ;;  %v2736_v11 = vadd.f32 1e-12, %v2728_v55 }
 0xbec   :  { %8216 = vrsqrt.f32 %v2737_v57  ;;  %v2746_v37 = vmul.f32 %v8207_v10, %v9219_v22 }
 0xbed   :  { %v2761_v58 = vmul.f32 %v6314_v4, %v2747_v30  ;;  %8218 = vrsqrt.f32 %v2736_v11 }
 0xbee   :  { %v8209_v25 = vpop.eup %8208  ;;  %v2760_v39 = vmul.f32 %v6314_v4, %v2746_v37 }
 0xbef   :  { %v8211_v45 = vpop.eup %8210  ;;  %v2749_v3 = vmul.f32 %v8209_v25, %v9225_v56  ;;  %v9269_v46 = vadd.f32 %v6315_v32, %v2761_v58 }
 0xbf0   :  { %v9266_v47 = vadd.f32 %v6315_v32, %v2760_v39  ;;  %v2748_v14 = vmul.f32 %v8211_v45, %v9228_v35 }
 0xbf1   :  { %v2763_v18 = vmul.f32 %v6314_v4, %v2749_v3 }
 0xbf2   :  { %v8213_v28 = vpop.eup %8212  ;;  %7301 = vmatprep.mubr.msk.f32.mxu1 %vm704_vm14, %v9266_v47  ;;  %v2762_v22 = vmul.f32 %v6314_v4, %v2748_v14 }
 0xbf3   :  { %v8215_v59 = vpop.eup %8214  ;;  %7302 = vmatmul.mubr.msk.f32.vlgmr.msra.gmra.mrb[48].mxu1 %vm704_vm14, %v9269_v46  ;;  %v2751_v19 = vmul.f32 %v8213_v28, %v9235_v8  ;;  %v9279_v17 = vadd.f32 %v6315_v32, %v2763_v18 }
 0xbf4   :  { %v9276_v49 = vadd.f32 %v6315_v32, %v2762_v22  ;;  %v2750_v56 = vmul.f32 %v8215_v59, %v9238_v40 }
 0xbf5   :  { %v2765_v35 = vmul.f32 %v6314_v4, %v2751_v19 }
 0xbf6   :  { %v8217_v63 = vpop.eup %8216  ;;  %7304 = vmatprep.mubr.msk.f32.mxu1 %vm704_vm14, %v9276_v49  ;;  %v2764_v7 = vmul.f32 %v6314_v4, %v2750_v56 }
 0xbf7   :  { %v8219_v53 = vpop.eup %8218  ;;  %7305 = vmatmul.mubr.msk.f32.gmra.mrb[50].mxu1 %vm704_vm14, %v9279_v17  ;;  %v2753_v8 = vmul.f32 %v8217_v63, %v9245_v23  ;;  %v9289_v20 = vadd.f32 %v6315_v32, %v2765_v35 }
 0xbf8   :  { %v9286_v2 = vadd.f32 %v6315_v32, %v2764_v7  ;;  %v2752_v40 = vmul.f32 %v8219_v53, %v9248_v41  ;;  %v2994_v41 = vld [vmem:[%s10111_s21] sm:$0xff] }
 0xbf9   :  { %v2767_v9 = vmul.f32 %v6314_v4, %v2753_v8  ;;  %v7860_v21 = vpack.c.bf16 %v2995_v42, %v2994_v41 }
 0xbfa   :  { %7307 = vmatprep.mubr.msk.f32.mxu1 %vm704_vm14, %v9286_v2  ;;  %v2766_v33 = vmul.f32 %v6314_v4, %v2752_v40 }
 0xbfb   :  { %7308 = vmatmul.mubr.msk.f32.gmra.mrb[52].mxu1 %vm704_vm14, %v9289_v20  ;;  %v9297_v23 = vadd.f32 %v6315_v32, %v2767_v9  ;;  %7861 = vmatprep.subr.bf16.mxu1 %v7860_v21 }
 0xbfc   :  { %v9295_v61 = vadd.f32 %v6315_v32, %v2766_v33  ;;  %7863 = vmatpush3.bf16.msra.mxu1 %v7860_v21 }
 0xbfd   :  { %7865 = vmatprep.subr.bf16.mxu1 %v7864_v29 }
 0xbfe   :  { %7310 = vmatprep.mubr.msk.f32.mxu1 %vm704_vm14, %v9295_v61 }
 0xbff   :  { %7311 = vmatmul.mubr.msk.f32.gmra.mrb[54].mxu1 %vm704_vm14, %v9297_v23 }
 0xc00   :  { %7867 = vmatpush3.bf16.msra.mxu1 %v7864_v29 }
 0xc01   :  { %7869 = vmatprep.subr.bf16.mxu1 %v7868_v34 }
 0xc04   :  { %7871 = vmatpush3.bf16.msra.mxu1 %v7868_v34 }
 0xc05   :  { %7873 = vmatprep.subr.bf16.mxu1 %v7872_v48 }
 0xc08   :  { %7875 = vmatpush3.bf16.msra.mxu1 %v7872_v48 }
 0xcc6   :  { %v7303_v15 = vpop.f32.mrb[48].mxu1 }
 0xcc7   :  { %v9312_v0 = vadd.f32 %v7303_v15, %v6316_v50  ;;  %v2883_v55 = vpop.f32.mrb[49].mxu1 }
 0xcc8   :  { %v2884_v13 = vadd.f32 %v6316_v50, %v2883_v55 }
 0xcc9   :  { %v2931_v4 = vmul.f32 0.044715, %v9312_v0 }
 0xcca   :  { %v2930_v57 = vmul.f32 0.044715, %v2884_v13  ;;  %v7306_v10 = vpop.f32.mrb[50].mxu1 }
 0xccb   :  { %v2939_v30 = vmul.f32 %v2931_v4, %v9312_v0  ;;  %v9316_v11 = vadd.f32 %v7306_v10, %v6316_v50  ;;  %v2893_v37 = vpop.f32.mrb[51].mxu1 }
 0xccc   :  { %v2938_v58 = vmul.f32 %v2930_v57, %v2884_v13  ;;  %v9318_v32 = vadd.f32 %v6316_v50, %v2893_v37 }
 0xccd   :  { %v2947_v25 = vmul.f32 %v2939_v30, %v9312_v0  ;;  %v2933_v39 = vmul.f32 0.044715, %v9316_v11 }
 0xcce   :  { %v2946_v45 = vmul.f32 %v2938_v58, %v2884_v13  ;;  %v2932_v3 = vmul.f32 0.044715, %v9318_v32  ;;  %v7309_v14 = vpop.f32.mrb[52].mxu1 }
 0xccf   :  { %v2955_v18 = vadd.f32 %v2947_v25, %v9312_v0  ;;  %v2941_v28 = vmul.f32 %v2933_v39, %v9316_v11  ;;  %v9325_v22 = vadd.f32 %v7309_v14, %v6316_v50  ;;  %v2903_v59 = vpop.f32.mrb[53].mxu1 }
 0xcd0   :  { %v2954_v19 = vadd.f32 %v2946_v45, %v2884_v13  ;;  %v2940_v56 = vmul.f32 %v2932_v3, %v9318_v32  ;;  %v9328_v35 = vadd.f32 %v6316_v50, %v2903_v59  ;;  %v2922_v59 = vmul.f32 0.5, %v2884_v13 }
 0xcd1   :  { %v2963_v63 = vmul.f32 0.7978846, %v2955_v18  ;;  %v2949_v7 = vmul.f32 %v2941_v28, %v9316_v11  ;;  %v2935_v53 = vmul.f32 0.044715, %v9325_v22 }
 0xcd2   :  { %v2948_v8 = vmul.f32 %v2940_v56, %v9318_v32  ;;  %v2934_v40 = vmul.f32 0.044715, %v9328_v35  ;;  %v7312_v9 = vpop.f32.mrb[54].mxu1  ;;  %v2962_v33 = vmul.f32 0.7978846, %v2954_v19  ;;  %v2923_v56 = vmul.f32 0.5, %v9312_v0 }
 0xcd3   :  { %8220 = vtanh.f32 %v2963_v63  ;;  %v2957_v41 = vadd.f32 %v2949_v7, %v9316_v11  ;;  %v2943_v42 = vmul.f32 %v2935_v53, %v9325_v22  ;;  %v9336_v21 = vadd.f32 %v7312_v9, %v6316_v50  ;;  %v2913_v26 = vpop.f32.mrb[55].mxu1 }
 0xcd4   :  { %v2956_v12 = vadd.f32 %v2948_v8, %v9318_v32  ;;  %v2942_v29 = vmul.f32 %v2934_v40, %v9328_v35  ;;  %v2914_v51 = vadd.f32 %v6316_v50, %v2913_v26  ;;  %8222 = vtanh.f32 %v2962_v33 }
 0xcd5   :  { %v2951_v1 = vmul.f32 %v2943_v42, %v9325_v22  ;;  %v2937_v34 = vmul.f32 0.044715, %v9336_v21  ;;  %v2965_v16 = vmul.f32 0.7978846, %v2957_v41  ;;  %v2924_v9 = vmul.f32 0.5, %v9318_v32 }
 0xcd6   :  { %v2950_v31 = vmul.f32 %v2942_v29, %v9328_v35  ;;  %v2936_v48 = vmul.f32 0.044715, %v2914_v51  ;;  %v2964_v15 = vmul.f32 0.7978846, %v2956_v12  ;;  %v2925_v41 = vmul.f32 0.5, %v9316_v11 }
 0xcd7   :  { %v2959_v55 = vadd.f32 %v2951_v1, %v9325_v22  ;;  %v2945_v4 = vmul.f32 %v2937_v34, %v9336_v21  ;;  %8224 = vtanh.f32 %v2965_v16  ;;  %v2926_v29 = vmul.f32 0.5, %v9328_v35 }
 0xcd8   :  { %v2958_v57 = vadd.f32 %v2950_v31, %v9328_v35  ;;  %v2944_v10 = vmul.f32 %v2936_v48, %v2914_v51  ;;  %8226 = vtanh.f32 %v2964_v15  ;;  %v2927_v32 = vmul.f32 0.5, %v9325_v22  ;;  %v6325_v22 = vld [vmem:[%s10113_s29] ss:$0 sm:$0xff] }
 0xcd9   :  { %v2953_v50 = vmul.f32 %v2945_v4, %v9336_v21  ;;  %v2967_v30 = vmul.f32 0.7978846, %v2959_v55  ;;  %v2928_v15 = vmul.f32 0.5, %v2914_v51  ;;  %v2929_v4 = vmul.f32 0.5, %v9336_v21 }
 0xcda   :  { %v2952_v37 = vmul.f32 %v2944_v10, %v2914_v51  ;;  %v2966_v58 = vmul.f32 0.7978846, %v2958_v57 }
 0xcdb   :  { %v2961_v25 = vadd.f32 %v2953_v50, %v9336_v21  ;;  %8228 = vtanh.f32 %v2967_v30 }
 0xcdc   :  { %v2960_v39 = vadd.f32 %v2952_v37, %v2914_v51  ;;  %8230 = vtanh.f32 %v2966_v58 }
 0xcdd   :  { %v8221_v45 = vpop.eup %8220  ;;  %v2969_v3 = vmul.f32 0.7978846, %v2961_v25 }
 0xcde   :  { %v8223_v14 = vpop.eup %8222  ;;  %v2979_v18 = vadd.f32 1.0, %v8221_v45  ;;  %v2968_v28 = vmul.f32 0.7978846, %v2960_v39 }
 0xcdf   :  { %v2978_v19 = vadd.f32 1.0, %v8223_v14  ;;  %8232 = vtanh.f32 %v2969_v3 }
 0xce0   :  { %8234 = vtanh.f32 %v2968_v28  ;;  %v2987_v8 = vmul.f32 %v2979_v18, %v2923_v56 }
 0xce1   :  { %v8225_v63 = vpop.eup %8224  ;;  %v2986_v7 = vmul.f32 %v2978_v19, %v2922_v59 }
 0xce2   :  { %v8227_v53 = vpop.eup %8226  ;;  %v2981_v40 = vadd.f32 1.0, %v8225_v63 }
 0xce3   :  { %7329 = vmatprep.mubr.msk.f32.mxu1 %vm1404_vm5, %v2986_v7  ;;  %v2980_v33 = vadd.f32 1.0, %v8227_v53 }
 0xce4   :  { %7330 = vmatmul.mubr.msk.f32.vlgmr.msra.gmra.mrb[56].mxu1 %vm1404_vm5, %v2987_v8  ;;  %v2989_v12 = vmul.f32 %v2981_v40, %v2925_v41 }
 0xce5   :  { %v8229_v13 = vpop.eup %8228  ;;  %v2988_v42 = vmul.f32 %v2980_v33, %v2924_v9 }
 0xce6   :  { %v8231_v26 = vpop.eup %8230  ;;  %v2983_v0 = vadd.f32 1.0, %v8229_v13 }
 0xce7   :  { %7332 = vmatprep.mubr.msk.f32.mxu1 %vm1404_vm5, %v2988_v42  ;;  %v2982_v1 = vadd.f32 1.0, %v8231_v26 }
 0xce8   :  { %7333 = vmatmul.mubr.msk.f32.gmra.mrb[58].mxu1 %vm1404_vm5, %v2989_v12  ;;  %v2991_v48 = vmul.f32 %v2983_v0, %v2927_v32 }
 0xce9   :  { %v8233_v34 = vpop.eup %8232  ;;  %v2990_v16 = vmul.f32 %v2982_v1, %v2926_v29 }
 0xcea   :  { %v8235_v31 = vpop.eup %8234  ;;  %v2985_v11 = vadd.f32 1.0, %v8233_v34 }
 0xceb   :  { %7335 = vmatprep.mubr.msk.f32.mxu1 %vm1404_vm5, %v2990_v16  ;;  %v2984_v55 = vadd.f32 1.0, %v8235_v31 }
 0xcec   :  { %7336 = vmatmul.mubr.msk.f32.gmra.mrb[60].mxu1 %vm1404_vm5, %v2991_v48  ;;  %v2993_v57 = vmul.f32 %v2985_v11, %v2929_v4 }
 0xced   :  { %v2992_v35 = vmul.f32 %v2984_v55, %v2928_v15 }
 0xcef   :  { %7338 = vmatprep.mubr.msk.f32.mxu1 %vm1404_vm5, %v2992_v35 }
 0xcf0   :  { %7339 = vmatmul.mubr.msk.f32.gmra.mrb[62].mxu1 %vm1404_vm5, %v2993_v57 }
 0xdb7   :  { %v7331_v10 = vpop.f32.mrb[56].mxu1 }
 0xdb8   :  { %v3105_v50 = vadd.f32 %v7331_v10, %v6325_v22  ;;  %v3099_v30 = vpop.f32.mrb[57].mxu1 }
 0xdb9   :  { %v3100_v37 = vadd.f32 %v6325_v22, %v3099_v30 }
 0xdba   :  { %v3139_v58 = vadd.f32 %v3105_v50, %v9269_v46 }
 0xdbb   :  { %v7334_v25 = vpop.f32.mrb[58].mxu1  ;;  %v3138_v51 = vadd.f32 %v3100_v37, %v9266_v47 }
 0xdbc   :  { %v3115_v39 = vadd.f32 %v7334_v25, %v6325_v22  ;;  %v3109_v45 = vpop.f32.mrb[59].mxu1  ;;  %v3151_v21 = vsel %vm704_vm14, %v3139_v58, 0.0 }
 0xdbd   :  { %v3110_v3 = vadd.f32 %v6325_v22, %v3109_v45  ;;  %3152 = vadd.xlane.f32.xlu0 %v3151_v21  ;;  %v3148_v14 = vsel %vm704_vm14, %v3138_v51, 0.0 }
 0xdbe   :  { %3149 = vadd.xlane.f32.xlu1 %v3148_v14  ;;  %v3141_v18 = vadd.f32 %v3115_v39, %v9279_v17 }
 0xdbf   :  { %v7337_v28 = vpop.f32.mrb[60].mxu1  ;;  %v3140_v59 = vadd.f32 %v3110_v3, %v9276_v49 }
 0xdc0   :  { %v3125_v19 = vadd.f32 %v7337_v28, %v6325_v22  ;;  %v3119_v56 = vpop.f32.mrb[61].mxu1  ;;  %v3157_v46 = vsel %vm704_vm14, %v3141_v18, 0.0 }
 0xdc1   :  { %v3120_v63 = vadd.f32 %v6325_v22, %v3119_v56  ;;  %3158 = vadd.xlane.f32.xlu0 %v3157_v46  ;;  %v3154_v47 = vsel %vm704_vm14, %v3140_v59, 0.0 }
 0xdc2   :  { %3155 = vadd.xlane.f32.xlu1 %v3154_v47  ;;  %v3143_v7 = vadd.f32 %v3125_v19, %v9289_v20 }
 0xdc3   :  { %v7340_v53 = vpop.f32.mrb[62].mxu1  ;;  %v3142_v8 = vadd.f32 %v3120_v63, %v9286_v2 }
 0xdc4   :  { %v3135_v40 = vadd.f32 %v7340_v53, %v6325_v22  ;;  %v3129_v9 = vpop.f32.mrb[63].mxu1  ;;  %v3163_v17 = vsel %vm704_vm14, %v3143_v7, 0.0  ;;  %v6337_v53 = vld [vmem:[%s8506_s8 + $0x48] sm:$0xff] }
 0xdc5   :  { %v3130_v33 = vadd.f32 %v6325_v22, %v3129_v9  ;;  %3164 = vadd.xlane.f32.xlu0 %v3163_v17  ;;  %v3160_v49 = vsel %vm704_vm14, %v3142_v8, 0.0  ;;  %v6351_v9 = vld [vmem:[%s8516_s19 + $0x48] sm:$0xff] }
 0xdc6   :  { %3161 = vadd.xlane.f32.xlu1 %v3160_v49  ;;  %v3145_v41 = vadd.f32 %v3135_v40, %v9297_v23  ;;  %v6339_v49 = vld [vmem:[%s8506_s8 + $0x58] sm:$0xff] }
 0xdc7   :  { %v3144_v13 = vadd.f32 %v3130_v33, %v9295_v61  ;;  %v6338_v33 = vld [vmem:[%s8506_s8 + $0x50] sm:$0xff] }
 0xdc8   :  { %v3169_v42 = vsel %vm704_vm14, %v3145_v41, 0.0 }
 0xdc9   :  { %3170 = vadd.xlane.f32.xlu0 %v3169_v42  ;;  %v3166_v20 = vsel %vm704_vm14, %v3144_v13, 0.0  ;;  %v6353_v42 = vld [vmem:[%s8516_s19 + $0x58] sm:$0xff] }
 0xdca   :  { %3167 = vadd.xlane.f32.xlu1 %v3166_v20 }
 0xe4a   :  { %v3153_v2 = vpop.xlane.xlu0 %3152 }
 0xe4b   :  { %v3173_v26 = vmul.f32 0.03125, %v3153_v2  ;;  %v3150_v12 = vpop.xlane.xlu1 %3149  ;;  %v6364_v2 = vld [vmem:[%s8526_s30 + $0x40] sm:$0xff] }
 0xe4c   :  { %v3172_v0 = vmul.f32 0.03125, %v3150_v12 }
 0xe4d   :  { %v9379_v29 = vsub.f32 %v3139_v58, %v3173_v26  ;;  %v6365_v26 = vld [vmem:[%s8526_s30 + $0x48] sm:$0xff] }
 0xe4e   :  { %v9381_v1 = vsub.f32 %v3138_v51, %v3172_v0  ;;  %v3159_v32 = vpop.xlane.xlu0 %3158  ;;  %v7892_v12 = vpack.c.bf16 %v6365_v26, %v6364_v2 }
 0xe4f   :  { %v3175_v34 = vmul.f32 0.03125, %v3159_v32  ;;  %v3156_v16 = vpop.xlane.xlu1 %3155  ;;  %v3189_v61 = vmul.f32 %v9379_v29, %v9379_v29 }
 0xe50   :  { %v3174_v23 = vmul.f32 0.03125, %v3156_v16  ;;  %v3188_v31 = vmul.f32 %v9381_v1, %v9381_v1 }
 0xe51   :  { %v9387_v48 = vsub.f32 %v3141_v18, %v3175_v34  ;;  %v3199_v11 = vsel %vm704_vm14, %v3189_v61, 0.0 }
 0xe52   :  { %v9390_v15 = vsub.f32 %v3140_v59, %v3174_v23  ;;  %v3165_v55 = vpop.xlane.xlu0 %3164  ;;  %3200 = vadd.xlane.f32.xlu0 %v3199_v11  ;;  %v3196_v4 = vsel %vm704_vm14, %v3188_v31, 0.0 }
 0xe53   :  { %v3177_v35 = vmul.f32 0.03125, %v3165_v55  ;;  %v3162_v57 = vpop.xlane.xlu1 %3161  ;;  %3197 = vadd.xlane.f32.xlu1 %v3196_v4  ;;  %v3191_v22 = vmul.f32 %v9387_v48, %v9387_v48 }
 0xe54   :  { %v3176_v10 = vmul.f32 0.03125, %v3162_v57  ;;  %v3190_v50 = vmul.f32 %v9390_v15, %v9390_v15 }
 0xe55   :  { %v9397_v30 = vsub.f32 %v3143_v7, %v3177_v35  ;;  %v3205_v37 = vsel %vm704_vm14, %v3191_v22, 0.0  ;;  %v6336_v7 = vld [vmem:[%s8506_s8 + $0x40] sm:$0xff] }
 0xe56   :  { %v9400_v58 = vsub.f32 %v3142_v8, %v3176_v10  ;;  %3206 = vadd.xlane.f32.xlu0 %v3205_v37  ;;  %v3171_v25 = vpop.xlane.xlu0 %3170  ;;  %v3202_v51 = vsel %vm704_vm14, %v3190_v50, 0.0  ;;  %v6350_v8 = vld [vmem:[%s8516_s19 + $0x40] sm:$0xff]  ;;  %v7876_v40 = vpack.c.bf16 %v6337_v53, %v6336_v7 }
 0xe57   :  { %v3179_v39 = vmul.f32 0.03125, %v3171_v25  ;;  %3203 = vadd.xlane.f32.xlu1 %v3202_v51  ;;  %v3168_v45 = vpop.xlane.xlu1 %3167  ;;  %v3193_v21 = vmul.f32 %v9397_v30, %v9397_v30  ;;  %v7884_v17 = vpack.c.bf16 %v6351_v9, %v6350_v8  ;;  %v6335_v7 = vld [vmem:[%s10115_s20] ss:$0 sm:$0xff]  ;;  %v6366_v9 = vld [vmem:[%s8526_s30 + $0x50] sm:$0xff] }
 0xe58   :  { %v3178_v3 = vmul.f32 0.03125, %v3168_v45  ;;  %v3192_v14 = vmul.f32 %v9400_v58, %v9400_v58  ;;  %7877 = vmatprep.subr.bf16.mxu0 %v7876_v40 }
 0xe59   :  { %v9407_v18 = vsub.f32 %v3145_v41, %v3179_v39  ;;  %v3211_v28 = vsel %vm704_vm14, %v3193_v21, 0.0  ;;  %7885 = vmatprep.subr.bf16.mxu1 %v7884_v17  ;;  %7879 = vmatpush3.bf16.msra.mxu0 %v7876_v40  ;;  %v6352_v41 = vld [vmem:[%s8516_s19 + $0x50] sm:$0xff] }
 0xe5a   :  { %v9410_v59 = vsub.f32 %v3144_v13, %v3178_v3  ;;  %3212 = vadd.xlane.f32.xlu0 %v3211_v28  ;;  %v3208_v19 = vsel %vm704_vm14, %v3192_v14, 0.0  ;;  %7887 = vmatpush3.bf16.msra.mxu1 %v7884_v17  ;;  %v7880_v13 = vpack.c.bf16 %v6339_v49, %v6338_v33  ;;  %v7888_v20 = vpack.c.bf16 %v6353_v42, %v6352_v41  ;;  %v6334_v28 = vld [vmem:[%s10114_s3] ss:$0 sm:$0xff]  ;;  %v6367_v17 = vld [vmem:[%s8526_s30 + $0x58] sm:$0xff] }
 0xe5b   :  { %3209 = vadd.xlane.f32.xlu1 %v3208_v19  ;;  %v3195_v56 = vmul.f32 %v9407_v18, %v9407_v18 }
 0xe5c   :  { %v3194_v46 = vmul.f32 %v9410_v59, %v9410_v59  ;;  %7881 = vmatprep.subr.bf16.mxu0 %v7880_v13  ;;  %7889 = vmatprep.subr.bf16.mxu1 %v7888_v20 }
 0xe5d   :  { %v3217_v63 = vsel %vm704_vm14, %v3195_v56, 0.0  ;;  %7883 = vmatpush3.bf16.msra.mxu0 %v7880_v13 }
 0xe5e   :  { %3218 = vadd.xlane.f32.xlu0 %v3217_v63  ;;  %v3214_v47 = vsel %vm704_vm14, %v3194_v46, 0.0  ;;  %7891 = vmatpush3.bf16.msra.mxu1 %v7888_v20  ;;  %v7896_v20 = vpack.c.bf16 %v6367_v17, %v6366_v9 }
 0xe5f   :  { %3215 = vadd.xlane.f32.xlu1 %v3214_v47  ;;  %7893 = vmatprep.subr.bf16.mxu0 %v7892_v12 }
 0xedf   :  { %v3201_v0 = vpop.xlane.xlu0 %3200 }
 0xee0   :  { %v3221_v32 = vmul.f32 0.03125, %v3201_v0  ;;  %v3198_v34 = vpop.xlane.xlu1 %3197 }
 0xee1   :  { %v3220_v16 = vmul.f32 0.03125, %v3198_v34 }
 0xee2   :  { %v3229_v61 = vadd.f32 1e-12, %v3221_v32 }
 0xee3   :  { %v3228_v23 = vadd.f32 1e-12, %v3220_v16  ;;  %v3207_v31 = vpop.xlane.xlu0 %3206 }
 0xee4   :  { %8236 = vrsqrt.f32 %v3229_v61  ;;  %v3223_v11 = vmul.f32 0.03125, %v3207_v31  ;;  %v3204_v55 = vpop.xlane.xlu1 %3203 }
 0xee5   :  { %8238 = vrsqrt.f32 %v3228_v23  ;;  %v3222_v4 = vmul.f32 0.03125, %v3204_v55 }
 0xee6   :  { %v3231_v35 = vadd.f32 1e-12, %v3223_v11 }
 0xee7   :  { %v3230_v57 = vadd.f32 1e-12, %v3222_v4  ;;  %v3213_v22 = vpop.xlane.xlu0 %3212  ;;  %v6355_v4 = vld [vmem:[%s8521_s24 + $0x2] ss:$0 sm:$0xff] }
 0xee8   :  { %8240 = vrsqrt.f32 %v3231_v35  ;;  %v3225_v10 = vmul.f32 0.03125, %v3213_v22  ;;  %v3210_v50 = vpop.xlane.xlu1 %3209  ;;  %v9507_v35 = vld [vmem:[%s8511_s14 + $0x2] ss:$0 sm:$0xff] }
 0xee9   :  { %8242 = vrsqrt.f32 %v3230_v57  ;;  %v3224_v37 = vmul.f32 0.03125, %v3210_v50 }
 0xeea   :  { %v3233_v25 = vadd.f32 1e-12, %v3225_v10 }
 0xeeb   :  { %v3232_v51 = vadd.f32 1e-12, %v3224_v37  ;;  %v3219_v39 = vpop.xlane.xlu0 %3218 }
 0xeec   :  { %8244 = vrsqrt.f32 %v3233_v25  ;;  %v3227_v45 = vmul.f32 0.03125, %v3219_v39  ;;  %v3216_v21 = vpop.xlane.xlu1 %3215 }
 0xeed   :  { %8246 = vrsqrt.f32 %v3232_v51  ;;  %v3226_v3 = vmul.f32 0.03125, %v3216_v21 }
 0xeee   :  { %v8237_v14 = vpop.eup %8236  ;;  %v3235_v19 = vadd.f32 1e-12, %v3227_v45 }
 0xeef   :  { %v8239_v56 = vpop.eup %8238  ;;  %v3245_v46 = vmul.f32 %v8237_v14, %v9379_v29  ;;  %v3234_v63 = vadd.f32 1e-12, %v3226_v3 }
 0xef0   :  { %v3244_v47 = vmul.f32 %v8239_v56, %v9381_v1  ;;  %8248 = vrsqrt.f32 %v3235_v19 }
 0xef1   :  { %v3259_v53 = vmul.f32 %v6334_v28, %v3245_v46  ;;  %8250 = vrsqrt.f32 %v3234_v63 }
 0xef2   :  { %v8241_v8 = vpop.eup %8240  ;;  %v3258_v40 = vmul.f32 %v6334_v28, %v3244_v47 }
 0xef3   :  { %v8243_v33 = vpop.eup %8242  ;;  %v3247_v49 = vmul.f32 %v8241_v8, %v9387_v48  ;;  %v9439_v42 = vadd.f32 %v6335_v7, %v3259_v53 }
 0xef4   :  { %v9436_v41 = vadd.f32 %v6335_v7, %v3258_v40  ;;  %v3246_v13 = vmul.f32 %v8243_v33, %v9390_v15 }
 0xef5   :  { %v3261_v29 = vmul.f32 %v6334_v28, %v3247_v49 }
 0xef6   :  { %v8245_v1 = vpop.eup %8244  ;;  %v3260_v2 = vmul.f32 %v6334_v28, %v3246_v13  ;;  %7349 = vmatprep.mubr.msk.f32.mxu0 %vm704_vm14, %v9436_v41  ;;  %7369 = vmatprep.mubr.msk.f32.mxu1 %vm704_vm14, %v9436_v41 }
 0xef7   :  { %v8247_v26 = vpop.eup %8246  ;;  %v3249_v0 = vmul.f32 %v8245_v1, %v9397_v30  ;;  %7350 = vmatmul.mubr.msk.f32.vlgmr.msra.gmra.mrb[48].mxu0 %vm704_vm14, %v9439_v42  ;;  %7370 = vmatmul.mubr.msk.f32.vlgmr.msra.gmra.mrb[64].mxu1 %vm704_vm14, %v9439_v42  ;;  %v9453_v32 = vadd.f32 %v6335_v7, %v3261_v29 }
 0xef8   :  { %v9450_v48 = vadd.f32 %v6335_v7, %v3260_v2  ;;  %v3248_v15 = vmul.f32 %v8247_v26, %v9400_v58  ;;  %7895 = vmatpush3.bf16.msra.mxu0 %v7892_v12 }
 0xef9   :  { %v3263_v34 = vmul.f32 %v6334_v28, %v3249_v0  ;;  %7897 = vmatprep.subr.bf16.mxu0 %v7896_v20 }
 0xefa   :  { %v8249_v16 = vpop.eup %8248  ;;  %v3262_v61 = vmul.f32 %v6334_v28, %v3248_v15  ;;  %7352 = vmatprep.mubr.msk.f32.mxu0 %vm704_vm14, %v9450_v48  ;;  %7372 = vmatprep.mubr.msk.f32.mxu1 %vm704_vm14, %v9450_v48 }
 0xefb   :  { %v8251_v30 = vpop.eup %8250  ;;  %v3251_v23 = vmul.f32 %v8249_v16, %v9407_v18  ;;  %7353 = vmatmul.mubr.msk.f32.gmra.mrb[50].mxu0 %vm704_vm14, %v9453_v32  ;;  %7373 = vmatmul.mubr.msk.f32.gmra.mrb[66].mxu1 %vm704_vm14, %v9453_v32  ;;  %v9467_v31 = vadd.f32 %v6335_v7, %v3263_v34 }
 0xefc   :  { %v9464_v58 = vadd.f32 %v6335_v7, %v3262_v61  ;;  %v3250_v12 = vmul.f32 %v8251_v30, %v9410_v59  ;;  %7899 = vmatpush3.bf16.msra.mxu0 %v7896_v20  ;;  %v6369_v20 = vld [vmem:[%s8531_s6 + $0x2] ss:$0 sm:$0xff] }
 0xefd   :  { %v3265_v11 = vmul.f32 %v6334_v28, %v3251_v23 }
 0xefe   :  { %v3264_v55 = vmul.f32 %v6334_v28, %v3250_v12  ;;  %7355 = vmatprep.mubr.msk.f32.mxu0 %vm704_vm14, %v9464_v58  ;;  %7375 = vmatprep.mubr.msk.f32.mxu1 %vm704_vm14, %v9464_v58 }
 0xeff   :  { %7356 = vmatmul.mubr.msk.f32.gmra.mrb[52].mxu0 %vm704_vm14, %v9467_v31  ;;  %7376 = vmatmul.mubr.msk.f32.gmra.mrb[68].mxu1 %vm704_vm14, %v9467_v31  ;;  %v9479_v59 = vadd.f32 %v6335_v7, %v3265_v11 }
 0xf00   :  { %v9477_v18 = vadd.f32 %v6335_v7, %v3264_v55 }
 0xf02   :  { %7358 = vmatprep.mubr.msk.f32.mxu0 %vm704_vm14, %v9477_v18  ;;  %7378 = vmatprep.mubr.msk.f32.mxu1 %vm704_vm14, %v9477_v18 }
 0xf03   :  { %7359 = vmatmul.mubr.msk.f32.gmra.mrb[54].mxu0 %vm704_vm14, %v9479_v59  ;;  %7379 = vmatmul.mubr.msk.f32.gmra.mrb[70].mxu1 %vm704_vm14, %v9479_v59 }
 0xf04   :  { %7389 = vmatprep.mubr.msk.f32.mxu0 %vm704_vm14, %v9436_v41 }
 0xf07   :  { %7390 = vmatmul.mubr.msk.f32.vlgmr.msra.gmra.mrb[56].mxu0 %vm704_vm14, %v9439_v42 }
 0xf08   :  { %7392 = vmatprep.mubr.msk.f32.mxu0 %vm704_vm14, %v9450_v48 }
 0xf0b   :  { %7393 = vmatmul.mubr.msk.f32.gmra.mrb[58].mxu0 %vm704_vm14, %v9453_v32 }
 0xf0c   :  { %7395 = vmatprep.mubr.msk.f32.mxu0 %vm704_vm14, %v9464_v58 }
 0xf0f   :  { %7396 = vmatmul.mubr.msk.f32.gmra.mrb[60].mxu0 %vm704_vm14, %v9467_v31 }
 0xf10   :  { %7398 = vmatprep.mubr.msk.f32.mxu0 %vm704_vm14, %v9477_v18 }
 0xf13   :  { %7399 = vmatmul.mubr.msk.f32.gmra.mrb[62].mxu0 %vm704_vm14, %v9479_v59 }
 0xfca   :  { %v9509_v57 = vpop.f32.mrb[48].mxu0  ;;  %v7371_v22 = vpop.f32.mrb[64].mxu1 }
 0xfcb   :  { %v3507_v10 = vadd.f32 %v7371_v22, %v6355_v4  ;;  %v3383_v50 = vpop.f32.mrb[49].mxu0  ;;  %v3501_v37 = vpop.f32.mrb[65].mxu1  ;;  %v6418_v22 = vld [vmem:[%s8516_s19 + $0x60] sm:$0xff] }
 0xfcc   :  { %v3384_v25 = vadd.f32 %v9507_v35, %v3383_v50  ;;  %v3502_v51 = vadd.f32 %v6355_v4, %v3501_v37 }
 0xfce   :  { %v7900_v39 = vpack.c.bf16 %v3507_v10, %v3502_v51  ;;  %v9512_v45 = vpop.f32.mrb[50].mxu0  ;;  %v7374_v21 = vpop.f32.mrb[66].mxu1  ;;  %7417 = vmatprep.mubr.msk.f32.mxu1 %vm247_vm0, %v3384_v25  ;;  %v6419_v10 = vld [vmem:[%s8516_s19 + $0x68] sm:$0xff] }
 0xfcf   :  { %v3517_v3 = vadd.f32 %v7374_v21, %v6355_v4  ;;  %v9515_v14 = vpop.f32.mrb[51].mxu0  ;;  %v3511_v28 = vpop.f32.mrb[67].mxu1  ;;  %v7948_v51 = vpack.c.bf16 %v6419_v10, %v6418_v22 }
 0xfd0   :  { %v3512_v19 = vadd.f32 %v6355_v4, %v3511_v28  ;;  %7902 = vmatprep.subr.msk.bf16.mxu1 %vm8907_vm15, %v7900_v39 }
 0xfd1   :  { %7905 = vmatpush3.bf16.xpose.msk.msra.mxu1 %vm8907_vm15, %v7900_v39 }
 0xfd2   :  { %v7906_v56 = vpack.c.bf16 %v3517_v3, %v3512_v19  ;;  %v9521_v46 = vpop.f32.mrb[52].mxu0  ;;  %v7377_v63 = vpop.f32.mrb[68].mxu1  ;;  %v6420_v19 = vld [vmem:[%s8516_s19 + $0x70] sm:$0xff] }
 0xfd3   :  { %v3527_v47 = vadd.f32 %v7377_v63, %v6355_v4  ;;  %v3403_v7 = vpop.f32.mrb[53].mxu0  ;;  %v3521_v53 = vpop.f32.mrb[69].mxu1  ;;  %v3389_v63 = vadd.f32 %v9509_v57, %v9507_v35  ;;  %v3409_v57 = vadd.f32 %v9521_v46, %v9507_v35 }
 0xfd4   :  { %v3522_v8 = vadd.f32 %v6355_v4, %v3521_v53  ;;  %7908 = vmatprep.subr.msk.bf16.mxu1 %vm8907_vm15, %v7906_v56  ;;  %v3394_v53 = vadd.f32 %v9507_v35, %v9515_v14 }
 0xfd6   :  { %v7912_v40 = vpack.c.bf16 %v3527_v47, %v3522_v8  ;;  %v9525_v9 = vpop.f32.mrb[54].mxu0  ;;  %v7380_v17 = vpop.f32.mrb[70].mxu1  ;;  %v3399_v8 = vadd.f32 %v9512_v45, %v9507_v35 }
 0xfd7   :  { %v3537_v33 = vadd.f32 %v7380_v17, %v6355_v4  ;;  %v3413_v49 = vpop.f32.mrb[55].mxu0  ;;  %v3531_v13 = vpop.f32.mrb[71].mxu1  ;;  %v3419_v45 = vadd.f32 %v9525_v9, %v9507_v35 }
 0xfd8   :  { %v3532_v29 = vadd.f32 %v6355_v4, %v3531_v13  ;;  %v3414_v14 = vadd.f32 %v9507_v35, %v3413_v49 }
 0xfd9   :  { %7911 = vmatpush3.bf16.xpose.msk.msra.mxu1 %vm8907_vm15, %v7906_v56  ;;  %v6421_v56 = vld [vmem:[%s8516_s19 + $0x78] sm:$0xff]  ;;  %s10118_s19 = sld [smem:[#allocation20_spill]] }
 0xfda   :  { %v7918_v1 = vpack.c.bf16 %v3537_v33, %v3532_v29  ;;  %v7391_v2 = vpop.f32.mrb[56].mxu0  ;;  %7914 = vmatprep.subr.msk.bf16.mxu1 %vm8907_vm15, %v7912_v40  ;;  %v7952_v47 = vpack.c.bf16 %v6421_v56, %v6420_v19 }
 0xfdb   :  { %v3625_v26 = vadd.f32 %v7391_v2, %v6369_v20  ;;  %v3619_v0 = vpop.f32.mrb[57].mxu0 }
 0xfdc   :  { %v3620_v15 = vadd.f32 %v6369_v20, %v3619_v0 }
 0xfde   :  { %v7924_v34 = vpack.c.bf16 %v3625_v26, %v3620_v15  ;;  %v7394_v16 = vpop.f32.mrb[58].mxu0 }
 0xfdf   :  { %v3635_v61 = vadd.f32 %v7394_v16, %v6369_v20  ;;  %v3629_v30 = vpop.f32.mrb[59].mxu0 }
 0xfe0   :  { %v3630_v23 = vadd.f32 %v6369_v20, %v3629_v30  ;;  %7925 = vmatprep.subr.bf16.mxu0 %v7924_v34 }
 0xfe1   :  { %7917 = vmatpush3.bf16.xpose.msk.msra.mxu1 %vm8907_vm15, %v7912_v40  ;;  %7927 = vmatpush3.bf16.msra.mxu0 %v7924_v34  ;;  %v3404_v40 = vadd.f32 %v9507_v35, %v3403_v7 }
 0xfe2   :  { %v7928_v12 = vpack.c.bf16 %v3635_v61, %v3630_v23  ;;  %v7397_v11 = vpop.f32.mrb[60].mxu0  ;;  %7920 = vmatprep.subr.msk.bf16.mxu1 %vm8907_vm15, %v7918_v1 }
 0xfe3   :  { %v3645_v55 = vadd.f32 %v7397_v11, %v6369_v20  ;;  %v3639_v4 = vpop.f32.mrb[61].mxu0 }
 0xfe4   :  { %v3640_v50 = vadd.f32 %v6369_v20, %v3639_v4  ;;  %7929 = vmatprep.subr.bf16.mxu0 %v7928_v12 }
 0xfe5   :  { %7931 = vmatpush3.bf16.msra.mxu0 %v7928_v12 }
 0xfe6   :  { %v7932_v37 = vpack.c.bf16 %v3645_v55, %v3640_v50  ;;  %v7400_v25 = vpop.f32.mrb[62].mxu0 }
 0xfe7   :  { %v3655_v39 = vadd.f32 %v7400_v25, %v6369_v20  ;;  %v3649_v21 = vpop.f32.mrb[63].mxu0  ;;  %v6423_v25 = vld [vmem:[%s8521_s24 + $0x3] ss:$0 sm:$0xff] }
 0xfe8   :  { %v3650_v3 = vadd.f32 %v6369_v20, %v3649_v21  ;;  %7933 = vmatprep.subr.bf16.mxu0 %v7932_v37 }
 0xfe9   :  { %7923 = vmatpush3.bf16.xpose.msk.msra.mxu1 %vm8907_vm15, %v7918_v1  ;;  %7935 = vmatpush3.bf16.msra.mxu0 %v7932_v37 }
 0xfea   :  { %v7936_v28 = vpack.c.bf16 %v3655_v39, %v3650_v3  ;;  %7949 = vmatprep.subr.bf16.mxu1 %v7948_v51 }
 0xfec   :  { %7937 = vmatprep.subr.bf16.mxu0 %v7936_v28 }
 0xfed   :  { %7939 = vmatpush3.bf16.msra.mxu0 %v7936_v28 }
 0xff0   :  { %7418 = vmatmul.mubr.msk.f32.vlgmr.msra.gmra.mrb[72].mxu1 %vm247_vm0, %v3389_v63 }
 0xff1   :  { %7420 = vmatprep.mubr.msk.f32.mxu1 %vm247_vm0, %v3394_v53  ;;  %7951 = vmatpush3.bf16.msra.mxu1 %v7948_v51 }
 0xff2   :  { %7953 = vmatprep.subr.bf16.mxu1 %v7952_v47 }
 0xff4   :  { %7421 = vmatmul.mubr.msk.f32.gmra.mrb[74].mxu1 %vm247_vm0, %v3399_v8 }
 0xff5   :  { %7423 = vmatprep.mubr.msk.f32.mxu1 %vm247_vm0, %v3404_v40  ;;  %7955 = vmatpush3.bf16.msra.mxu1 %v7952_v47 }
 0xff8   :  { %7424 = vmatmul.mubr.msk.f32.gmra.mrb[76].mxu1 %vm247_vm0, %v3409_v57 }
 0xff9   :  { %7426 = vmatprep.mubr.msk.f32.mxu1 %vm247_vm0, %v3414_v14 }
 0xffc   :  { %7427 = vmatmul.mubr.msk.f32.gmra.mrb[78].mxu1 %vm247_vm0, %v3419_v45 }
 0xffd   :  { %7485 = vmatprep.mubr.msk.f32.mxu1 %vm704_vm14, %v9436_v41 }
0x1000   :  { %7486 = vmatmul.mubr.msk.f32.vlgmr.msra.gmra.mrb[80].mxu1 %vm704_vm14, %v9439_v42 }
0x1001   :  { %7488 = vmatprep.mubr.msk.f32.mxu1 %vm704_vm14, %v9450_v48 }
0x1004   :  { %7489 = vmatmul.mubr.msk.f32.gmra.mrb[82].mxu1 %vm704_vm14, %v9453_v32 }
0x1005   :  { %7491 = vmatprep.mubr.msk.f32.mxu1 %vm704_vm14, %v9464_v58 }
0x1008   :  { %7492 = vmatmul.mubr.msk.f32.gmra.mrb[84].mxu1 %vm704_vm14, %v9467_v31 }
0x1009   :  { %7494 = vmatprep.mubr.msk.f32.mxu1 %vm704_vm14, %v9477_v18 }
0x100c   :  { %7495 = vmatmul.mubr.msk.f32.gmra.mrb[86].mxu1 %vm704_vm14, %v9479_v59 }
0x10c3   :  { %v7419_v35 = vpop.f32.mrb[72].mxu1 }
0x10c4   :  { %v3812_v46 = vmul.f32 0.25, %v7419_v35  ;;  %v3772_v7 = vpop.f32.mrb[73].mxu1 }
0x10c5   :  { %v3811_v9 = vmul.f32 0.25, %v3772_v7 }
0x10c6   :  { %v9578_v17 = vadd.f32 %v3812_v46, %v8973_v52 }
0x10c7   :  { %v7422_v33 = vpop.f32.mrb[74].mxu1  ;;  %v9581_v49 = vadd.f32 %v3811_v9, %v8975_v54 }
0x10c8   :  { %v3814_v13 = vmul.f32 0.25, %v7422_v33  ;;  %v3782_v29 = vpop.f32.mrb[75].mxu1  ;;  %v3830_v20 = vsel %vm1404_vm5, %v9578_v17, -inf }
0x10c9   :  { %v3813_v1 = vmul.f32 0.25, %v3782_v29  ;;  %3831 = vmax.xlane.f32.xlu0 %v3830_v20  ;;  %v3827_v2 = vsel %vm1404_vm5, %v9581_v49, -inf }
0x10ca   :  { %v9588_v26 = vadd.f32 %v3814_v13, %v8985_v60  ;;  %3828 = vmax.xlane.f32.xlu1 %v3827_v2 }
0x10cb   :  { %v7425_v0 = vpop.f32.mrb[76].mxu1  ;;  %v9591_v15 = vadd.f32 %v3813_v1, %v8987_v62 }
0x10cc   :  { %v3816_v34 = vmul.f32 0.25, %v7425_v0  ;;  %v3792_v16 = vpop.f32.mrb[77].mxu1  ;;  %v3836_v61 = vsel %vm1404_vm5, %v9588_v26, -inf }
0x10cd   :  { %v3815_v30 = vmul.f32 0.25, %v3792_v16  ;;  %3837 = vmax.xlane.f32.xlu0 %v3836_v61  ;;  %v3833_v23 = vsel %vm1404_vm5, %v9591_v15, -inf }
0x10ce   :  { %v9598_v12 = vadd.f32 %v3816_v34, %v9001_v43  ;;  %3834 = vmax.xlane.f32.xlu1 %v3833_v23 }
0x10cf   :  { %v9601_v11 = vadd.f32 %v3815_v30, %v9005_v27  ;;  %v7428_v55 = vpop.f32.mrb[78].mxu1 }
0x10d0   :  { %v3818_v4 = vmul.f32 0.25, %v7428_v55  ;;  %v3802_v22 = vpop.f32.mrb[79].mxu1  ;;  %v3842_v10 = vsel %vm1404_vm5, %v9598_v12, -inf }
0x10d1   :  { %v3817_v50 = vmul.f32 0.25, %v3802_v22  ;;  %3843 = vmax.xlane.f32.xlu0 %v3842_v10  ;;  %v3839_v37 = vsel %vm1404_vm5, %v9601_v11, -inf }
0x10d2   :  { %v9609_v51 = vadd.f32 %v3818_v4, %v9015_v36  ;;  %3840 = vmax.xlane.f32.xlu1 %v3839_v37 }
0x10d3   :  { %v9612_v39 = vadd.f32 %v3817_v50, %v9019_v44  ;;  %v7487_v21 = vpop.f32.mrb[80].mxu1 }
0x10d4   :  { %v4250_v3 = vadd.f32 %v7487_v21, %v6423_v25  ;;  %v4244_v28 = vpop.f32.mrb[81].mxu1  ;;  %v3848_v19 = vsel %vm1404_vm5, %v9609_v51, -inf }
0x10d5   :  { %v4245_v56 = vadd.f32 %v6423_v25, %v4244_v28  ;;  %3849 = vmax.xlane.f32.xlu0 %v3848_v19  ;;  %v3845_v63 = vsel %vm1404_vm5, %v9612_v39, -inf }
0x10d6   :  { %3846 = vmax.xlane.f32.xlu1 %v3845_v63 }
0x10d7   :  { %v7964_v47 = vpack.c.bf16 %v4250_v3, %v4245_v56  ;;  %v7490_v53 = vpop.f32.mrb[82].mxu1 }
0x10d8   :  { %v4260_v8 = vadd.f32 %v7490_v53, %v6423_v25  ;;  %v4254_v40 = vpop.f32.mrb[83].mxu1 }
0x10d9   :  { %v4255_v57 = vadd.f32 %v6423_v25, %v4254_v40  ;;  %7966 = vmatprep.subr.msk.bf16.mxu1 %vm8907_vm15, %v7964_v47 }
0x10da   :  { %7969 = vmatpush3.bf16.xpose.msk.msra.mxu1 %vm8907_vm15, %v7964_v47 }
0x10db   :  { %v7970_v14 = vpack.c.bf16 %v4260_v8, %v4255_v57  ;;  %v7493_v45 = vpop.f32.mrb[84].mxu1 }
0x10dc   :  { %v4270_v35 = vadd.f32 %v7493_v45, %v6423_v25  ;;  %v4264_v46 = vpop.f32.mrb[85].mxu1 }
0x10dd   :  { %v4265_v7 = vadd.f32 %v6423_v25, %v4264_v46  ;;  %7972 = vmatprep.subr.msk.bf16.mxu1 %vm8907_vm15, %v7970_v14 }
0x10df   :  { %v7976_v9 = vpack.c.bf16 %v4270_v35, %v4265_v7  ;;  %v7496_v33 = vpop.f32.mrb[86].mxu1 }
0x10e0   :  { %v4280_v13 = vadd.f32 %v7496_v33, %v6423_v25  ;;  %v4274_v29 = vpop.f32.mrb[87].mxu1  ;;  %v6404_v33 = vld [vmem:[%s8506_s8 + $0x60] sm:$0xff] }
0x10e1   :  { %v4275_v20 = vadd.f32 %v6423_v25, %v4274_v29 }
0x10e2   :  { %7975 = vmatpush3.bf16.xpose.msk.msra.mxu1 %vm8907_vm15, %v7970_v14 }
0x10e3   :  { %v7982_v1 = vpack.c.bf16 %v4280_v13, %v4275_v20  ;;  %7978 = vmatprep.subr.msk.bf16.mxu1 %vm8907_vm15, %v7976_v9  ;;  %v6405_v13 = vld [vmem:[%s8506_s8 + $0x68] sm:$0xff] }
0x10e4   :  { %v7940_v29 = vpack.c.bf16 %v6405_v13, %v6404_v33 }
0x10e6   :  { %7941 = vmatprep.subr.bf16.mxu0 %v7940_v29 }
0x10ea   :  { %7981 = vmatpush3.bf16.xpose.msk.msra.mxu1 %vm8907_vm15, %v7976_v9 }
0x10eb   :  { %7984 = vmatprep.subr.msk.bf16.mxu1 %vm8907_vm15, %v7982_v1 }
0x10f2   :  { %7987 = vmatpush3.bf16.xpose.msk.msra.mxu1 %vm8907_vm15, %v7982_v1  ;;  %vm5966_vm15 = vcmask 57344  }
0x1156   :  { %v3832_v2 = vpop.xlane.xlu0 %3831 }
0x1157   :  { %v3852_v0 = vsub.f32 %v9578_v17, %v3832_v2  ;;  %v3829_v34 = vpop.xlane.xlu1 %3828 }
0x1158   :  { %v3851_v16 = vsub.f32 %v9581_v49, %v3829_v34 }
0x1159   :  { %v3861_v61 = vmul.f32 1.442695, %v3852_v0 }
0x115a   :  { %v3859_v30 = vmul.f32 1.442695, %v3851_v16  ;;  %v3838_v23 = vpop.xlane.xlu0 %3837 }
0x115b   :  { %8252 = vpow2.f32 %v3861_v61  ;;  %v3854_v55 = vsub.f32 %v9588_v26, %v3838_v23  ;;  %v3835_v4 = vpop.xlane.xlu1 %3834  ;;  %v6407_v23 = vld [vmem:[%s8506_s8 + $0x78] sm:$0xff] }
0x115c   :  { %8254 = vpow2.f32 %v3859_v30  ;;  %v3853_v22 = vsub.f32 %v9591_v15, %v3835_v4  ;;  %v6406_v30 = vld [vmem:[%s8506_s8 + $0x70] sm:$0xff]  ;;  %s10116_s8 = sld [smem:[#allocation9_spill]] }
0x115d   :  { %v3865_v10 = vmul.f32 1.442695, %v3854_v55 }
0x115e   :  { %v3863_v50 = vmul.f32 1.442695, %v3853_v22  ;;  %v3844_v38 = vpop.xlane.xlu0 %3843 }
0x115f   :  { %8256 = vpow2.f32 %v3865_v10  ;;  %v3856_v37 = vsub.f32 %v9598_v12, %v3844_v38  ;;  %v3841_v17 = vpop.xlane.xlu1 %3840  ;;  %v7944_v38 = vpack.c.bf16 %v6407_v23, %v6406_v30 }
0x1160   :  { %8258 = vpow2.f32 %v3863_v50  ;;  %v3855_v49 = vsub.f32 %v9601_v11, %v3841_v17  ;;  %v6432_v17 = vld [vmem:[%s8526_s30 + $0x60] sm:$0xff] }
0x1161   :  { %v3869_v25 = vmul.f32 1.442695, %v3856_v37 }
0x1162   :  { %v3867_v21 = vmul.f32 1.442695, %v3855_v49  ;;  %v3850_v3 = vpop.xlane.xlu0 %3849  ;;  %v6433_v49 = vld [vmem:[%s8526_s30 + $0x68] sm:$0xff] }
0x1163   :  { %8260 = vpow2.f32 %v3869_v25  ;;  %v3858_v26 = vsub.f32 %v9609_v51, %v3850_v3  ;;  %v3847_v28 = vpop.xlane.xlu1 %3846 }
0x1164   :  { %8262 = vpow2.f32 %v3867_v21  ;;  %v3857_v15 = vsub.f32 %v9612_v39, %v3847_v28 }
0x1165   :  { %v8253_v19 = vpop.eup %8252  ;;  %v3873_v56 = vmul.f32 1.442695, %v3858_v26  ;;  %v7956_v26 = vpack.c.bf16 %v6433_v49, %v6432_v17 }
0x1166   :  { %v8255_v63 = vpop.eup %8254  ;;  %v3871_v47 = vmul.f32 1.442695, %v3857_v15  ;;  %v3878_v12 = vsel %vm1404_vm5, %v8253_v19, 0.0 }
0x1167   :  { %8264 = vpow2.f32 %v3873_v56  ;;  %3879 = vadd.xlane.f32.xlu0 %v3878_v12  ;;  %v3875_v11 = vsel %vm1404_vm5, %v8255_v63, 0.0 }
0x1168   :  { %8266 = vpow2.f32 %v3871_v47  ;;  %3876 = vadd.xlane.f32.xlu1 %v3875_v11 }
0x1169   :  { %v8257_v53 = vpop.eup %8256 }
0x116a   :  { %v8259_v8 = vpop.eup %8258  ;;  %v3884_v51 = vsel %vm1404_vm5, %v8257_v53, 0.0 }
0x116b   :  { %3885 = vadd.xlane.f32.xlu0 %v3884_v51  ;;  %v3881_v39 = vsel %vm1404_vm5, %v8259_v8, 0.0 }
0x116c   :  { %3882 = vadd.xlane.f32.xlu1 %v3881_v39 }
0x116d   :  { %v8261_v40 = vpop.eup %8260 }
0x116e   :  { %v8263_v57 = vpop.eup %8262  ;;  %v3890_v14 = vsel %vm1404_vm5, %v8261_v40, 0.0 }
0x116f   :  { %3891 = vadd.xlane.f32.xlu0 %v3890_v14  ;;  %v3887_v45 = vsel %vm1404_vm5, %v8263_v57, 0.0 }
0x1170   :  { %3888 = vadd.xlane.f32.xlu1 %v3887_v45 }
0x1171   :  { %v8265_v35 = vpop.eup %8264 }
0x1172   :  { %v8267_v46 = vpop.eup %8266  ;;  %v3896_v7 = vsel %vm1404_vm5, %v8265_v35, 0.0 }
0x1173   :  { %3897 = vadd.xlane.f32.xlu0 %v3896_v7  ;;  %v3893_v9 = vsel %vm1404_vm5, %v8267_v46, 0.0 }
0x1174   :  { %3894 = vadd.xlane.f32.xlu1 %v3893_v9  ;;  %v6409_v9 = vld [vmem:[%s8511_s14 + $0x3] ss:$0 sm:$0xff]  ;;  %s10117_s14 = sld [smem:[#allocation19_spill]] }
0x11f4   :  { %v3880_v20 = vpop.xlane.xlu0 %3879 }
0x11f5   :  { %8268 = vrcp.f32 %v3880_v20  ;;  %v3877_v1 = vpop.xlane.xlu1 %3876 }
0x11f6   :  { %8270 = vrcp.f32 %v3877_v1 }
0x11f8   :  { %v3886_v2 = vpop.xlane.xlu0 %3885 }
0x11f9   :  { %8272 = vrcp.f32 %v3886_v2  ;;  %v3883_v0 = vpop.xlane.xlu1 %3882 }
0x11fa   :  { %8274 = vrcp.f32 %v3883_v0 }
0x11fc   :  { %v3892_v34 = vpop.xlane.xlu0 %3891 }
0x11fd   :  { %8276 = vrcp.f32 %v3892_v34  ;;  %v3889_v16 = vpop.xlane.xlu1 %3888 }
0x11fe   :  { %8278 = vrcp.f32 %v3889_v16 }
0x11ff   :  { %v8269_v61 = vpop.eup %8268 }
0x1200   :  { %v8271_v55 = vpop.eup %8270  ;;  %v3898_v4 = vpop.xlane.xlu0 %3897  ;;  %v3902_v50 = vmul.f32 %v8269_v61, %v8253_v19 }
0x1201   :  { %8280 = vrcp.f32 %v3898_v4  ;;  %v3895_v22 = vpop.xlane.xlu1 %3894  ;;  %v3900_v10 = vmul.f32 %v8271_v55, %v8255_v63 }
0x1202   :  { %8282 = vrcp.f32 %v3895_v22 }
0x1203   :  { %v8273_v37 = vpop.eup %8272  ;;  %7445 = vmatprep.mubr.msk.f32.mxu0 %vm1404_vm5, %v3900_v10  ;;  %v6437_v10 = vld [vmem:[%s8531_s6 + $0x3] ss:$0 sm:$0xff] }
0x1204   :  { %v8275_v25 = vpop.eup %8274  ;;  %7446 = vmatmul.mubr.msk.f32.vlgmr.msra.gmra.mrb[64].mxu0 %vm1404_vm5, %v3902_v50  ;;  %v3906_v3 = vmul.f32 %v8273_v37, %v8257_v53  ;;  %v6434_v53 = vld [vmem:[%s8526_s30 + $0x70] sm:$0xff] }
0x1205   :  { %v3904_v21 = vmul.f32 %v8275_v25, %v8259_v8  ;;  %7943 = vmatpush3.bf16.msra.mxu0 %v7940_v29  ;;  %v6435_v8 = vld [vmem:[%s8526_s30 + $0x78] sm:$0xff] }
0x1206   :  { %7945 = vmatprep.subr.bf16.mxu0 %v7944_v38  ;;  %v7960_v51 = vpack.c.bf16 %v6435_v8, %v6434_v53 }
0x1207   :  { %v8277_v28 = vpop.eup %8276  ;;  %7448 = vmatprep.mubr.msk.f32.mxu0 %vm1404_vm5, %v3904_v21 }
0x1208   :  { %v8279_v15 = vpop.eup %8278  ;;  %7449 = vmatmul.mubr.msk.f32.gmra.mrb[66].mxu0 %vm1404_vm5, %v3906_v3  ;;  %v3910_v56 = vmul.f32 %v8277_v28, %v8261_v40 }
0x1209   :  { %v3908_v19 = vmul.f32 %v8279_v15, %v8263_v57  ;;  %7947 = vmatpush3.bf16.msra.mxu0 %v7944_v38 }
0x120a   :  { %7957 = vmatprep.subr.bf16.mxu0 %v7956_v26 }
0x120b   :  { %v8281_v63 = vpop.eup %8280  ;;  %7451 = vmatprep.mubr.msk.f32.mxu0 %vm1404_vm5, %v3908_v19 }
0x120c   :  { %v8283_v47 = vpop.eup %8282  ;;  %7452 = vmatmul.mubr.msk.f32.gmra.mrb[68].mxu0 %vm1404_vm5, %v3910_v56  ;;  %v3914_v11 = vmul.f32 %v8281_v63, %v8265_v35 }
0x120d   :  { %v3912_v12 = vmul.f32 %v8283_v47, %v8267_v46 }
0x120f   :  { %7454 = vmatprep.mubr.msk.f32.mxu0 %vm1404_vm5, %v3912_v12 }
0x1210   :  { %7455 = vmatmul.mubr.msk.f32.gmra.mrb[70].mxu0 %vm1404_vm5, %v3914_v11 }
0x1211   :  { %7465 = vmatprep.mubr.msk.f32.mxu0 %vm704_vm14, %v9436_v41 }
0x1214   :  { %7466 = vmatmul.mubr.msk.f32.vlgmr.msra.gmra.mrb[72].mxu0 %vm704_vm14, %v9439_v42 }
0x1215   :  { %7468 = vmatprep.mubr.msk.f32.mxu0 %vm704_vm14, %v9450_v48  ;;  %7959 = vmatpush3.bf16.msra.mxu0 %v7956_v26 }
0x1216   :  { %7961 = vmatprep.subr.bf16.mxu0 %v7960_v51 }
0x1218   :  { %7469 = vmatmul.mubr.msk.f32.gmra.mrb[74].mxu0 %vm704_vm14, %v9453_v32 }
0x1219   :  { %7471 = vmatprep.mubr.msk.f32.mxu0 %vm704_vm14, %v9464_v58  ;;  %7963 = vmatpush3.bf16.msra.mxu0 %v7960_v51 }
0x121c   :  { %7472 = vmatmul.mubr.msk.f32.gmra.mrb[76].mxu0 %vm704_vm14, %v9467_v31 }
0x121d   :  { %7474 = vmatprep.mubr.msk.f32.mxu0 %vm704_vm14, %v9477_v18 }
0x1220   :  { %7475 = vmatmul.mubr.msk.f32.gmra.mrb[78].mxu0 %vm704_vm14, %v9479_v59 }
0x1221   :  { %7505 = vmatprep.mubr.msk.f32.mxu0 %vm704_vm14, %v9436_v41 }
0x1224   :  { %7506 = vmatmul.mubr.msk.f32.vlgmr.msra.gmra.mrb[80].mxu0 %vm704_vm14, %v9439_v42 }
0x1225   :  { %7508 = vmatprep.mubr.msk.f32.mxu0 %vm704_vm14, %v9450_v48 }
0x1228   :  { %7509 = vmatmul.mubr.msk.f32.gmra.mrb[82].mxu0 %vm704_vm14, %v9453_v32 }
0x1229   :  { %7511 = vmatprep.mubr.msk.f32.mxu0 %vm704_vm14, %v9464_v58 }
0x122c   :  { %7512 = vmatmul.mubr.msk.f32.gmra.mrb[84].mxu0 %vm704_vm14, %v9467_v31 }
0x122d   :  { %7514 = vmatprep.mubr.msk.f32.mxu0 %vm704_vm14, %v9477_v18 }
0x1230   :  { %7515 = vmatmul.mubr.msk.f32.gmra.mrb[86].mxu0 %vm704_vm14, %v9479_v59 }
0x12d7   :  { %v9698_v39 = vpop.f32.mrb[64].mxu0 }
0x12d8   :  { %v9700_v40 = vpop.f32.mrb[65].mxu0 }
0x12db   :  { %v9702_v57 = vpop.f32.mrb[66].mxu0 }
0x12dc   :  { %v9704_v14 = vpop.f32.mrb[67].mxu0 }
0x12df   :  { %v9706_v45 = vpop.f32.mrb[68].mxu0 }
0x12e0   :  { %v9708_v35 = vpop.f32.mrb[69].mxu0 }
0x12e3   :  { %v9710_v46 = vpop.f32.mrb[70].mxu0 }
0x12e4   :  { %v9712_v7 = vpop.f32.mrb[71].mxu0 }
0x12e7   :  { %v7467_v33 = vpop.f32.mrb[72].mxu0 }
0x12e8   :  { %v4126_v13 = vpop.f32.mrb[73].mxu0  ;;  %v4132_v20 = vadd.f32 %v7467_v33, %v6409_v9 }
0x12e9   :  { %v4127_v29 = vadd.f32 %v6409_v9, %v4126_v13 }
0x12eb   :  { %v7470_v1 = vpop.f32.mrb[74].mxu0  ;;  %7533 = vmatprep.mubr.msk.f32.mxu1 %vm247_vm0, %v4127_v29 }
0x12ec   :  { %v4136_v2 = vpop.f32.mrb[75].mxu0  ;;  %7534 = vmatmul.mubr.msk.f32.vlgmr.msra.gmra.mrb[88].mxu1 %vm247_vm0, %v4132_v20  ;;  %v4142_v34 = vadd.f32 %v7470_v1, %v6409_v9 }
0x12ed   :  { %v4137_v0 = vadd.f32 %v6409_v9, %v4136_v2 }
0x12ef   :  { %v7473_v16 = vpop.f32.mrb[76].mxu0  ;;  %7536 = vmatprep.mubr.msk.f32.mxu1 %vm247_vm0, %v4137_v0 }
0x12f0   :  { %v4146_v61 = vpop.f32.mrb[77].mxu0  ;;  %7537 = vmatmul.mubr.msk.f32.gmra.mrb[90].mxu1 %vm247_vm0, %v4142_v34  ;;  %v4152_v23 = vadd.f32 %v7473_v16, %v6409_v9 }
0x12f1   :  { %v4147_v30 = vadd.f32 %v6409_v9, %v4146_v61 }
0x12f3   :  { %v7476_v55 = vpop.f32.mrb[78].mxu0  ;;  %7539 = vmatprep.mubr.msk.f32.mxu1 %vm247_vm0, %v4147_v30 }
0x12f4   :  { %v4156_v4 = vpop.f32.mrb[79].mxu0  ;;  %7540 = vmatmul.mubr.msk.f32.gmra.mrb[92].mxu1 %vm247_vm0, %v4152_v23  ;;  %v4162_v50 = vadd.f32 %v7476_v55, %v6409_v9 }
0x12f5   :  { %v4157_v22 = vadd.f32 %v6409_v9, %v4156_v4 }
0x12f7   :  { %v7507_v38 = vpop.f32.mrb[80].mxu0  ;;  %7542 = vmatprep.mubr.msk.f32.mxu1 %vm247_vm0, %v4157_v22 }
0x12f8   :  { %v4368_v37 = vadd.f32 %v7507_v38, %v6437_v10  ;;  %v4362_v17 = vpop.f32.mrb[81].mxu0  ;;  %7543 = vmatmul.mubr.msk.f32.gmra.mrb[94].mxu1 %vm247_vm0, %v4162_v50 }
0x12f9   :  { %v4363_v49 = vadd.f32 %v6437_v10, %v4362_v17 }
0x12fb   :  { %v7988_v25 = vpack.c.bf16 %v4368_v37, %v4363_v49  ;;  %v7510_v21 = vpop.f32.mrb[82].mxu0 }
0x12fc   :  { %v4378_v3 = vadd.f32 %v7510_v21, %v6437_v10  ;;  %v4372_v26 = vpop.f32.mrb[83].mxu0 }
0x12fd   :  { %v4373_v28 = vadd.f32 %v6437_v10, %v4372_v26  ;;  %7989 = vmatprep.subr.bf16.mxu0 %v7988_v25 }
0x12fe   :  { %7991 = vmatpush3.bf16.msra.mxu0 %v7988_v25 }
0x12ff   :  { %v7992_v15 = vpack.c.bf16 %v4378_v3, %v4373_v28  ;;  %v7513_v19 = vpop.f32.mrb[84].mxu0 }
0x1300   :  { %v4388_v56 = vadd.f32 %v7513_v19, %v6437_v10  ;;  %v4382_v63 = vpop.f32.mrb[85].mxu0 }
0x1301   :  { %v4383_v47 = vadd.f32 %v6437_v10, %v4382_v63  ;;  %7993 = vmatprep.subr.bf16.mxu0 %v7992_v15 }
0x1302   :  { %7995 = vmatpush3.bf16.msra.mxu0 %v7992_v15 }
0x1303   :  { %v7996_v12 = vpack.c.bf16 %v4388_v56, %v4383_v47  ;;  %v7516_v11 = vpop.f32.mrb[86].mxu0 }
0x1304   :  { %v4398_v53 = vadd.f32 %v7516_v11, %v6437_v10  ;;  %v4392_v8 = vpop.f32.mrb[87].mxu0 }
0x1305   :  { %v4393_v51 = vadd.f32 %v6437_v10, %v4392_v8  ;;  %7997 = vmatprep.subr.bf16.mxu0 %v7996_v12 }
0x1306   :  { %7999 = vmatpush3.bf16.msra.mxu0 %v7996_v12 }
0x1307   :  { %v8000_v9 = vpack.c.bf16 %v4398_v53, %v4393_v51 }
0x1309   :  { %8001 = vmatprep.subr.bf16.mxu0 %v8000_v9 }
0x130a   :  { %8003 = vmatpush3.bf16.msra.mxu0 %v8000_v9 }
0x13bf   :  { %v7535_v33 = vpop.f32.mrb[88].mxu1 }
0x13c0   :  { %v4555_v13 = vmul.f32 0.25, %v7535_v33  ;;  %v4515_v29 = vpop.f32.mrb[89].mxu1 }
0x13c1   :  { %v4554_v20 = vmul.f32 0.25, %v4515_v29 }
0x13c2   :  { %v4563_v1 = vadd.f32 %v4555_v13, %v8973_v52 }
0x13c3   :  { %v4562_v2 = vadd.f32 %v4554_v20, %v8975_v54  ;;  %v7538_v0 = vpop.f32.mrb[90].mxu1 }
0x13c4   :  { %v4557_v34 = vmul.f32 0.25, %v7538_v0  ;;  %v4525_v16 = vpop.f32.mrb[91].mxu1  ;;  %v4573_v61 = vsel %vm1404_vm5, %v4563_v1, -inf }
0x13c5   :  { %v4556_v30 = vmul.f32 0.25, %v4525_v16  ;;  %4574 = vmax.xlane.f32.xlu0 %v4573_v61  ;;  %v4570_v23 = vsel %vm1404_vm5, %v4562_v2, -inf }
0x13c6   :  { %v4565_v55 = vadd.f32 %v4557_v34, %v8985_v60  ;;  %4571 = vmax.xlane.f32.xlu1 %v4570_v23 }
0x13c7   :  { %v4564_v4 = vadd.f32 %v4556_v30, %v8987_v62  ;;  %v7541_v22 = vpop.f32.mrb[92].mxu1 }
0x13c8   :  { %v4559_v10 = vmul.f32 0.25, %v7541_v22  ;;  %v4535_v50 = vpop.f32.mrb[93].mxu1  ;;  %v4579_v52 = vsel %vm1404_vm5, %v4565_v55, -inf }
0x13c9   :  { %v4558_v54 = vmul.f32 0.25, %v4535_v50  ;;  %4580 = vmax.xlane.f32.xlu0 %v4579_v52  ;;  %v4576_v38 = vsel %vm1404_vm5, %v4564_v4, -inf }
0x13ca   :  { %v4567_v37 = vadd.f32 %v4559_v10, %v9001_v43  ;;  %4577 = vmax.xlane.f32.xlu1 %v4576_v38 }
0x13cb   :  { %v4566_v17 = vadd.f32 %v4558_v54, %v9005_v27  ;;  %v7544_v49 = vpop.f32.mrb[94].mxu1 }
0x13cc   :  { %v4561_v25 = vmul.f32 0.25, %v7544_v49  ;;  %v4545_v60 = vpop.f32.mrb[95].mxu1  ;;  %v4585_v21 = vsel %vm1404_vm5, %v4567_v37, -inf }
0x13cd   :  { %v4560_v62 = vmul.f32 0.25, %v4545_v60  ;;  %4586 = vmax.xlane.f32.xlu0 %v4585_v21  ;;  %v4582_v3 = vsel %vm1404_vm5, %v4566_v17, -inf }
0x13ce   :  { %v4569_v26 = vadd.f32 %v4561_v25, %v9015_v36  ;;  %4583 = vmax.xlane.f32.xlu1 %v4582_v3  ;;  %v6470_v3 = vld [vmem:[%s8536_s12 + $0x30] sm:$0xff] }
0x13cf   :  { %v4568_v28 = vadd.f32 %v4560_v62, %v9019_v44 }
0x13d0   :  { %v4591_v15 = vsel %vm1404_vm5, %v4569_v26, -inf }
0x13d1   :  { %4592 = vmax.xlane.f32.xlu0 %v4591_v15  ;;  %v4588_v43 = vsel %vm1404_vm5, %v4568_v28, -inf }
0x13d2   :  { %4589 = vmax.xlane.f32.xlu1 %v4588_v43 }
0x1452   :  { %v4575_v27 = vpop.xlane.xlu0 %4574 }
0x1453   :  { %v4595_v19 = vsub.f32 %v4563_v1, %v4575_v27  ;;  %v4572_v56 = vpop.xlane.xlu1 %4571 }
0x1454   :  { %v4594_v63 = vsub.f32 %v4562_v2, %v4572_v56 }
0x1455   :  { %v4604_v47 = vmul.f32 1.442695, %v4595_v19 }
0x1456   :  { %v4602_v12 = vmul.f32 1.442695, %v4594_v63  ;;  %v4581_v11 = vpop.xlane.xlu0 %4580 }
0x1457   :  { %8284 = vpow2.f32 %v4604_v47  ;;  %v4597_v53 = vsub.f32 %v4565_v55, %v4581_v11  ;;  %v4578_v8 = vpop.xlane.xlu1 %4577 }
0x1458   :  { %8286 = vpow2.f32 %v4602_v12  ;;  %v4596_v36 = vsub.f32 %v4564_v4, %v4578_v8 }
0x1459   :  { %v4608_v51 = vmul.f32 1.442695, %v4597_v53 }
0x145a   :  { %v4606_v44 = vmul.f32 1.442695, %v4596_v36  ;;  %v4587_v9 = vpop.xlane.xlu0 %4586 }
0x145b   :  { %8288 = vpow2.f32 %v4608_v51  ;;  %v4599_v33 = vsub.f32 %v4567_v37, %v4587_v9  ;;  %v4584_v13 = vpop.xlane.xlu1 %4583 }
0x145c   :  { %8290 = vpow2.f32 %v4606_v44  ;;  %v4598_v29 = vsub.f32 %v4566_v17, %v4584_v13 }
0x145d   :  { %v4612_v20 = vmul.f32 1.442695, %v4599_v33 }
0x145e   :  { %v4610_v1 = vmul.f32 1.442695, %v4598_v29  ;;  %v4593_v0 = vpop.xlane.xlu0 %4592 }
0x145f   :  { %8292 = vpow2.f32 %v4612_v20  ;;  %v4601_v2 = vsub.f32 %v4569_v26, %v4593_v0  ;;  %v4590_v34 = vpop.xlane.xlu1 %4589  ;;  %v6471_v26 = vld [vmem:[%s8536_s12 + $0x38] sm:$0xff] }
0x1460   :  { %8294 = vpow2.f32 %v4610_v1  ;;  %v4600_v16 = vsub.f32 %v4568_v28, %v4590_v34  ;;  %v8004_v28 = vpack.c.bf16 %v6471_v26, %v6470_v3 }
0x1461   :  { %v8285_v61 = vpop.eup %8284  ;;  %v4616_v30 = vmul.f32 1.442695, %v4601_v2 }
0x1462   :  { %v8287_v23 = vpop.eup %8286  ;;  %v4614_v55 = vmul.f32 1.442695, %v4600_v16  ;;  %v4621_v4 = vsel %vm1404_vm5, %v8285_v61, 0.0  ;;  %8005 = vmatprep.subr.bf16.mxu0 %v8004_v28 }
0x1463   :  { %8296 = vpow2.f32 %v4616_v30  ;;  %4622 = vadd.xlane.f32.xlu0 %v4621_v4  ;;  %v4618_v22 = vsel %vm1404_vm5, %v8287_v23, 0.0  ;;  %v6403_v30 = vld [vmem:[%s8536_s12 + $0x28] sm:$0xff] }
0x1464   :  { %8298 = vpow2.f32 %v4614_v55  ;;  %4619 = vadd.xlane.f32.xlu1 %v4618_v22 }
0x1465   :  { %v8289_v10 = vpop.eup %8288 }
0x1466   :  { %v8291_v50 = vpop.eup %8290  ;;  %v4627_v52 = vsel %vm1404_vm5, %v8289_v10, 0.0 }
0x1467   :  { %4628 = vadd.xlane.f32.xlu0 %v4627_v52  ;;  %v4624_v54 = vsel %vm1404_vm5, %v8291_v50, 0.0 }
0x1468   :  { %4625 = vadd.xlane.f32.xlu1 %v4624_v54 }
0x1469   :  { %v8293_v38 = vpop.eup %8292 }
0x146a   :  { %v8295_v37 = vpop.eup %8294  ;;  %v4633_v17 = vsel %vm1404_vm5, %v8293_v38, 0.0 }
0x146b   :  { %4634 = vadd.xlane.f32.xlu0 %v4633_v17  ;;  %v4630_v49 = vsel %vm1404_vm5, %v8295_v37, 0.0 }
0x146c   :  { %4631 = vadd.xlane.f32.xlu1 %v4630_v49 }
0x146d   :  { %v8297_v25 = vpop.eup %8296 }
0x146e   :  { %v8299_v60 = vpop.eup %8298  ;;  %v4639_v21 = vsel %vm1404_vm5, %v8297_v25, 0.0 }
0x146f   :  { %4640 = vadd.xlane.f32.xlu0 %v4639_v21  ;;  %v4636_v62 = vsel %vm1404_vm5, %v8299_v60, 0.0 }
0x1470   :  { %4637 = vadd.xlane.f32.xlu1 %v4636_v62 }
0x14f0   :  { %v4623_v15 = vpop.xlane.xlu0 %4622 }
0x14f1   :  { %8300 = vrcp.f32 %v4623_v15  ;;  %v4620_v43 = vpop.xlane.xlu1 %4619 }
0x14f2   :  { %8302 = vrcp.f32 %v4620_v43 }
0x14f4   :  { %v4629_v27 = vpop.xlane.xlu0 %4628 }
0x14f5   :  { %8304 = vrcp.f32 %v4629_v27  ;;  %v4626_v19 = vpop.xlane.xlu1 %4625 }
0x14f6   :  { %8306 = vrcp.f32 %v4626_v19 }
0x14f8   :  { %v4635_v56 = vpop.xlane.xlu0 %4634 }
0x14f9   :  { %8308 = vrcp.f32 %v4635_v56  ;;  %v4632_v63 = vpop.xlane.xlu1 %4631 }
0x14fa   :  { %8310 = vrcp.f32 %v4632_v63 }
0x14fb   :  { %v8301_v47 = vpop.eup %8300 }
0x14fc   :  { %v8303_v12 = vpop.eup %8302  ;;  %v4641_v11 = vpop.xlane.xlu0 %4640  ;;  %v4645_v36 = vmul.f32 %v8301_v47, %v8285_v61  ;;  %v6402_v61 = vld [vmem:[%s8536_s12 + $0x20] sm:$0xff] }
0x14fd   :  { %8312 = vrcp.f32 %v4641_v11  ;;  %v4638_v53 = vpop.xlane.xlu1 %4637  ;;  %v4643_v8 = vmul.f32 %v8303_v12, %v8287_v23  ;;  %v8008_v23 = vpack.c.bf16 %v6403_v30, %v6402_v61 }
0x14fe   :  { %8314 = vrcp.f32 %v4638_v53 }
0x14ff   :  { %v8305_v51 = vpop.eup %8304  ;;  %7561 = vmatprep.mubr.msk.f32.mxu0 %vm1404_vm5, %v4643_v8 }
0x1500   :  { %v8307_v44 = vpop.eup %8306  ;;  %7562 = vmatmul.mubr.msk.f32.vlgmr.msra.gmra.mrb[88].mxu0 %vm1404_vm5, %v4645_v36  ;;  %v4649_v33 = vmul.f32 %v8305_v51, %v8289_v10 }
0x1501   :  { %v4647_v9 = vmul.f32 %v8307_v44, %v8291_v50  ;;  %8007 = vmatpush3.bf16.msra.mxu0 %v8004_v28 }
0x1502   :  { %8009 = vmatprep.subr.bf16.mxu0 %v8008_v23 }
0x1503   :  { %v8309_v13 = vpop.eup %8308  ;;  %7564 = vmatprep.mubr.msk.f32.mxu0 %vm1404_vm5, %v4647_v9 }
0x1504   :  { %v8311_v29 = vpop.eup %8310  ;;  %7565 = vmatmul.mubr.msk.f32.gmra.mrb[90].mxu0 %vm1404_vm5, %v4649_v33  ;;  %v4653_v1 = vmul.f32 %v8309_v13, %v8293_v38 }
0x1505   :  { %v4651_v20 = vmul.f32 %v8311_v29, %v8295_v37 }
0x1507   :  { %v8313_v0 = vpop.eup %8312  ;;  %7567 = vmatprep.mubr.msk.f32.mxu0 %vm1404_vm5, %v4651_v20 }
0x1508   :  { %v8315_v2 = vpop.eup %8314  ;;  %7568 = vmatmul.mubr.msk.f32.gmra.mrb[92].mxu0 %vm1404_vm5, %v4653_v1  ;;  %v4657_v16 = vmul.f32 %v8313_v0, %v8297_v25 }
0x1509   :  { %v4655_v34 = vmul.f32 %v8315_v2, %v8299_v60 }
0x150b   :  { %7570 = vmatprep.mubr.msk.f32.mxu0 %vm1404_vm5, %v4655_v34 }
0x150c   :  { %7571 = vmatmul.mubr.msk.f32.gmra.mrb[94].mxu0 %vm1404_vm5, %v4657_v16 }
0x15d3   :  { %v7563_v55 = vpop.f32.mrb[88].mxu0 }
0x15d4   :  { %v4748_v4 = vpop.f32.mrb[89].mxu0 }
0x15d5   :  { %7577 = vmatprep.mubr.msk.f32.mxu0 %vm247_vm0, %v4748_v4 }
0x15d6   :  { %7578 = vmatmul.mubr.msk.f32.vlgmr.msra.gmra.mrb[96].mxu0 %vm247_vm0, %v7563_v55 }
0x15d7   :  { %v7566_v22 = vpop.f32.mrb[90].mxu0  ;;  %8011 = vmatpush3.bf16.msra.mxu0 %v8008_v23 }
0x15d8   :  { %v4758_v10 = vpop.f32.mrb[91].mxu0 }
0x15d9   :  { %7580 = vmatprep.mubr.msk.f32.mxu0 %vm247_vm0, %v4758_v10 }
0x15da   :  { %7581 = vmatmul.mubr.msk.f32.gmra.mrb[98].mxu0 %vm247_vm0, %v7566_v22 }
0x15db   :  { %v7569_v50 = vpop.f32.mrb[92].mxu0 }
0x15dc   :  { %v4768_v52 = vpop.f32.mrb[93].mxu0 }
0x15dd   :  { %7583 = vmatprep.mubr.msk.f32.mxu0 %vm247_vm0, %v4768_v52 }
0x15de   :  { %7584 = vmatmul.mubr.msk.f32.gmra.mrb[100].mxu0 %vm247_vm0, %v7569_v50 }
0x15df   :  { %v7572_v54 = vpop.f32.mrb[94].mxu0 }
0x15e0   :  { %v4778_v38 = vpop.f32.mrb[95].mxu0 }
0x15e1   :  { %7586 = vmatprep.mubr.msk.f32.mxu0 %vm247_vm0, %v4778_v38 }
0x15e2   :  { %7587 = vmatmul.mubr.msk.f32.gmra.mrb[102].mxu0 %vm247_vm0, %v7572_v54 }
0x15e3   :  { %7593 = vmatprep.mubr.msk.f32.mxu0 %vm247_vm0, %v9700_v40  ;;  %v6489_v40 = vld [vmem:[%s10107_s0 + $0x1] ss:$0 sm:$0xff] }
0x15e6   :  { %7594 = vmatmul.mubr.msk.f32.vlgmr.msra.gmra.mrb[96].mxu0 %vm247_vm0, %v9698_v39 }
0x15e7   :  { %7596 = vmatprep.mubr.msk.f32.mxu0 %vm247_vm0, %v9704_v14 }
0x15ea   :  { %7597 = vmatmul.mubr.msk.f32.gmra.mrb[98].mxu0 %vm247_vm0, %v9702_v57 }
0x15eb   :  { %7599 = vmatprep.mubr.msk.f32.mxu0 %vm247_vm0, %v9708_v35 }
0x15ee   :  { %7600 = vmatmul.mubr.msk.f32.gmra.mrb[100].mxu0 %vm247_vm0, %v9706_v45 }
0x15ef   :  { %7602 = vmatprep.mubr.msk.f32.mxu0 %vm247_vm0, %v9712_v7 }
0x15f2   :  { %7603 = vmatmul.mubr.msk.f32.gmra.mrb[102].mxu0 %vm247_vm0, %v9710_v46  ;;  %vm8455_vm0 = vmmov 0  }
0x15f3   :  { %7669 = vmatprep.mubr.msk.f32.mxu0 %vm8455_vm0, %v8452_v24 }
0x16b9   :  { %v7595_v39 = vpop.f32.mrb[96].mxu0 }
0x16ba   :  { %v5057_v37 = vadd.f32 %v7595_v39, %v6489_v40  ;;  %v5009_v17 = vpop.f32.mrb[97].mxu0 }
0x16bb   :  { %v5056_v14 = vadd.f32 %v6489_v40, %v5009_v17 }
0x16bc   :  { %v5065_v49 = vadd.f32 %v5057_v37, %v9439_v42 }
0x16bd   :  { %v5064_v57 = vadd.f32 %v5056_v14, %v9436_v41  ;;  %v7598_v25 = vpop.f32.mrb[98].mxu0 }
0x16be   :  { %v5059_v35 = vadd.f32 %v7598_v25, %v6489_v40  ;;  %v5019_v60 = vpop.f32.mrb[99].mxu0  ;;  %v5079_v45 = vsel %vm704_vm14, %v5065_v49, 0.0 }
0x16bf   :  { %v5058_v21 = vadd.f32 %v6489_v40, %v5019_v60  ;;  %5080 = vadd.xlane.f32.xlu0 %v5079_v45  ;;  %v5076_v7 = vsel %vm704_vm14, %v5064_v57, 0.0 }
0x16c0   :  { %v5067_v46 = vadd.f32 %v5059_v35, %v9453_v32  ;;  %5077 = vadd.xlane.f32.xlu1 %v5076_v7  ;;  %v6494_v7 = vld [vmem:[%s10108_s5 + $0x20] sm:$0xff] }
0x16c1   :  { %v5066_v62 = vadd.f32 %v5058_v21, %v9450_v48  ;;  %v7601_v3 = vpop.f32.mrb[100].mxu0 }
0x16c2   :  { %v5061_v26 = vadd.f32 %v7601_v3, %v6489_v40  ;;  %v5029_v28 = vpop.f32.mrb[101].mxu0  ;;  %v5085_v42 = vsel %vm704_vm14, %v5067_v46, 0.0  ;;  %v6496_v3 = vld [vmem:[%s10108_s5 + $0x30] sm:$0xff] }
0x16c3   :  { %v5060_v41 = vadd.f32 %v6489_v40, %v5029_v28  ;;  %5086 = vadd.xlane.f32.xlu0 %v5085_v42  ;;  %v5082_v15 = vsel %vm704_vm14, %v5066_v62, 0.0 }
0x16c4   :  { %v5069_v43 = vadd.f32 %v5061_v26, %v9467_v31  ;;  %5083 = vadd.xlane.f32.xlu1 %v5082_v15  ;;  %v6497_v26 = vld [vmem:[%s10108_s5 + $0x38] sm:$0xff] }
0x16c5   :  { %v5068_v27 = vadd.f32 %v5060_v41, %v9464_v58  ;;  %v7604_v19 = vpop.f32.mrb[102].mxu0  ;;  %v8016_v28 = vpack.c.bf16 %v6497_v26, %v6496_v3  ;;  %v6509_v26 = vld [vmem:[%s10111_s21 + $0x48] sm:$0xff] }
0x16c6   :  { %v5063_v56 = vadd.f32 %v7604_v19, %v6489_v40  ;;  %v5039_v32 = vpop.f32.mrb[103].mxu0  ;;  %v5091_v63 = vsel %vm704_vm14, %v5069_v43, 0.0 }
0x16c7   :  { %v5062_v48 = vadd.f32 %v6489_v40, %v5039_v32  ;;  %5092 = vadd.xlane.f32.xlu0 %v5091_v63  ;;  %v5088_v47 = vsel %vm704_vm14, %v5068_v27, 0.0 }
0x16c8   :  { %v5071_v12 = vadd.f32 %v5063_v56, %v9479_v59  ;;  %5089 = vadd.xlane.f32.xlu1 %v5088_v47 }
0x16c9   :  { %v5070_v11 = vadd.f32 %v5062_v48, %v9477_v18 }
0x16ca   :  { %v5097_v53 = vsel %vm704_vm14, %v5071_v12, 0.0 }
0x16cb   :  { %5098 = vadd.xlane.f32.xlu0 %v5097_v53  ;;  %v5094_v31 = vsel %vm704_vm14, %v5070_v11, 0.0 }
0x16cc   :  { %5095 = vadd.xlane.f32.xlu1 %v5094_v31 }
0x174c   :  { %v5081_v58 = vpop.xlane.xlu0 %5080 }
0x174d   :  { %v5101_v8 = vmul.f32 0.03125, %v5081_v58  ;;  %v5078_v36 = vpop.xlane.xlu1 %5077 }
0x174e   :  { %v5100_v51 = vmul.f32 0.03125, %v5078_v36 }
0x174f   :  { %v9801_v44 = vsub.f32 %v5065_v49, %v5101_v8 }
0x1750   :  { %v9803_v9 = vsub.f32 %v5064_v57, %v5100_v51  ;;  %v5087_v33 = vpop.xlane.xlu0 %5086 }
0x1751   :  { %v5103_v13 = vmul.f32 0.03125, %v5087_v33  ;;  %v5084_v59 = vpop.xlane.xlu1 %5083  ;;  %v5117_v18 = vmul.f32 %v9801_v44, %v9801_v44 }
0x1752   :  { %v5102_v29 = vmul.f32 0.03125, %v5084_v59  ;;  %v5116_v20 = vmul.f32 %v9803_v9, %v9803_v9 }
0x1753   :  { %v9809_v1 = vsub.f32 %v5067_v46, %v5103_v13  ;;  %v5127_v0 = vsel %vm704_vm14, %v5117_v18, 0.0  ;;  %v6495_v46 = vld [vmem:[%s10108_s5 + $0x28] sm:$0xff] }
0x1754   :  { %v9812_v2 = vsub.f32 %v5066_v62, %v5102_v29  ;;  %v5093_v34 = vpop.xlane.xlu0 %5092  ;;  %5128 = vadd.xlane.f32.xlu0 %v5127_v0  ;;  %v5124_v16 = vsel %vm704_vm14, %v5116_v20, 0.0  ;;  %v8012_v62 = vpack.c.bf16 %v6495_v46, %v6494_v7  ;;  %v6492_v29 = vld [vmem:[%s10109_s9 + $0x1] ss:$0 sm:$0xff] }
0x1755   :  { %v5105_v61 = vmul.f32 0.03125, %v5093_v34  ;;  %v5090_v30 = vpop.xlane.xlu1 %5089  ;;  %5125 = vadd.xlane.f32.xlu1 %v5124_v16  ;;  %v5119_v23 = vmul.f32 %v9809_v1, %v9809_v1 }
0x1756   :  { %v5104_v55 = vmul.f32 0.03125, %v5090_v30  ;;  %v5118_v4 = vmul.f32 %v9812_v2, %v9812_v2  ;;  %8013 = vmatprep.subr.bf16.mxu1 %v8012_v62  ;;  %v6493_v30 = vld [vmem:[%s10110_s17 + $0x1] ss:$0 sm:$0xff] }
0x1757   :  { %v9819_v22 = vsub.f32 %v5069_v43, %v5105_v61  ;;  %v5133_v10 = vsel %vm704_vm14, %v5119_v23, 0.0  ;;  %8015 = vmatpush3.bf16.msra.mxu1 %v8012_v62 }
0x1758   :  { %v9822_v50 = vsub.f32 %v5068_v27, %v5104_v55  ;;  %5134 = vadd.xlane.f32.xlu0 %v5133_v10  ;;  %v5099_v52 = vpop.xlane.xlu0 %5098  ;;  %v5130_v54 = vsel %vm704_vm14, %v5118_v4, 0.0  ;;  %8017 = vmatprep.subr.bf16.mxu1 %v8016_v28 }
0x1759   :  { %v5107_v38 = vmul.f32 0.03125, %v5099_v52  ;;  %5131 = vadd.xlane.f32.xlu1 %v5130_v54  ;;  %v5096_v40 = vpop.xlane.xlu1 %5095  ;;  %v5121_v39 = vmul.f32 %v9819_v22, %v9819_v22 }
0x175a   :  { %v5106_v37 = vmul.f32 0.03125, %v5096_v40  ;;  %v5120_v17 = vmul.f32 %v9822_v50, %v9822_v50 }
0x175b   :  { %v9829_v14 = vsub.f32 %v5071_v12, %v5107_v38  ;;  %v5139_v49 = vsel %vm704_vm14, %v5121_v39, 0.0  ;;  %8019 = vmatpush3.bf16.msra.mxu1 %v8016_v28 }
0x175c   :  { %v9832_v57 = vsub.f32 %v5070_v11, %v5106_v37  ;;  %5140 = vadd.xlane.f32.xlu0 %v5139_v49  ;;  %v5136_v25 = vsel %vm704_vm14, %v5120_v17, 0.0 }
0x175d   :  { %5137 = vadd.xlane.f32.xlu1 %v5136_v25  ;;  %v5123_v35 = vmul.f32 %v9829_v14, %v9829_v14 }
0x175e   :  { %v5122_v60 = vmul.f32 %v9832_v57, %v9832_v57 }
0x175f   :  { %v5145_v45 = vsel %vm704_vm14, %v5123_v35, 0.0 }
0x1760   :  { %5146 = vadd.xlane.f32.xlu0 %v5145_v45  ;;  %v5142_v21 = vsel %vm704_vm14, %v5122_v60, 0.0 }
0x1761   :  { %5143 = vadd.xlane.f32.xlu1 %v5142_v21 }
0x17e1   :  { %v5129_v42 = vpop.xlane.xlu0 %5128 }
0x17e2   :  { %v5149_v41 = vmul.f32 0.03125, %v5129_v42  ;;  %v5126_v15 = vpop.xlane.xlu1 %5125  ;;  %v6510_v42 = vld [vmem:[%s10111_s21 + $0x50] sm:$0xff] }
0x17e3   :  { %v5148_v43 = vmul.f32 0.03125, %v5126_v15 }
0x17e4   :  { %v5157_v27 = vadd.f32 1e-12, %v5149_v41  ;;  %v6511_v41 = vld [vmem:[%s10111_s21 + $0x58] sm:$0xff] }
0x17e5   :  { %v5156_v19 = vadd.f32 1e-12, %v5148_v43  ;;  %v5135_v56 = vpop.xlane.xlu0 %5134  ;;  %v8024_v15 = vpack.c.bf16 %v6511_v41, %v6510_v42  ;;  %v6512_v43 = vld [vmem:[%s10111_s21 + $0x60] sm:$0xff] }
0x17e6   :  { %8316 = vrsqrt.f32 %v5157_v27  ;;  %v5151_v32 = vmul.f32 0.03125, %v5135_v56  ;;  %v5132_v63 = vpop.xlane.xlu1 %5131  ;;  %v6513_v27 = vld [vmem:[%s10111_s21 + $0x68] sm:$0xff]  ;;  %v6514_v56 = vld [vmem:[%s10111_s21 + $0x70] sm:$0xff] }
0x17e7   :  { %8318 = vrsqrt.f32 %v5156_v19  ;;  %v5150_v48 = vmul.f32 0.03125, %v5132_v63  ;;  %v8028_v19 = vpack.c.bf16 %v6513_v27, %v6512_v43 }
0x17e8   :  { %v5159_v47 = vadd.f32 1e-12, %v5151_v32  ;;  %v6515_v32 = vld [vmem:[%s10111_s21 + $0x78] sm:$0xff] }
0x17e9   :  { %v5158_v12 = vadd.f32 1e-12, %v5150_v48  ;;  %v5141_v11 = vpop.xlane.xlu0 %5140  ;;  %v8032_v63 = vpack.c.bf16 %v6515_v32, %v6514_v56  ;;  %v6499_v48 = vld [vmem:[%s10112_s25 + $0x1] ss:$0 sm:$0xff] }
0x17ea   :  { %8320 = vrsqrt.f32 %v5159_v47  ;;  %v5153_v53 = vmul.f32 0.03125, %v5141_v11  ;;  %v5138_v31 = vpop.xlane.xlu1 %5137 }
0x17eb   :  { %8322 = vrsqrt.f32 %v5158_v12  ;;  %v5152_v58 = vmul.f32 0.03125, %v5138_v31 }
0x17ec   :  { %v5161_v8 = vadd.f32 1e-12, %v5153_v53 }
0x17ed   :  { %v5160_v36 = vadd.f32 1e-12, %v5152_v58  ;;  %v5147_v51 = vpop.xlane.xlu0 %5146 }
0x17ee   :  { %8324 = vrsqrt.f32 %v5161_v8  ;;  %v5155_v33 = vmul.f32 0.03125, %v5147_v51  ;;  %v5144_v13 = vpop.xlane.xlu1 %5143 }
0x17ef   :  { %8326 = vrsqrt.f32 %v5160_v36  ;;  %v5154_v59 = vmul.f32 0.03125, %v5144_v13 }
0x17f0   :  { %v8317_v18 = vpop.eup %8316  ;;  %v5163_v20 = vadd.f32 1e-12, %v5155_v33 }
0x17f1   :  { %v8319_v0 = vpop.eup %8318  ;;  %v5173_v34 = vmul.f32 %v8317_v18, %v9801_v44  ;;  %v5162_v16 = vadd.f32 1e-12, %v5154_v59 }
0x17f2   :  { %8328 = vrsqrt.f32 %v5163_v20  ;;  %v5172_v61 = vmul.f32 %v8319_v0, %v9803_v9 }
0x17f3   :  { %v5187_v23 = vmul.f32 %v6492_v29, %v5173_v34  ;;  %8330 = vrsqrt.f32 %v5162_v16 }
0x17f4   :  { %v8321_v55 = vpop.eup %8320  ;;  %v5186_v4 = vmul.f32 %v6492_v29, %v5172_v61 }
0x17f5   :  { %v8323_v10 = vpop.eup %8322  ;;  %v5175_v52 = vmul.f32 %v8321_v55, %v9809_v1  ;;  %v9853_v40 = vadd.f32 %v6493_v30, %v5187_v23 }
0x17f6   :  { %v9850_v54 = vadd.f32 %v6493_v30, %v5186_v4  ;;  %v5174_v38 = vmul.f32 %v8323_v10, %v9812_v2 }
0x17f7   :  { %v5189_v39 = vmul.f32 %v6492_v29, %v5175_v52 }
0x17f8   :  { %v8325_v44 = vpop.eup %8324  ;;  %7613 = vmatprep.mubr.msk.f32.mxu1 %vm704_vm14, %v9850_v54  ;;  %v5188_v9 = vmul.f32 %v6492_v29, %v5174_v38 }
0x17f9   :  { %v8327_v37 = vpop.eup %8326  ;;  %7614 = vmatmul.mubr.msk.f32.vlgmr.msra.gmra.mrb[96].mxu1 %vm704_vm14, %v9853_v40  ;;  %v5177_v17 = vmul.f32 %v8325_v44, %v9819_v22  ;;  %v9863_v25 = vadd.f32 %v6493_v30, %v5189_v39 }
0x17fa   :  { %v9860_v49 = vadd.f32 %v6493_v30, %v5188_v9  ;;  %v5176_v1 = vmul.f32 %v8327_v37, %v9822_v50 }
0x17fb   :  { %v5191_v2 = vmul.f32 %v6492_v29, %v5177_v17 }
0x17fc   :  { %v8329_v35 = vpop.eup %8328  ;;  %7616 = vmatprep.mubr.msk.f32.mxu1 %vm704_vm14, %v9860_v49  ;;  %v5190_v60 = vmul.f32 %v6492_v29, %v5176_v1 }
0x17fd   :  { %v8331_v45 = vpop.eup %8330  ;;  %7617 = vmatmul.mubr.msk.f32.gmra.mrb[98].mxu1 %vm704_vm14, %v9863_v25  ;;  %v5179_v22 = vmul.f32 %v8329_v35, %v9829_v14  ;;  %v9873_v7 = vadd.f32 %v6493_v30, %v5191_v2 }
0x17fe   :  { %v9870_v21 = vadd.f32 %v6493_v30, %v5190_v60  ;;  %v5178_v50 = vmul.f32 %v8331_v45, %v9832_v57  ;;  %v6508_v57 = vld [vmem:[%s10111_s21 + $0x40] sm:$0xff] }
0x17ff   :  { %v5193_v46 = vmul.f32 %v6492_v29, %v5179_v22  ;;  %v8020_v28 = vpack.c.bf16 %v6509_v26, %v6508_v57 }
0x1800   :  { %7619 = vmatprep.mubr.msk.f32.mxu1 %vm704_vm14, %v9870_v21  ;;  %v5192_v62 = vmul.f32 %v6492_v29, %v5178_v50 }
0x1801   :  { %7620 = vmatmul.mubr.msk.f32.gmra.mrb[100].mxu1 %vm704_vm14, %v9873_v7  ;;  %v9881_v14 = vadd.f32 %v6493_v30, %v5193_v46  ;;  %8021 = vmatprep.subr.bf16.mxu1 %v8020_v28 }
0x1802   :  { %v9879_v3 = vadd.f32 %v6493_v30, %v5192_v62  ;;  %8023 = vmatpush3.bf16.msra.mxu1 %v8020_v28 }
0x1803   :  { %8025 = vmatprep.subr.bf16.mxu1 %v8024_v15 }
0x1804   :  { %7622 = vmatprep.mubr.msk.f32.mxu1 %vm704_vm14, %v9879_v3 }
0x1805   :  { %7623 = vmatmul.mubr.msk.f32.gmra.mrb[102].mxu1 %vm704_vm14, %v9881_v14 }
0x1806   :  { %8027 = vmatpush3.bf16.msra.mxu1 %v8024_v15 }
0x1807   :  { %8029 = vmatprep.subr.bf16.mxu1 %v8028_v19 }
0x180a   :  { %8031 = vmatpush3.bf16.msra.mxu1 %v8028_v19 }
0x180b   :  { %8033 = vmatprep.subr.bf16.mxu1 %v8032_v63 }
0x180e   :  { %8035 = vmatpush3.bf16.msra.mxu1 %v8032_v63 }
0x180f   :  { %7683 = vmatprep.subr.mxu1 %v8452_v24 }
0x18cc   :  { %v7615_v47 = vpop.f32.mrb[96].mxu1 }
0x18cd   :  { %v9897_v12 = vadd.f32 %v7615_v47, %v6499_v48  ;;  %v5311_v11 = vpop.f32.mrb[97].mxu1 }
0x18ce   :  { %v5312_v53 = vadd.f32 %v6499_v48, %v5311_v11 }
0x18cf   :  { %v5359_v31 = vmul.f32 0.044715, %v9897_v12 }
0x18d0   :  { %v5358_v58 = vmul.f32 0.044715, %v5312_v53  ;;  %v7618_v8 = vpop.f32.mrb[98].mxu1 }
0x18d1   :  { %v5367_v36 = vmul.f32 %v5359_v31, %v9897_v12  ;;  %v9901_v51 = vadd.f32 %v7618_v8, %v6499_v48  ;;  %v5321_v33 = vpop.f32.mrb[99].mxu1 }
0x18d2   :  { %v5366_v13 = vmul.f32 %v5358_v58, %v5312_v53  ;;  %v9903_v59 = vadd.f32 %v6499_v48, %v5321_v33  ;;  %v5350_v33 = vmul.f32 0.5, %v5312_v53 }
0x18d3   :  { %v5375_v18 = vmul.f32 %v5367_v36, %v9897_v12  ;;  %v5361_v29 = vmul.f32 0.044715, %v9901_v51 }
0x18d4   :  { %v5374_v20 = vmul.f32 %v5366_v13, %v5312_v53  ;;  %v5360_v0 = vmul.f32 0.044715, %v9903_v59  ;;  %v7621_v34 = vpop.f32.mrb[100].mxu1 }
0x18d5   :  { %v5383_v16 = vadd.f32 %v5375_v18, %v9897_v12  ;;  %v5369_v61 = vmul.f32 %v5361_v29, %v9901_v51  ;;  %v9910_v30 = vadd.f32 %v7621_v34, %v6499_v48  ;;  %v5331_v23 = vpop.f32.mrb[101].mxu1  ;;  %v5351_v18 = vmul.f32 0.5, %v9897_v12 }
0x18d6   :  { %v5382_v55 = vadd.f32 %v5374_v20, %v5312_v53  ;;  %v5368_v4 = vmul.f32 %v5360_v0, %v9903_v59  ;;  %v9913_v10 = vadd.f32 %v6499_v48, %v5331_v23 }
0x18d7   :  { %v5391_v52 = vmul.f32 0.7978846, %v5383_v16  ;;  %v5377_v38 = vmul.f32 %v5369_v61, %v9901_v51  ;;  %v5363_v39 = vmul.f32 0.044715, %v9910_v30  ;;  %v5352_v61 = vmul.f32 0.5, %v9903_v59 }
0x18d8   :  { %v5376_v44 = vmul.f32 %v5368_v4, %v9903_v59  ;;  %v5362_v9 = vmul.f32 0.044715, %v9913_v10  ;;  %v7624_v37 = vpop.f32.mrb[102].mxu1  ;;  %v5390_v17 = vmul.f32 0.7978846, %v5382_v55  ;;  %v5353_v55 = vmul.f32 0.5, %v9901_v51 }
0x18d9   :  { %8332 = vtanh.f32 %v5391_v52  ;;  %v5385_v1 = vadd.f32 %v5377_v38, %v9901_v51  ;;  %v5371_v2 = vmul.f32 %v5363_v39, %v9910_v30  ;;  %v9921_v35 = vadd.f32 %v7624_v37, %v6499_v48  ;;  %v5341_v60 = vpop.f32.mrb[103].mxu1 }
0x18da   :  { %v5384_v45 = vadd.f32 %v5376_v44, %v9903_v59  ;;  %v5370_v22 = vmul.f32 %v5362_v9, %v9913_v10  ;;  %v5342_v50 = vadd.f32 %v6499_v48, %v5341_v60  ;;  %8334 = vtanh.f32 %v5390_v17 }
0x18db   :  { %v5379_v46 = vmul.f32 %v5371_v2, %v9910_v30  ;;  %v5365_v62 = vmul.f32 0.044715, %v9921_v35  ;;  %v5393_v57 = vmul.f32 0.7978846, %v5385_v1  ;;  %v5354_v39 = vmul.f32 0.5, %v9913_v10 }
0x18dc   :  { %v5378_v26 = vmul.f32 %v5370_v22, %v9913_v10  ;;  %v5364_v28 = vmul.f32 0.044715, %v5342_v50  ;;  %v5392_v42 = vmul.f32 0.7978846, %v5384_v45  ;;  %v5355_v59 = vmul.f32 0.5, %v9910_v30 }
0x18dd   :  { %v5387_v41 = vadd.f32 %v5379_v46, %v9910_v30  ;;  %v5373_v15 = vmul.f32 %v5365_v62, %v9921_v35  ;;  %8336 = vtanh.f32 %v5393_v57  ;;  %v5356_v2 = vmul.f32 0.5, %v5342_v50  ;;  %v6517_v30 = vld [vmem:[%s10113_s29 + $0x1] ss:$0 sm:$0xff] }
0x18de   :  { %v5386_v43 = vadd.f32 %v5378_v26, %v9913_v10  ;;  %v5372_v27 = vmul.f32 %v5364_v28, %v5342_v50  ;;  %8338 = vtanh.f32 %v5392_v42  ;;  %v5357_v45 = vmul.f32 0.5, %v9921_v35 }
0x18df   :  { %v5381_v19 = vmul.f32 %v5373_v15, %v9921_v35  ;;  %v5395_v56 = vmul.f32 0.7978846, %v5387_v41 }
0x18e0   :  { %v5380_v32 = vmul.f32 %v5372_v27, %v5342_v50  ;;  %v5394_v63 = vmul.f32 0.7978846, %v5386_v43 }
0x18e1   :  { %v5389_v48 = vadd.f32 %v5381_v19, %v9921_v35  ;;  %8340 = vtanh.f32 %v5395_v56 }
0x18e2   :  { %v5388_v47 = vadd.f32 %v5380_v32, %v5342_v50  ;;  %8342 = vtanh.f32 %v5394_v63 }
0x18e3   :  { %v8333_v11 = vpop.eup %8332  ;;  %v5397_v31 = vmul.f32 0.7978846, %v5389_v48 }
0x18e4   :  { %v8335_v58 = vpop.eup %8334  ;;  %v5407_v8 = vadd.f32 1.0, %v8333_v11  ;;  %v5396_v36 = vmul.f32 0.7978846, %v5388_v47 }
0x18e5   :  { %v5406_v13 = vadd.f32 1.0, %v8335_v58  ;;  %8344 = vtanh.f32 %v5397_v31 }
0x18e6   :  { %8346 = vtanh.f32 %v5396_v36  ;;  %v5415_v34 = vmul.f32 %v5407_v8, %v5351_v18 }
0x18e7   :  { %v8337_v29 = vpop.eup %8336  ;;  %v5414_v20 = vmul.f32 %v5406_v13, %v5350_v33 }
0x18e8   :  { %v8339_v0 = vpop.eup %8338  ;;  %v5409_v16 = vadd.f32 1.0, %v8337_v29 }
0x18e9   :  { %7641 = vmatprep.mubr.msk.f32.mxu1 %vm1404_vm5, %v5414_v20  ;;  %v5408_v23 = vadd.f32 1.0, %v8339_v0 }
0x18ea   :  { %7642 = vmatmul.mubr.msk.f32.vlgmr.msra.gmra.mrb[104].mxu1 %vm1404_vm5, %v5415_v34  ;;  %v5417_v38 = vmul.f32 %v5409_v16, %v5353_v55 }
0x18eb   :  { %v8341_v53 = vpop.eup %8340  ;;  %v5416_v4 = vmul.f32 %v5408_v23, %v5352_v61 }
0x18ec   :  { %v8343_v52 = vpop.eup %8342  ;;  %v5411_v12 = vadd.f32 1.0, %v8341_v53 }
0x18ed   :  { %7644 = vmatprep.mubr.msk.f32.mxu1 %vm1404_vm5, %v5416_v4  ;;  %v5410_v44 = vadd.f32 1.0, %v8343_v52 }
0x18ee   :  { %7645 = vmatmul.mubr.msk.f32.gmra.mrb[106].mxu1 %vm1404_vm5, %v5417_v38  ;;  %v5419_v1 = vmul.f32 %v5411_v12, %v5355_v59 }
0x18ef   :  { %v8345_v9 = vpop.eup %8344  ;;  %v5418_v37 = vmul.f32 %v5410_v44, %v5354_v39 }
0x18f0   :  { %v8347_v17 = vpop.eup %8346  ;;  %v5413_v51 = vadd.f32 1.0, %v8345_v9 }
0x18f1   :  { %7647 = vmatprep.mubr.msk.f32.mxu1 %vm1404_vm5, %v5418_v37  ;;  %v5412_v60 = vadd.f32 1.0, %v8347_v17 }
0x18f2   :  { %7648 = vmatmul.mubr.msk.f32.gmra.mrb[108].mxu1 %vm1404_vm5, %v5419_v1  ;;  %v5421_v22 = vmul.f32 %v5413_v51, %v5357_v45 }
0x18f3   :  { %v5420_v10 = vmul.f32 %v5412_v60, %v5356_v2 }
0x18f5   :  { %7650 = vmatprep.mubr.msk.f32.mxu1 %vm1404_vm5, %v5420_v10 }
0x18f6   :  { %7651 = vmatmul.mubr.msk.f32.gmra.mrb[110].mxu1 %vm1404_vm5, %v5421_v22 }
0x18f7   :  { %7685 = vmatprep.mubr.msk.f32.mxu1 %vm8455_vm0, %v8452_v24 }
0x19bd   :  { %v7643_v46 = vpop.f32.mrb[104].mxu1 }
0x19be   :  { %v5535_v62 = vadd.f32 %v7643_v46, %v6517_v30  ;;  %v5529_v57 = vpop.f32.mrb[105].mxu1 }
0x19bf   :  { %v5530_v26 = vadd.f32 %v6517_v30, %v5529_v57 }
0x19c0   :  { %v5569_v28 = vadd.f32 %v5535_v62, %v9853_v40 }
0x19c1   :  { %v5568_v50 = vadd.f32 %v5530_v26, %v9850_v54  ;;  %v7646_v42 = vpop.f32.mrb[106].mxu1 }
0x19c2   :  { %v5545_v41 = vadd.f32 %v7646_v42, %v6517_v30  ;;  %v5539_v15 = vpop.f32.mrb[107].mxu1  ;;  %v5583_v35 = vsel %vm704_vm14, %v5569_v28, 0.0 }
0x19c3   :  { %v5540_v43 = vadd.f32 %v6517_v30, %v5539_v15  ;;  %5584 = vadd.xlane.f32.xlu0 %v5583_v35  ;;  %v5580_v27 = vsel %vm704_vm14, %v5568_v50, 0.0 }
0x19c4   :  { %v5571_v19 = vadd.f32 %v5545_v41, %v9863_v25  ;;  %5581 = vadd.xlane.f32.xlu1 %v5580_v27  ;;  %v5875_v27 = vld [vmem:[#allocation2] sm:$0x1] }
0x19c5   :  { %v5570_v56 = vadd.f32 %v5540_v43, %v9860_v49  ;;  %v7649_v32 = vpop.f32.mrb[108].mxu1 }
0x19c6   :  { %v5555_v63 = vadd.f32 %v7649_v32, %v6517_v30  ;;  %v5549_v48 = vpop.f32.mrb[109].mxu1  ;;  %v5589_v40 = vsel %vm704_vm14, %v5571_v19, 0.0  ;;  %v8454_v32 = vmov 0.0|0.0  }
0x19c7   :  { %v5550_v54 = vadd.f32 %v6517_v30, %v5549_v48  ;;  %5590 = vadd.xlane.f32.xlu0 %v5589_v40  ;;  %v5586_v47 = vsel %vm704_vm14, %v5570_v56, 0.0  ;;  %8036 = vmatprep.subr.bf16.mxu0 %v8454_v32 }
0x19c8   :  { %v5573_v11 = vadd.f32 %v5555_v63, %v9873_v7  ;;  %5587 = vadd.xlane.f32.xlu1 %v5586_v47 }
0x19c9   :  { %v5572_v31 = vadd.f32 %v5550_v54, %v9870_v21  ;;  %v7652_v58 = vpop.f32.mrb[110].mxu1 }
0x19ca   :  { %v5565_v8 = vadd.f32 %v7652_v58, %v6517_v30  ;;  %v5559_v25 = vpop.f32.mrb[111].mxu1  ;;  %v5595_v36 = vsel %vm704_vm14, %v5573_v11, 0.0 }
0x19cb   :  { %v5560_v49 = vadd.f32 %v6517_v30, %v5559_v25  ;;  %5596 = vadd.xlane.f32.xlu0 %v5595_v36  ;;  %v5592_v33 = vsel %vm704_vm14, %v5572_v31, 0.0 }
0x19cc   :  { %v5575_v13 = vadd.f32 %v5565_v8, %v9881_v14  ;;  %5593 = vadd.xlane.f32.xlu1 %v5592_v33 }
0x19cd   :  { %v5574_v18 = vadd.f32 %v5560_v49, %v9879_v3 }
0x19ce   :  { %v5601_v29 = vsel %vm704_vm14, %v5575_v13, 0.0 }
0x19cf   :  { %5602 = vadd.xlane.f32.xlu0 %v5601_v29  ;;  %v5598_v7 = vsel %vm704_vm14, %v5574_v18, 0.0 }
0x19d0   :  { %5599 = vadd.xlane.f32.xlu1 %v5598_v7 }
0x1a50   :  { %v5585_v21 = vpop.xlane.xlu0 %5584 }
0x1a51   :  { %v5605_v20 = vmul.f32 0.03125, %v5585_v21  ;;  %v5582_v0 = vpop.xlane.xlu1 %5581 }
0x1a52   :  { %v5604_v34 = vmul.f32 0.03125, %v5582_v0 }
0x1a53   :  { %v9964_v16 = vsub.f32 %v5569_v28, %v5605_v20 }
0x1a54   :  { %v9966_v61 = vsub.f32 %v5568_v50, %v5604_v34  ;;  %v5591_v23 = vpop.xlane.xlu0 %5590 }
0x1a55   :  { %v5607_v55 = vmul.f32 0.03125, %v5591_v23  ;;  %v5588_v14 = vpop.xlane.xlu1 %5587  ;;  %v5621_v3 = vmul.f32 %v9964_v16, %v9964_v16 }
0x1a56   :  { %v5606_v53 = vmul.f32 0.03125, %v5588_v14  ;;  %v5620_v4 = vmul.f32 %v9966_v61, %v9966_v61 }
0x1a57   :  { %v9972_v52 = vsub.f32 %v5571_v19, %v5607_v55  ;;  %v5631_v38 = vsel %vm704_vm14, %v5621_v3, 0.0  ;;  %v10005_v19 = vld [vmem:[%s10116_s8] sm:$0x3] }
0x1a58   :  { %v9975_v12 = vsub.f32 %v5570_v56, %v5606_v53  ;;  %v5597_v39 = vpop.xlane.xlu0 %5596  ;;  %5632 = vadd.xlane.f32.xlu0 %v5631_v38  ;;  %v5628_v44 = vsel %vm704_vm14, %v5620_v4, 0.0  ;;  %v6025_v56 = vadd.s32 4, %v10005_v19  ;;  %v6528_v3 = vld [vmem:[%s10114_s3 + $0x1] ss:$0 sm:$0xff] }
0x1a59   :  { %v5609_v59 = vmul.f32 0.03125, %v5597_v39  ;;  %v5594_v9 = vpop.xlane.xlu1 %5593  ;;  %5629 = vadd.xlane.f32.xlu1 %v5628_v44  ;;  %v5623_v37 = vmul.f32 %v9972_v52, %v9972_v52  ;;  %v6529_v44 = vld [vmem:[%s10115_s20 + $0x1] ss:$0 sm:$0xff] }
0x1a5a   :  { %v5608_v17 = vmul.f32 0.03125, %v5594_v9  ;;  %v5622_v1 = vmul.f32 %v9975_v12, %v9975_v12 }
0x1a5b   :  { %v9982_v51 = vsub.f32 %v5573_v11, %v5609_v59  ;;  %v5637_v2 = vsel %vm704_vm14, %v5623_v37, 0.0 }
0x1a5c   :  { %v9985_v60 = vsub.f32 %v5572_v31, %v5608_v17  ;;  %5638 = vadd.xlane.f32.xlu0 %v5637_v2  ;;  %v5603_v45 = vpop.xlane.xlu0 %5602  ;;  %v5634_v10 = vsel %vm704_vm14, %v5622_v1, 0.0 }
0x1a5d   :  { %v5611_v22 = vmul.f32 0.03125, %v5603_v45  ;;  %5635 = vadd.xlane.f32.xlu1 %v5634_v10  ;;  %v5600_v30 = vpop.xlane.xlu1 %5599  ;;  %v5625_v46 = vmul.f32 %v9982_v51, %v9982_v51 }
0x1a5e   :  { %v5610_v62 = vmul.f32 0.03125, %v5600_v30  ;;  %v5624_v57 = vmul.f32 %v9985_v60, %v9985_v60 }
0x1a5f   :  { %v9992_v26 = vsub.f32 %v5575_v13, %v5611_v22  ;;  %v5643_v28 = vsel %vm704_vm14, %v5625_v46, 0.0 }
0x1a60   :  { %v9995_v50 = vsub.f32 %v5574_v18, %v5610_v62  ;;  %5644 = vadd.xlane.f32.xlu0 %v5643_v28  ;;  %v5640_v42 = vsel %vm704_vm14, %v5624_v57, 0.0 }
0x1a61   :  { %5641 = vadd.xlane.f32.xlu1 %v5640_v42  ;;  %v5627_v41 = vmul.f32 %v9992_v26, %v9992_v26 }
0x1a62   :  { %v5626_v15 = vmul.f32 %v9995_v50, %v9995_v50 }
0x1a63   :  { %v5649_v35 = vsel %vm704_vm14, %v5627_v41, 0.0 }
0x1a64   :  { %5650 = vadd.xlane.f32.xlu0 %v5649_v35  ;;  %v5646_v43 = vsel %vm704_vm14, %v5626_v15, 0.0 }
0x1a65   :  { %5647 = vadd.xlane.f32.xlu1 %v5646_v43 }
0x1a76   :  { %5878 = vperm.xlu1 %8123, %v5875_v27  }
0x1a7a   :  { %6027 = vperm.xlu1 %8123, %v6025_v56  }
0x1ae5   :  { %v5633_v63 = vpop.xlane.xlu0 %5632 }
0x1ae6   :  { %v5653_v48 = vmul.f32 0.03125, %v5633_v63  ;;  %v5630_v40 = vpop.xlane.xlu1 %5629  ;;  %v5712_v63 = vmul.u32 8, %v8615_v6 }
0x1ae7   :  { %v5652_v54 = vmul.f32 0.03125, %v5630_v40 }
0x1ae8   :  { %v5661_v47 = vadd.f32 1e-12, %v5653_v48  ;;  %vm5713_vm10 = vcmp.eq.s32.totalorder %v8613_v5, %v5712_v63 }
0x1ae9   :  { %v5660_v11 = vadd.f32 1e-12, %v5652_v54  ;;  %v5639_v31 = vpop.xlane.xlu0 %5638 }
0x1aea   :  { %8348 = vrsqrt.f32 %v5661_v47  ;;  %v5655_v58 = vmul.f32 0.03125, %v5639_v31  ;;  %v5636_v8 = vpop.xlane.xlu1 %5635  ;;  %v6530_v31 = vsel %vm5713_vm10, 1.0, %v8452_v24 }
0x1aeb   :  { %8350 = vrsqrt.f32 %v5660_v11  ;;  %v5654_v25 = vmul.f32 0.03125, %v5636_v8  ;;  %v5791_v8 = vld [vmem:[%s10117_s14 + $0x10] sm:$0xff] }
0x1aec   :  { %v5663_v36 = vadd.f32 1e-12, %v5655_v58 }
0x1aed   :  { %v5662_v49 = vadd.f32 1e-12, %v5654_v25  ;;  %v5645_v33 = vpop.xlane.xlu0 %5644  ;;  %v5792_v25 = vld [vmem:[%s10117_s14 + $0x18] sm:$0xff] }
0x1aee   :  { %8352 = vrsqrt.f32 %v5663_v36  ;;  %v5657_v13 = vmul.f32 0.03125, %v5645_v33  ;;  %v5642_v18 = vpop.xlane.xlu1 %5641  ;;  %v8052_v36 = vpack.c.bf16 %v5792_v25, %v5791_v8 }
0x1aef   :  { %8354 = vrsqrt.f32 %v5662_v49  ;;  %v5656_v29 = vmul.f32 0.03125, %v5642_v18 }
0x1af0   :  { %v5665_v7 = vadd.f32 1e-12, %v5657_v13  ;;  %v6532_v13 = vld [vmem:[%s10118_s19] ss:$0 sm:$0xff] }
0x1af1   :  { %v5664_v21 = vadd.f32 1e-12, %v5656_v29  ;;  %v5651_v20 = vpop.xlane.xlu0 %5650 }
0x1af2   :  { %8356 = vrsqrt.f32 %v5665_v7  ;;  %v5659_v0 = vmul.f32 0.03125, %v5651_v20  ;;  %v5648_v34 = vpop.xlane.xlu1 %5647  ;;  %v5874_v20 = vld [vmem:[%s8596_s13] sm:$0x1]  ;;  %s8456_s13 = smov [#allocation3]  }
0x1af3   :  { %8358 = vrsqrt.f32 %v5664_v21  ;;  %v5658_v23 = vmul.f32 0.03125, %v5648_v34  ;;  %s6075_s24 = sshll.u32 %s8456_s13, 4  ;;  %s6076_s24 = int_to_ptr.vmem [resolvable:$true] %s6075_s24 }
0x1af4   :  { %v8349_v55 = vpop.eup %8348  ;;  %v5667_v14 = vadd.f32 1e-12, %v5659_v0  ;;  %s8374_s30 = scalar_lea.vmem %s6076_s24, 16  ;;  %s8378_s6 = scalar_lea.vmem %s6076_s24, 32 }
0x1af5   :  { %v8351_v53 = vpop.eup %8350  ;;  %v5677_v4 = vmul.f32 %v8349_v55, %v9964_v16  ;;  %v5666_v38 = vadd.f32 1e-12, %v5658_v23  ;;  %p8375_p0 = scmp.ne.s32.totalorder %s6076_s24, %s8374_s30  ;;  %p8379_p1 = scmp.lt.s32.totalorder %s6076_s24, %s6076_s24 }
0x1af6   :  { %v5676_v39 = vmul.f32 %v8351_v53, %v9966_v61  ;;  %8360 = vrsqrt.f32 %v5667_v14  ;;  %v5879_v0 = vpop.permute.xlu1 %5878  ;;  %p8380_p2 = scmp.lt.s32.totalorder %s8378_s6, %s8374_s30 }
0x1af7   :  { %8362 = vrsqrt.f32 %v5666_v38  ;;  %v5691_v59 = vmul.f32 %v6528_v3, %v5677_v4 }
0x1af8   :  { %v8353_v9 = vpop.eup %8352  ;;  %v5690_v37 = vmul.f32 %v6528_v3, %v5676_v39  ;;  %p8381_p3 = por %p8380_p2, %p8379_p1 }
0x1af9   :  { %v8355_v17 = vpop.eup %8354  ;;  %v5679_v1 = vmul.f32 %v8353_v9, %v9972_v52  ;;  %v5705_v2 = vadd.f32 %v6529_v44, %v5691_v59  ;;  %v6536_v9 = vadd.s32 4294967292, %v8613_v5 }
0x1afa   :  { %v5678_v45 = vmul.f32 %v8355_v17, %v9975_v12  ;;  %v5704_v10 = vadd.f32 %v6529_v44, %v5690_v37  ;;  %p8382_p4 = pnand %p8381_p3, %p8375_p0 }
0x1afb   :  { %v5693_v22 = vmul.f32 %v6528_v3, %v5679_v1 }
0x1afc   :  { %v8357_v30 = vpop.eup %8356  ;;  %v8037_v46 = vpack.c.bf16 %v5705_v2, %v5704_v10  ;;  %v5692_v16 = vmul.f32 %v6528_v3, %v5678_v45 }
0x1afd   :  { %v8359_v62 = vpop.eup %8358  ;;  %v5681_v61 = vmul.f32 %v8357_v30, %v9982_v51  ;;  %v5707_v57 = vadd.f32 %v6529_v44, %v5693_v22 }
0x1afe   :  { %v5680_v28 = vmul.f32 %v8359_v62, %v9985_v60  ;;  %8038 = vmatpush3.bf16.msra.mxu0 %v8037_v46  ;;  %v5706_v42 = vadd.f32 %v6529_v44, %v5692_v16  ;;  %v6028_v46 = vpop.permute.xlu1 %6027 }
0x1aff   :  { %8039 = vmatprep.subr.bf16.mxu0 %v8454_v32  ;;  %v5695_v41 = vmul.f32 %v6528_v3, %v5681_v61 }
0x1b00   :  { %v8361_v52 = vpop.eup %8360  ;;  %v8040_v15 = vpack.c.bf16 %v5707_v57, %v5706_v42  ;;  %v5694_v35 = vmul.f32 %v6528_v3, %v5680_v28 }
0x1b01   :  { %v8363_v12 = vpop.eup %8362  ;;  %v5683_v43 = vmul.f32 %v8361_v52, %v9992_v26  ;;  %v5709_v27 = vadd.f32 %v6529_v44, %v5695_v41  ;;  %v5789_v26 = vld [vmem:[%s10117_s14] sm:$0xff] }
0x1b02   :  { %v5682_v56 = vmul.f32 %v8363_v12, %v9995_v50  ;;  %8041 = vmatpush3.bf16.msra.mxu0 %v8040_v15  ;;  %v5708_v51 = vadd.f32 %v6529_v44, %v5694_v35  ;;  %v5790_v50 = vld [vmem:[%s10117_s14 + $0x8] sm:$0xff] }
0x1b03   :  { %8042 = vmatprep.subr.bf16.mxu0 %v8454_v32  ;;  %v5697_v60 = vmul.f32 %v6528_v3, %v5683_v43  ;;  %v8049_v58 = vpack.c.bf16 %v5790_v50, %v5789_v26 }
0x1b04   :  { %v8043_v48 = vpack.c.bf16 %v5709_v27, %v5708_v51  ;;  %v5696_v40 = vmul.f32 %v6528_v3, %v5682_v56 }
0x1b05   :  { %v5711_v54 = vadd.f32 %v6529_v44, %v5697_v60 }
0x1b06   :  { %8044 = vmatpush3.bf16.msra.mxu0 %v8043_v48  ;;  %v5710_v47 = vadd.f32 %v6529_v44, %v5696_v40 }
0x1b07   :  { %8045 = vmatprep.subr.bf16.mxu0 %v8454_v32 }
0x1b08   :  { %v8046_v11 = vpack.c.bf16 %v5711_v54, %v5710_v47 }
0x1b0a   :  { %8047 = vmatpush3.bf16.msra.mxu0 %v8046_v11 }
0x1b0b   :  { %8048 = vmatprep.subr.bf16.mxu0 %v8454_v32 }
0x1b0d   :  { %7670 = vmatmul.mubr.msk.f32.vlgmr.msra.gmra.mrb[104].mxu0 %vm1404_vm5, %v6530_v31  ;;  %vm6029_vm5 = vcmp.eq.s32.totalorder %v8613_v5, %v6028_v46 }
0x1b0e   :  { %8050 = vmatpush3.bf16.msra.mxu0 %v8049_v58  ;;  %7680 = vmatprep.mubr.msk.f32.mxu0 %vm8455_vm0, %v8452_v24  ;;  %v5883_v24 = vsub.s32 0, %v8615_v6  ;;  %vm6065_vm0 = vcmask 0  }
0x1b0f   :  { %8051 = vmatprep.subr.bf16.mxu0 %v8454_v32 }
0x1b10   :  { %v5884_v32 = vrot.slane %v5879_v0, %v5883_v24 }
0x1b12   :  { %8053 = vmatpush3.bf16.msra.mxu0 %v8052_v36 }
0x1be0   :  { %v5785_v49 = vpop.f32.mrb[104].mxu0 }
0x1be1   :  { %v7671_v33 = vpop.f32.mrb[105].mxu0  ;;  %7681 = vmatmul.mubr.msk.f32.vlgmr.msra.gmra.mrb[106].mxu0 %vm704_vm14, %v5785_v49 }
0x1cb4   :  { %v5869_v18 = vpop.f32.mrb[106].mxu0 }
0x1cb5   :  { %v5870_v29 = vadd.f32 %v6532_v13, %v5869_v18  ;;  %v7682_v7 = vpop.f32.mrb[107].mxu0 }
0x1cb7   :  { %8364 = vtanh.f32 %v5870_v29 }
0x1cc1   :  { %v8365_v21 = vpop.eup %8364 }
0x1cc2   :  { %7684 = vmatpush3.xpose.msk.msra.mxu1 %vm704_vm14, %v8365_v21 }
0x1cc5   :  { %7686 = vmatmul.mubr.msk.f32.vlgmr.msra.gmra.mrb[112].mxu1 %vm704_vm14, %v5874_v20 }
0x1d98   :  { %v5957_v34 = vpop.f32.mrb[112].mxu1 }
0x1d99   :  { %v5958_v23 = vadd.f32 %v5957_v34, %v5884_v32  ;;  %v7687_v55 = vpop.f32.mrb[113].mxu1 }
0x1d9b   :  { %v5965_v3 = vsel %vm5963_vm13, %v5958_v23, -1e+30  ;;  %v6012_v6 = vsel %vm10047_vm1, %v5958_v23, -1e+30  ;;  %v6031_v16 = vrot.slane %v5958_v23, 7 }
0x1d9c   :  { %v5967_v53 = vsel %vm5966_vm15, %v5965_v3, -inf  ;;  %v6013_v4 = vsel %vm5966_vm15, %v6012_v6, -inf }
0x1d9d   :  { %5968 = vmax.xlane.f32.xlu0 %v5967_v53  ;;  %v6033_v57 = vsel %vm6029_vm5, %v6031_v16, 0.0 }
0x1d9e   :  { %v6035_v28 = vsel %vm6034_vm6, %v6033_v57, 0.0 }
0x1da1   :  { %6014 = vmax.xlane.f32.xlu0 %v6013_v4 }
0x1e2a   :  { %v10055_v38 = vpop.xlane.xlu0 %5968 }
0x1e2b   :  { %v5970_v39 = vsub.f32 %v5965_v3, %v10055_v38  ;;  %vm5989_vm14 = vcmp.eq.f32.partialorder %v5965_v3, %v10055_v38 }
0x1e2c   :  { %vm5990_vm2 = vmand %vm5989_vm14, %vm5963_vm13 }
0x1e2d   :  { %v5971_v44 = vmul.f32 1.442695, %v5970_v39  ;;  %v5991_v59 = vsel %vm5990_vm2, %v8613_v5, 4 }
0x1e2e   :  { %v6015_v37 = vpop.xlane.xlu0 %6014  ;;  %v5992_v17 = vsel %vm5966_vm15, %v5991_v59, 2147483647 }
0x1e2f   :  { %8366 = vpow2.f32 %v5971_v44  ;;  %vm6043_vm3 = vcmp.eq.f32.partialorder %v6012_v6, %v6015_v37  ;;  %v5994_v1 = vshra.s32 %v5992_v17, 16  ;;  %v6016_v42 = vsub.f32 %v6012_v6, %v6015_v37 }
0x1e30   :  { %vm6044_vm4 = vmand %vm6043_vm3, %vm10047_vm1  ;;  %v5993_v27 = vand.u32 65535, %v5992_v17 }
0x1e31   :  { %v6046_v2 = vsel %vm6044_vm4, %v6536_v9, 4  ;;  %v5996_v45 = vcvt.s32.f32 %v5994_v1  ;;  %v6017_v41 = vmul.f32 1.442695, %v6016_v42 }
0x1e32   :  { %v6047_v10 = vsel %vm5966_vm15, %v6046_v2, 2147483647  ;;  %v5995_v60 = vcvt.s32.f32 %v5993_v27 }
0x1e33   :  { %5997 = vmin.xlane.f32.xlu0 %v5996_v45  ;;  %v6049_v22 = vshra.s32 %v6047_v10, 16  ;;  %8368 = vpow2.f32 %v6017_v41 }
0x1e35   :  { %v6051_v30 = vcvt.s32.f32 %v6049_v22 }
0x1e37   :  { %6052 = vmin.xlane.f32.xlu0 %v6051_v30 }
0x1e39   :  { %v8367_v62 = vpop.eup %8366 }
0x1e3a   :  { %v5973_v61 = vsel %vm5966_vm15, %v8367_v62, 0.0 }
0x1e3b   :  { %5974 = vadd.xlane.f32.xlu1 %v5973_v61 }
0x1e3d   :  { %v8369_v52 = vpop.eup %8368 }
0x1e3e   :  { %v6019_v15 = vsel %vm5966_vm15, %v8369_v52, 0.0 }
0x1e3f   :  { %6036 = vadd.xlane.f32.xlu1 %v6035_v28 }
0x1e4d   :  { %5980 = vperm.xlu0 %8122, %v10005_v19   ;;  %v6048_v19 = vand.u32 65535, %v6047_v10 }
0x1e4f   :  { %v6050_v48 = vcvt.s32.f32 %v6048_v19 }
0x1e6c   :  { %6020 = vadd.xlane.f32.xlu0 %v6019_v15 }
0x1ec0   :  { %v5998_v35 = vpop.xlane.xlu0 %5997 }
0x1ec1   :  { %vm5999_vm8 = vcmp.eq.f32.partialorder %v5996_v45, %v5998_v35  ;;  %v6004_v18 = vcvt.f32.s32 %v5998_v35 }
0x1ec2   :  { %v6000_v63 = vsel %vm5999_vm8, %v5995_v60, inf }
0x1ec3   :  { %v6005_v0 = vshll.u32 %v6004_v18, 16 }
0x1ec4   :  { %v6053_v12 = vpop.xlane.xlu0 %6052 }
0x1ec5   :  { %vm6054_vm9 = vcmp.eq.f32.partialorder %v6051_v30, %v6053_v12  ;;  %v6059_v21 = vcvt.f32.s32 %v6053_v12 }
0x1ec6   :  { %v6055_v40 = vsel %vm6054_vm9, %v6050_v48, inf }
0x1ec8   :  { %v5975_v47 = vpop.xlane.xlu1 %5974 }
0x1ecc   :  { %v5981_v43 = vpop.permute.xlu0 %5980  ;;  %v6037_v58 = vpop.xlane.xlu1 %6036 }
0x1ecd   :  { %vm5982_vm7 = vcmp.eq.s32.totalorder %v8613_v5, %v5981_v43  ;;  %v6039_v25 = vrot.slane %v6037_v58, 1 }
0x1ece   :  { %v5983_v56 = vsel %vm5982_vm7, %v5958_v23, 0.0 }
0x1ecf   :  { %v5984_v51 = vsel %vm5966_vm15, %v5983_v56, 0.0 }
0x1ed0   :  { %5985 = vadd.xlane.f32.xlu1 %v5984_v51 }
0x1ed4   :  { %6001 = vmin.xlane.f32.xlu1 %v6000_v63 }
0x1ed8   :  { %6056 = vmin.xlane.f32.xlu1 %v6055_v40 }
0x1ef9   :  { %v6021_v54 = vpop.xlane.xlu0 %6020 }
0x1efa   :  { %8370 = vlog2.f32 %v6021_v54 }
0x1efb   :  { %8372 = vlog2.f32 %v5975_v47 }
0x1f04   :  { %v8371_v26 = vpop.eup %8370 }
0x1f05   :  { %v8373_v50 = vpop.eup %8372  ;;  %v6023_v11 = vmul.f32 0.6931472, %v8371_v26 }
0x1f06   :  { %v5977_v31 = vmul.f32 0.6931472, %v8373_v50 }
0x1f07   :  { %v6024_v8 = vadd.f32 %v6023_v11, %v6015_v37 }
0x1f08   :  { %v5978_v36 = vadd.f32 %v5977_v31, %v10055_v38 }
0x1f09   :  { %v6041_v33 = vsub.f32 %v6024_v8, %v6039_v25 }
0x1f5d   :  { %v5986_v49 = vpop.xlane.xlu1 %5985 }
0x1f5e   :  { %v5987_v13 = vsub.f32 %v5978_v36, %v5986_v49 }
0x1f60   :  { %v6042_v29 = vadd.f32 %v6041_v33, %v5987_v13 }
0x1f61   :  { %v6002_v7 = vpop.xlane.xlu1 %6001 }
0x1f62   :  { %v6003_v20 = vcvt.f32.s32 %v6002_v7  ;;  %v6064_v24 = vmul.f32 0.5, %v6042_v29 }
0x1f64   :  { %6066 = vst.msk [vmem:[#allocation3] sm:$0x1] %vm6065_vm0, %v6064_v24  ;;  %v6006_v32 = vadd.s32 %v6005_v0, %v6003_v20 }
0x1f65   :  { %v6057_v34 = vpop.xlane.xlu1 %6056 }
0x1f66   :  { %8385 = shalt.err (!%p8382_p4)
}
0x1f67   :  { %s8386_s12 = scalar_lea.hbm %s8604_s27, 16 }
0x1f68   :  { %p8387_p5 = scmp.ne.s32.totalorder %s8604_s27, %s8386_s12  ;;  %p8390_p6 = scmp.lt.u32.totalorder %s8386_s12, %s8604_s27 }
0x1f6a   :  { %p8392_p7 = pnand %p8390_p6, %p8387_p5 }
0x1f6c   :  { %8395 = shalt.err (!%p8392_p7)
}
0x1f6d   :  { %6078 = dma.vmem_to_hbm [thread:$0]  %s6076_s24, 16, %s8604_s27, [#allocation4]   ;;  %v6060_v23 = vshll.u32 %v6059_v21, 16  ;;  %vm6007_vm10 = vcmp.eq.s32.totalorder %v8613_v5, 0  ;;  %v6058_v55 = vcvt.f32.s32 %v6057_v34  ;;  %vm6062_vm11 = vcmp.eq.s32.totalorder %v8613_v5, 1 }
0x1f6e   :  { %s8457_s7 = smov [#allocation5]   ;;  %vm6067_vm12 = vcmask 8192   ;;  %v6008_v3 = vsel %vm6007_vm10, %v6006_v32, 0 }
0x1f6f   :  { %s6085_s10 = sshll.u32 %s8457_s7, 4  ;;  %v6061_v14 = vadd.s32 %v6060_v23, %v6058_v55  ;;  %s6086_s10 = int_to_ptr.vmem [resolvable:$true] %s6085_s10 }
0x1f70   :  { %s8396_s11 = scalar_lea.vmem %s6086_s10, 16  ;;  %s8400_s15 = scalar_lea.vmem %s6086_s10, 32 }
0x1f71   :  { %v6063_v53 = vsel %vm6062_vm11, %v6061_v14, %v6008_v3  ;;  %p8397_p8 = scmp.ne.s32.totalorder %s6086_s10, %s8396_s11  ;;  %p8401_p9 = scmp.lt.s32.totalorder %s6086_s10, %s6086_s10 }
0x1f72   :  { %6068 = vst.msk [vmem:[#allocation5] sm:$0x1] %vm6067_vm12, %v6063_v53  ;;  %p8402_p10 = scmp.lt.s32.totalorder %s8400_s15, %s8396_s11 }
0x1f74   :  { %p8403_p11 = por %p8402_p10, %p8401_p9 }
0x1f76   :  { %p8404_p12 = pnand %p8403_p11, %p8397_p8 }
0x1f78   :  { %8407 = shalt.err (!%p8404_p12)
}
0x1f79   :  { %s8408_s27 = scalar_lea.hbm %s8609_s4, 16 }
0x1f7a   :  { %p8409_p13 = scmp.ne.s32.totalorder %s8609_s4, %s8408_s27  ;;  %p8412_p0 = scmp.lt.u32.totalorder %s8408_s27, %s8609_s4 }
0x1f7c   :  { %p8414_p1 = pnand %p8412_p0, %p8409_p13 }
0x1f7e   :  { %8417 = shalt.err (!%p8414_p1)
}
0x1f7f   :  { %6088 = dma.vmem_to_hbm [thread:$0]  %s6086_s10, 16, %s8609_s4, [#allocation6]  }
0x1f80   :  { %8418 = dma.done.wait [#allocation4], 16  }
0x1f81   :  { %8419 = vsyncadd [#allocation4], 4294967280 }
0x1f82   :  { %8420 = dma.done.wait [#allocation6], 16  }
0x1f83   :  { %8421 = vsyncadd [#allocation6], 4294967280 }
0x1f84   :  { %6095 = vsyncpa [#allocation4], 1 }
0x1f85   :  { %6096 = vsyncpa [#allocation6], 1 }

</bundles_post_ra>
